<compile_context>
chip_gen: v7x
topology: tpu7x:2x2x1
jax: 0.10.0
libtpu: 0.0.40
codegen_flags: <defaults>
</compile_context>

<pallas_src>
import jax
import jax.numpy as jnp
from jax.experimental import pallas as pl
from jax.experimental.pallas import tpu as pltpu


# Network constants (fixed by the PyTorch module / 32x32 input).
C0, C1, C2 = 3, 16, 8            # channels: input, conv1 out, conv2 out
H1 = W1 = 32                     # conv1 spatial
H2 = W2 = 16                     # conv2 spatial (after pool1)
H3 = W3 = 8                      # after pool2
FC_IN, FC_HID, FC_OUT = H3 * W3 * C2, 32, 2
OUT_PAD = 128                    # lane-dense output slab; sliced to FC_OUT outside


# ----------------------------------------------------------------------------
# Wrapper-side weight preprocessing (cheap XLA, hoisted by jit).
# ----------------------------------------------------------------------------
def _make_band(w_hwio, w_out):
    """Banded conv weight (kh, W*Cin, W*Cout); output cols ordered (w&1, w//2, co).

    band[ky, w_in*Cin + ci, (w%2)*(W/2*Co) + (w//2)*Co + co]
        = w_hwio[ky, w_in - w + 1, ci, co]   (zero outside the 3-tap window)
    so a 3x3 same-padded conv row becomes  sum_ky  x_rows(h+ky-1) @ band[ky]
    with input rows packed as lanes (w_in, ci).  W-padding is implicit (the
    padded columns would multiply zero band entries), only H-padding is needed.
    """
    kh, kw, ci, co = w_hwio.shape
    half = w_out // 2
    w_in = jnp.arange(w_out)[:, None]
    w_o = jnp.arange(w_out)[None, :]
    kx = w_in - w_o + (kw // 2)
    valid = (kx >= 0) & (kx < kw)
    g = w_hwio[:, jnp.clip(kx, 0, kw - 1)]             # (kh, Win, Wout, Ci, Co)
    g = g * valid[None, :, :, None, None].astype(w_hwio.dtype)
    g = jnp.transpose(g, (0, 1, 3, 2, 4))              # (kh, Win, Ci, Wout, Co)
    g = g.reshape(kh, w_out, ci, half, 2, co)          # Wout -> (w//2, w&1)
    g = jnp.transpose(g, (0, 1, 2, 4, 3, 5))           # -> (.., w&1, w//2, Co)
    return g.reshape(kh, w_out * ci, w_out * co)


# ----------------------------------------------------------------------------
# Fused kernel: conv1 + pool1 + conv2 + pool2 + fc1 + fc2.
# ----------------------------------------------------------------------------
def _net_kernel(x_ref, band1_ref, b1_ref, band2_ref, b2_ref,
                fw1_ref, fb1_ref, fw2_ref, fb2_ref, out_ref, feat_ref):
    bb = x_ref.shape[0]
    f32, bf16 = jnp.float32, jnp.bfloat16

    def conv3x3(x_rows, band_ref, h):
        """Same-padded 3x3 conv as three lane-dense bf16 MXU matmuls.

        x_rows: (bb*h, W*Cin) f32, rows ordered (b, h); band_ref bf16.
        H padding: roll the row (sublane) axis on the XLU and zero-mask the
        one per-image border row.  W padding is folded into the band.
        """
        rows = x_rows.shape[0]
        rid = jax.lax.broadcasted_iota(jnp.int32, (rows, 1), 0)
        # ky = 1: input row h (no shift, no mask).
        acc = jnp.dot(x_rows.astype(bf16), band_ref[1],
                      preferred_element_type=f32)
        # ky = 0: input row h-1 (zero for the first row of each image).
        xm = pltpu.roll(x_rows, 1, 0)
        xm = jnp.where(rid % h != 0, xm, 0.0)
        acc += jnp.dot(xm.astype(bf16), band_ref[0], preferred_element_type=f32)
        # ky = 2: input row h+1 (zero for the last row of each image).
        xp = pltpu.roll(x_rows, rows - 1, 0)
        xp = jnp.where(rid % h != h - 1, xp, 0.0)
        acc += jnp.dot(xp.astype(bf16), band_ref[2], preferred_element_type=f32)
        return acc

    def pool2x2(y, half):
        """2x2 max-pool on (rows, 2*half); lanes ordered (w&1, w//2, c)."""
        y = jnp.max(y.reshape(y.shape[0] // 2, 2, 2 * half), axis=1)  # H pool
        return jnp.maximum(y[:, :half], y[:, half:])                  # W pool

    # ---- conv1 (3->16) + tanh + 2x2 max-pool --------------------------------
    x1 = x_ref[...].reshape(bb * H1, W1 * C0)                  # (bb*32, 96)
    y1 = jnp.tanh(conv3x3(x1, band1_ref, H1) + b1_ref[...])    # (bb*32, 512)
    p1 = pool2x2(y1, (W1 // 2) * C1)                           # (bb*16, 256)

    # ---- conv2 (16->8) + tanh + 2x2 max-pool --------------------------------
    y2 = jnp.tanh(conv3x3(p1, band2_ref, H2) + b2_ref[...])    # (bb*16, 128)
    p2 = pool2x2(y2, (W2 // 2) * C2)                           # (bb*8, 64)
    p2 = p2.reshape(bb, H3, W3 * C2)                           # (bb, 8, 64)

    # ---- flatten (rows -> lanes) via a tiny VMEM scratch, then fc head ------
    for r in range(H3):
        feat_ref[:, r * (W3 * C2):(r + 1) * (W3 * C2)] = p2[:, r, :]
    feat = feat_ref[...].astype(bf16)                          # (bb, 512)
    hid = jnp.tanh(jnp.dot(feat, fw1_ref[...], preferred_element_type=f32)
                   + fb1_ref[...])                             # (bb, 32)
    out_ref[...] = (jnp.dot(hid.astype(bf16), fw2_ref[...],
                            preferred_element_type=f32) + fb2_ref[...])


# ----------------------------------------------------------------------------
# Host wrapper.
# ----------------------------------------------------------------------------
def _pick_batch_block(b):
    # bb=32 fills the MXU M dim (conv LHS M = bb*32 = 1024) while per-step VMEM
    # stays a few MiB (safe even for v7x's 64 MiB).  Keep >= 2 grid steps when
    # the batch allows so the ("parallel",) axis can split across v7x's 2 TCs.
    if b >= 64:
        return 32
    if b >= 16:
        return 8
    return b


def net_forward(x_nchw, params):
    """Forward pass matching PyTorch Net.forward; x_nchw: (B, 3, 32, 32) f32."""
    b = x_nchw.shape[0]
    bb = _pick_batch_block(b)
    n_blocks = -(-b // bb)
    b_pad = n_blocks * bb
    bf16 = jnp.bfloat16

    # NCHW -> packed rows=(b,h), lanes=(w,c) layout; pad batch to a block
    # multiple so ragged B never becomes one giant grid step.
    x = jnp.transpose(x_nchw.astype(jnp.float32), (0, 2, 3, 1))
    x = x.reshape(b, H1, W1 * C0)
    if b_pad != b:
        x = jnp.pad(x, ((0, b_pad - b), (0, 0), (0, 0)))

    band1 = _make_band(params["w1"], W1).astype(bf16)          # (3, 96, 512)
    band2 = _make_band(params["w2"], W2).astype(bf16)          # (3, 256, 128)
    b1r = jnp.tile(params["b1"], W1)[None, :]                  # (1, 512) f32
    b2r = jnp.tile(params["b2"], W2)[None, :]                  # (1, 128) f32
    # fc1: fold torch's NCHW flatten order (c*64 + h*8 + w) into the weight and
    # reorder rows to the kernel's packed (h, w, c) order, flattened to 2D.
    fw1 = params["fw1"].reshape(C2, H3, W3, FC_HID)
    fw1 = jnp.transpose(fw1, (1, 2, 0, 3)).reshape(FC_IN, FC_HID).astype(bf16)
    fb1 = params["fb1"][None, :]
    # fc2: zero-pad the output dim to 128 lanes so the final store is dense.
    fw2 = jnp.zeros((FC_HID, OUT_PAD), jnp.float32)
    fw2 = fw2.at[:, :FC_OUT].set(params["fw2"]).astype(bf16)
    fb2 = jnp.zeros((1, OUT_PAD), jnp.float32).at[:, :FC_OUT].set(params["fb2"])

    out = pl.pallas_call(
        _net_kernel,
        out_shape=jax.ShapeDtypeStruct((b_pad, OUT_PAD), jnp.float32),
        grid_spec=pltpu.PrefetchScalarGridSpec(
            num_scalar_prefetch=0,
            grid=(n_blocks,),
            in_specs=[
                pl.BlockSpec((bb, H1, W1 * C0), lambda i: (i, 0, 0)),
                pl.BlockSpec((3, W1 * C0, W1 * C1), lambda i: (0, 0, 0)),
                pl.BlockSpec((1, W1 * C1), lambda i: (0, 0)),
                pl.BlockSpec((3, W2 * C1, W2 * C2), lambda i: (0, 0, 0)),
                pl.BlockSpec((1, W2 * C2), lambda i: (0, 0)),
                pl.BlockSpec((FC_IN, FC_HID), lambda i: (0, 0)),
                pl.BlockSpec((1, FC_HID), lambda i: (0, 0)),
                pl.BlockSpec((FC_HID, OUT_PAD), lambda i: (0, 0)),
                pl.BlockSpec((1, OUT_PAD), lambda i: (0, 0)),
            ],
            out_specs=pl.BlockSpec((bb, OUT_PAD), lambda i: (i, 0)),
            scratch_shapes=[pltpu.VMEM((bb, FC_IN), jnp.float32)],  # flatten buf
        ),
        compiler_params=pltpu.CompilerParams(
            dimension_semantics=("parallel",),
            vmem_limit_bytes=32 * 1024 * 1024),
    )(x, band1, b1r, band2, b2r, fw1, fb1, fw2, fb2)
    return out[:b, :FC_OUT]


# ----------------------------------------------------------------------------
# Parameters & pure-JAX reference (for a wiring check).
# ----------------------------------------------------------------------------
def init_params(key):
    ks = jax.random.split(key, 8)
    s = 0.1
    return {
        # conv weights in HWIO = torch_w.permute(2, 3, 1, 0)
        "w1": s * jax.random.normal(ks[0], (3, 3, C0, C1), jnp.float32),
        "b1": s * jax.random.normal(ks[1], (C1,), jnp.float32),
        "w2": s * jax.random.normal(ks[2], (3, 3, C1, C2), jnp.float32),
        "b2": s * jax.random.normal(ks[3], (C2,), jnp.float32),
        # linear weights as (in, out) = torch_w.T; fc1 rows in NCHW-flat order.
        "fw1": s * jax.random.normal(ks[4], (FC_IN, FC_HID), jnp.float32),
        "fb1": s * jax.random.normal(ks[5], (FC_HID,), jnp.float32),
        "fw2": s * jax.random.normal(ks[6], (FC_HID, FC_OUT), jnp.float32),
        "fb2": s * jax.random.normal(ks[7], (FC_OUT,), jnp.float32),
    }


def _ref_pool(x):
    b, h, w, c = x.shape
    return jnp.max(x.reshape(b, h // 2, 2, w // 2, 2, c), axis=(2, 4))


def reference_forward(x_nchw, params):
    x = jnp.transpose(x_nchw.astype(jnp.float32), (0, 2, 3, 1))
    dn = ("NHWC", "HWIO", "NHWC")
    x = jax.lax.conv_general_dilated(x, params["w1"], (1, 1), ((1, 1), (1, 1)),
                                     dimension_numbers=dn)
    x = _ref_pool(jnp.tanh(x + params["b1"]))
    x = jax.lax.conv_general_dilated(x, params["w2"], (1, 1), ((1, 1), (1, 1)),
                                     dimension_numbers=dn)
    x = _ref_pool(jnp.tanh(x + params["b2"]))                # (B, 8, 8, 8) NHWC
    x = jnp.transpose(x, (0, 3, 1, 2)).reshape(x.shape[0], -1)   # NCHW flatten
    h = jnp.tanh(x @ params["fw1"] + params["fb1"])
    return h @ params["fw2"] + params["fb2"]


if __name__ == "__main__":
    key = jax.random.PRNGKey(0)
    k_x, k_p = jax.random.split(key)

    # Spatial must be 32x32 so the flatten is 8*8*8 = 512 as the module requires.
    B = 2
    x = jax.random.normal(k_x, (B, 3, 32, 32), jnp.float32)
    params = init_params(k_p)

    out = jax.block_until_ready(jax.jit(net_forward)(x, params))
    assert out.shape == (B, FC_OUT), out.shape

    # Wiring check against a pure-JAX f32 reference (tolerance sized for the
    # bf16 MXU operands; layout bugs produce O(1) errors, not O(1e-2)).
    ref = jax.block_until_ready(reference_forward(x, params))
    max_err = jnp.max(jnp.abs(out - ref))
    assert jnp.allclose(out, ref, atol=5e-2, rtol=0.0), (
        "mismatch vs reference; max abs diff =", max_err)

    print("KERNEL_OK")
</pallas_src>

<mosaic_0001>
module attributes {stable_mosaic.version = 11 : i64} {
  func.func @_net_kernel(%arg0: i32, %arg1: memref<2x32x96xf32, #tpu.memory_space<vmem>>, %arg2: memref<3x96x512xbf16, #tpu.memory_space<vmem>>, %arg3: memref<1x512xf32, #tpu.memory_space<vmem>>, %arg4: memref<3x256x128xbf16, #tpu.memory_space<vmem>>, %arg5: memref<1x128xf32, #tpu.memory_space<vmem>>, %arg6: memref<512x32xbf16, #tpu.memory_space<vmem>>, %arg7: memref<1x32xf32, #tpu.memory_space<vmem>>, %arg8: memref<32x128xbf16, #tpu.memory_space<vmem>>, %arg9: memref<1x128xf32, #tpu.memory_space<vmem>>, %arg10: memref<2x128xf32, #tpu.memory_space<vmem>>, %arg11: memref<2x512xf32, #tpu.memory_space<vmem>>) attributes {dimension_semantics = [#tpu.dimension_semantics<parallel>], iteration_bounds = array<i64: 1>, scalar_prefetch = 0 : i64, scratch_operands = 1 : i64, tpu.core_type = #tpu.core_type<tc>, window_params = [{transform_indices = @transform_0, window_bounds = array<i64: 2, 32, 96>}, {pipeline_mode = #tpu.pipeline_mode<synchronous>, transform_indices = @transform_1, window_bounds = array<i64: 3, 96, 512>}, {pipeline_mode = #tpu.pipeline_mode<synchronous>, transform_indices = @transform_2, window_bounds = array<i64: 1, 512>}, {pipeline_mode = #tpu.pipeline_mode<synchronous>, transform_indices = @transform_3, window_bounds = array<i64: 3, 256, 128>}, {pipeline_mode = #tpu.pipeline_mode<synchronous>, transform_indices = @transform_4, window_bounds = array<i64: 1, 128>}, {pipeline_mode = #tpu.pipeline_mode<synchronous>, transform_indices = @transform_5, window_bounds = array<i64: 512, 32>}, {pipeline_mode = #tpu.pipeline_mode<synchronous>, transform_indices = @transform_6, window_bounds = array<i64: 1, 32>}, {pipeline_mode = #tpu.pipeline_mode<synchronous>, transform_indices = @transform_7, window_bounds = array<i64: 32, 128>}, {pipeline_mode = #tpu.pipeline_mode<synchronous>, transform_indices = @transform_8, window_bounds = array<i64: 1, 128>}, {transform_indices = @transform_9, window_bounds = array<i64: 2, 128>}]} {
    %c0 = arith.constant 0 : index
    %c0_0 = arith.constant 0 : index
    %c0_1 = arith.constant 0 : index
    %0 = vector.load %arg1[%c0, %c0_0, %c0_1] : memref<2x32x96xf32, #tpu.memory_space<vmem>>, vector<2x32x96xf32>
    %1 = vector.shape_cast %0 : vector<2x32x96xf32> to vector<64x96xf32>
    %2 = tpu.iota {dimensions = array<i32: 0>} : vector<64x1xi32>
    %3 = arith.truncf %1 : vector<64x96xf32> to vector<64x96xbf16>
    %c1 = arith.constant 1 : index
    %c0_2 = arith.constant 0 : index
    %c0_3 = arith.constant 0 : index
    %4 = vector.load %arg2[%c1, %c0_2, %c0_3] : memref<3x96x512xbf16, #tpu.memory_space<vmem>>, vector<1x96x512xbf16>
    %5 = vector.shape_cast %4 : vector<1x96x512xbf16> to vector<96x512xbf16>
    %cst = arith.constant dense<0.000000e+00> : vector<64x512xf32>
    %6 = tpu.matmul %3, %5, %cst {dimension_numbers = #tpu.dot_dimension_numbers<[1], [0], [0], [1], [0, 0, 1, 1], [], []>} : vector<64x96xbf16>, vector<96x512xbf16>, vector<64x512xf32> -> vector<64x512xf32>
    %c1_i32 = arith.constant 1 : i32
    %7 = tpu.dynamic_rotate %1 by %c1_i32 dim 0 : vector<64x96xf32>, i32 -> vector<64x96xf32>
    %c32_i32 = arith.constant 32 : i32
    %c0_i32 = arith.constant 0 : i32
    %8 = arith.cmpi eq, %c32_i32, %c0_i32 : i32
    %c1_i32_4 = arith.constant 1 : i32
    %9 = arith.select %8, %c1_i32_4, %c32_i32 : i32
    %10 = vector.broadcast %9 : i32 to vector<64x1xi32>
    %11 = arith.remsi %2, %10 : vector<64x1xi32>
    %c0_i32_5 = arith.constant 0 : i32
    %12 = vector.broadcast %c0_i32_5 : i32 to vector<64x1xi32>
    %13 = arith.cmpi ne, %11, %12 : vector<64x1xi32>
    %c0_i32_6 = arith.constant 0 : i32
    %14 = vector.broadcast %c0_i32_6 : i32 to vector<64x1xi32>
    %15 = arith.cmpi slt, %11, %14 : vector<64x1xi32>
    %c0_i32_7 = arith.constant 0 : i32
    %16 = arith.cmpi slt, %9, %c0_i32_7 : i32
    %17 = vector.broadcast %16 : i1 to vector<64x1xi1>
    %18 = vector.broadcast %17 : vector<64x1xi1> to vector<64x1xi1>
    %19 = arith.xori %15, %18 : vector<64x1xi1>
    %20 = arith.andi %19, %13 : vector<64x1xi1>
    %21 = vector.broadcast %9 : i32 to vector<64x1xi32>
    %22 = arith.addi %11, %21 : vector<64x1xi32>
    %23 = arith.select %20, %22, %11 : vector<64x1xi1>, vector<64x1xi32>
    %c0_i32_8 = arith.constant 0 : i32
    %24 = vector.broadcast %c0_i32_8 : i32 to vector<64x1xi32>
    %25 = arith.cmpi ne, %23, %24 : vector<64x1xi32>
    %cst_9 = arith.constant 0.000000e+00 : f32
    %26 = vector.shape_cast %25 : vector<64x1xi1> to vector<64x1xi1>
    %27 = vector.broadcast %26 : vector<64x1xi1> to vector<64x96xi1>
    %28 = vector.broadcast %cst_9 : f32 to vector<64x96xf32>
    %29 = arith.select %27, %7, %28 : vector<64x96xi1>, vector<64x96xf32>
    %30 = arith.truncf %29 : vector<64x96xf32> to vector<64x96xbf16>
    %c0_10 = arith.constant 0 : index
    %c0_11 = arith.constant 0 : index
    %c0_12 = arith.constant 0 : index
    %31 = vector.load %arg2[%c0_10, %c0_11, %c0_12] : memref<3x96x512xbf16, #tpu.memory_space<vmem>>, vector<1x96x512xbf16>
    %32 = vector.shape_cast %31 : vector<1x96x512xbf16> to vector<96x512xbf16>
    %cst_13 = arith.constant dense<0.000000e+00> : vector<64x512xf32>
    %33 = tpu.matmul %30, %32, %cst_13 {dimension_numbers = #tpu.dot_dimension_numbers<[1], [0], [0], [1], [0, 0, 1, 1], [], []>} : vector<64x96xbf16>, vector<96x512xbf16>, vector<64x512xf32> -> vector<64x512xf32>
    %34 = arith.addf %6, %33 : vector<64x512xf32>
    %c63_i32 = arith.constant 63 : i32
    %35 = tpu.dynamic_rotate %1 by %c63_i32 dim 0 : vector<64x96xf32>, i32 -> vector<64x96xf32>
    %c32_i32_14 = arith.constant 32 : i32
    %c0_i32_15 = arith.constant 0 : i32
    %36 = arith.cmpi eq, %c32_i32_14, %c0_i32_15 : i32
    %c1_i32_16 = arith.constant 1 : i32
    %37 = arith.select %36, %c1_i32_16, %c32_i32_14 : i32
    %38 = vector.broadcast %37 : i32 to vector<64x1xi32>
    %39 = arith.remsi %2, %38 : vector<64x1xi32>
    %c0_i32_17 = arith.constant 0 : i32
    %40 = vector.broadcast %c0_i32_17 : i32 to vector<64x1xi32>
    %41 = arith.cmpi ne, %39, %40 : vector<64x1xi32>
    %c0_i32_18 = arith.constant 0 : i32
    %42 = vector.broadcast %c0_i32_18 : i32 to vector<64x1xi32>
    %43 = arith.cmpi slt, %39, %42 : vector<64x1xi32>
    %c0_i32_19 = arith.constant 0 : i32
    %44 = arith.cmpi slt, %37, %c0_i32_19 : i32
    %45 = vector.broadcast %44 : i1 to vector<64x1xi1>
    %46 = vector.broadcast %45 : vector<64x1xi1> to vector<64x1xi1>
    %47 = arith.xori %43, %46 : vector<64x1xi1>
    %48 = arith.andi %47, %41 : vector<64x1xi1>
    %49 = vector.broadcast %37 : i32 to vector<64x1xi32>
    %50 = arith.addi %39, %49 : vector<64x1xi32>
    %51 = arith.select %48, %50, %39 : vector<64x1xi1>, vector<64x1xi32>
    %c31_i32 = arith.constant 31 : i32
    %52 = vector.broadcast %c31_i32 : i32 to vector<64x1xi32>
    %53 = arith.cmpi ne, %51, %52 : vector<64x1xi32>
    %cst_20 = arith.constant 0.000000e+00 : f32
    %54 = vector.shape_cast %53 : vector<64x1xi1> to vector<64x1xi1>
    %55 = vector.broadcast %54 : vector<64x1xi1> to vector<64x96xi1>
    %56 = vector.broadcast %cst_20 : f32 to vector<64x96xf32>
    %57 = arith.select %55, %35, %56 : vector<64x96xi1>, vector<64x96xf32>
    %58 = arith.truncf %57 : vector<64x96xf32> to vector<64x96xbf16>
    %c2 = arith.constant 2 : index
    %c0_21 = arith.constant 0 : index
    %c0_22 = arith.constant 0 : index
    %59 = vector.load %arg2[%c2, %c0_21, %c0_22] : memref<3x96x512xbf16, #tpu.memory_space<vmem>>, vector<1x96x512xbf16>
    %60 = vector.shape_cast %59 : vector<1x96x512xbf16> to vector<96x512xbf16>
    %cst_23 = arith.constant dense<0.000000e+00> : vector<64x512xf32>
    %61 = tpu.matmul %58, %60, %cst_23 {dimension_numbers = #tpu.dot_dimension_numbers<[1], [0], [0], [1], [0, 0, 1, 1], [], []>} : vector<64x96xbf16>, vector<96x512xbf16>, vector<64x512xf32> -> vector<64x512xf32>
    %62 = arith.addf %34, %61 : vector<64x512xf32>
    %c0_24 = arith.constant 0 : index
    %c0_25 = arith.constant 0 : index
    %63 = vector.load %arg3[%c0_24, %c0_25] : memref<1x512xf32, #tpu.memory_space<vmem>>, vector<1x512xf32>
    %64 = vector.broadcast %63 : vector<1x512xf32> to vector<64x512xf32>
    %65 = arith.addf %62, %64 : vector<64x512xf32>
    %66 = math.tanh %65 : vector<64x512xf32>
    %67 = vector.shape_cast %66 : vector<64x512xf32> to vector<32x2x512xf32>
    %cst_26 = arith.constant dense<0xFF800000> : vector<32x512xf32>
    %68 = vector.multi_reduction <maximumf>, %67, %cst_26 [1] : vector<32x2x512xf32> to vector<32x512xf32>
    %69 = vector.extract_strided_slice %68 {offsets = [0, 0], sizes = [32, 256], strides = [1, 1]} : vector<32x512xf32> to vector<32x256xf32>
    %70 = vector.extract_strided_slice %68 {offsets = [0, 256], sizes = [32, 256], strides = [1, 1]} : vector<32x512xf32> to vector<32x256xf32>
    %71 = arith.maximumf %69, %70 : vector<32x256xf32>
    %72 = tpu.iota {dimensions = array<i32: 0>} : vector<32x1xi32>
    %73 = arith.truncf %71 : vector<32x256xf32> to vector<32x256xbf16>
    %c1_27 = arith.constant 1 : index
    %c0_28 = arith.constant 0 : index
    %c0_29 = arith.constant 0 : index
    %74 = vector.load %arg4[%c1_27, %c0_28, %c0_29] : memref<3x256x128xbf16, #tpu.memory_space<vmem>>, vector<1x256x128xbf16>
    %75 = vector.shape_cast %74 : vector<1x256x128xbf16> to vector<256x128xbf16>
    %cst_30 = arith.constant dense<0.000000e+00> : vector<32x128xf32>
    %76 = tpu.matmul %73, %75, %cst_30 {dimension_numbers = #tpu.dot_dimension_numbers<[1], [0], [0], [1], [0, 0, 1, 1], [], []>} : vector<32x256xbf16>, vector<256x128xbf16>, vector<32x128xf32> -> vector<32x128xf32>
    %c1_i32_31 = arith.constant 1 : i32
    %77 = tpu.dynamic_rotate %71 by %c1_i32_31 dim 0 : vector<32x256xf32>, i32 -> vector<32x256xf32>
    %c16_i32 = arith.constant 16 : i32
    %c0_i32_32 = arith.constant 0 : i32
    %78 = arith.cmpi eq, %c16_i32, %c0_i32_32 : i32
    %c1_i32_33 = arith.constant 1 : i32
    %79 = arith.select %78, %c1_i32_33, %c16_i32 : i32
    %80 = vector.broadcast %79 : i32 to vector<32x1xi32>
    %81 = arith.remsi %72, %80 : vector<32x1xi32>
    %c0_i32_34 = arith.constant 0 : i32
    %82 = vector.broadcast %c0_i32_34 : i32 to vector<32x1xi32>
    %83 = arith.cmpi ne, %81, %82 : vector<32x1xi32>
    %c0_i32_35 = arith.constant 0 : i32
    %84 = vector.broadcast %c0_i32_35 : i32 to vector<32x1xi32>
    %85 = arith.cmpi slt, %81, %84 : vector<32x1xi32>
    %c0_i32_36 = arith.constant 0 : i32
    %86 = arith.cmpi slt, %79, %c0_i32_36 : i32
    %87 = vector.broadcast %86 : i1 to vector<32x1xi1>
    %88 = vector.broadcast %87 : vector<32x1xi1> to vector<32x1xi1>
    %89 = arith.xori %85, %88 : vector<32x1xi1>
    %90 = arith.andi %89, %83 : vector<32x1xi1>
    %91 = vector.broadcast %79 : i32 to vector<32x1xi32>
    %92 = arith.addi %81, %91 : vector<32x1xi32>
    %93 = arith.select %90, %92, %81 : vector<32x1xi1>, vector<32x1xi32>
    %c0_i32_37 = arith.constant 0 : i32
    %94 = vector.broadcast %c0_i32_37 : i32 to vector<32x1xi32>
    %95 = arith.cmpi ne, %93, %94 : vector<32x1xi32>
    %cst_38 = arith.constant 0.000000e+00 : f32
    %96 = vector.shape_cast %95 : vector<32x1xi1> to vector<32x1xi1>
    %97 = vector.broadcast %96 : vector<32x1xi1> to vector<32x256xi1>
    %98 = vector.broadcast %cst_38 : f32 to vector<32x256xf32>
    %99 = arith.select %97, %77, %98 : vector<32x256xi1>, vector<32x256xf32>
    %100 = arith.truncf %99 : vector<32x256xf32> to vector<32x256xbf16>
    %c0_39 = arith.constant 0 : index
    %c0_40 = arith.constant 0 : index
    %c0_41 = arith.constant 0 : index
    %101 = vector.load %arg4[%c0_39, %c0_40, %c0_41] : memref<3x256x128xbf16, #tpu.memory_space<vmem>>, vector<1x256x128xbf16>
    %102 = vector.shape_cast %101 : vector<1x256x128xbf16> to vector<256x128xbf16>
    %cst_42 = arith.constant dense<0.000000e+00> : vector<32x128xf32>
    %103 = tpu.matmul %100, %102, %cst_42 {dimension_numbers = #tpu.dot_dimension_numbers<[1], [0], [0], [1], [0, 0, 1, 1], [], []>} : vector<32x256xbf16>, vector<256x128xbf16>, vector<32x128xf32> -> vector<32x128xf32>
    %104 = arith.addf %76, %103 : vector<32x128xf32>
    %c31_i32_43 = arith.constant 31 : i32
    %105 = tpu.dynamic_rotate %71 by %c31_i32_43 dim 0 : vector<32x256xf32>, i32 -> vector<32x256xf32>
    %c16_i32_44 = arith.constant 16 : i32
    %c0_i32_45 = arith.constant 0 : i32
    %106 = arith.cmpi eq, %c16_i32_44, %c0_i32_45 : i32
    %c1_i32_46 = arith.constant 1 : i32
    %107 = arith.select %106, %c1_i32_46, %c16_i32_44 : i32
    %108 = vector.broadcast %107 : i32 to vector<32x1xi32>
    %109 = arith.remsi %72, %108 : vector<32x1xi32>
    %c0_i32_47 = arith.constant 0 : i32
    %110 = vector.broadcast %c0_i32_47 : i32 to vector<32x1xi32>
    %111 = arith.cmpi ne, %109, %110 : vector<32x1xi32>
    %c0_i32_48 = arith.constant 0 : i32
    %112 = vector.broadcast %c0_i32_48 : i32 to vector<32x1xi32>
    %113 = arith.cmpi slt, %109, %112 : vector<32x1xi32>
    %c0_i32_49 = arith.constant 0 : i32
    %114 = arith.cmpi slt, %107, %c0_i32_49 : i32
    %115 = vector.broadcast %114 : i1 to vector<32x1xi1>
    %116 = vector.broadcast %115 : vector<32x1xi1> to vector<32x1xi1>
    %117 = arith.xori %113, %116 : vector<32x1xi1>
    %118 = arith.andi %117, %111 : vector<32x1xi1>
    %119 = vector.broadcast %107 : i32 to vector<32x1xi32>
    %120 = arith.addi %109, %119 : vector<32x1xi32>
    %121 = arith.select %118, %120, %109 : vector<32x1xi1>, vector<32x1xi32>
    %c15_i32 = arith.constant 15 : i32
    %122 = vector.broadcast %c15_i32 : i32 to vector<32x1xi32>
    %123 = arith.cmpi ne, %121, %122 : vector<32x1xi32>
    %cst_50 = arith.constant 0.000000e+00 : f32
    %124 = vector.shape_cast %123 : vector<32x1xi1> to vector<32x1xi1>
    %125 = vector.broadcast %124 : vector<32x1xi1> to vector<32x256xi1>
    %126 = vector.broadcast %cst_50 : f32 to vector<32x256xf32>
    %127 = arith.select %125, %105, %126 : vector<32x256xi1>, vector<32x256xf32>
    %128 = arith.truncf %127 : vector<32x256xf32> to vector<32x256xbf16>
    %c2_51 = arith.constant 2 : index
    %c0_52 = arith.constant 0 : index
    %c0_53 = arith.constant 0 : index
    %129 = vector.load %arg4[%c2_51, %c0_52, %c0_53] : memref<3x256x128xbf16, #tpu.memory_space<vmem>>, vector<1x256x128xbf16>
    %130 = vector.shape_cast %129 : vector<1x256x128xbf16> to vector<256x128xbf16>
    %cst_54 = arith.constant dense<0.000000e+00> : vector<32x128xf32>
    %131 = tpu.matmul %128, %130, %cst_54 {dimension_numbers = #tpu.dot_dimension_numbers<[1], [0], [0], [1], [0, 0, 1, 1], [], []>} : vector<32x256xbf16>, vector<256x128xbf16>, vector<32x128xf32> -> vector<32x128xf32>
    %132 = arith.addf %104, %131 : vector<32x128xf32>
    %c0_55 = arith.constant 0 : index
    %c0_56 = arith.constant 0 : index
    %133 = vector.load %arg5[%c0_55, %c0_56] : memref<1x128xf32, #tpu.memory_space<vmem>>, vector<1x128xf32>
    %134 = vector.broadcast %133 : vector<1x128xf32> to vector<32x128xf32>
    %135 = arith.addf %132, %134 : vector<32x128xf32>
    %136 = math.tanh %135 : vector<32x128xf32>
    %137 = vector.shape_cast %136 : vector<32x128xf32> to vector<16x2x128xf32>
    %cst_57 = arith.constant dense<0xFF800000> : vector<16x128xf32>
    %138 = vector.multi_reduction <maximumf>, %137, %cst_57 [1] : vector<16x2x128xf32> to vector<16x128xf32>
    %139 = vector.extract_strided_slice %138 {offsets = [0, 0], sizes = [16, 64], strides = [1, 1]} : vector<16x128xf32> to vector<16x64xf32>
    %140 = vector.extract_strided_slice %138 {offsets = [0, 64], sizes = [16, 64], strides = [1, 1]} : vector<16x128xf32> to vector<16x64xf32>
    %141 = arith.maximumf %139, %140 : vector<16x64xf32>
    %142 = vector.shape_cast %141 : vector<16x64xf32> to vector<2x8x64xf32>
    %143 = vector.extract_strided_slice %142 {offsets = [0, 0, 0], sizes = [2, 1, 64], strides = [1, 1, 1]} : vector<2x8x64xf32> to vector<2x1x64xf32>
    %144 = vector.shape_cast %143 : vector<2x1x64xf32> to vector<2x64xf32>
    %c0_58 = arith.constant 0 : index
    %c0_59 = arith.constant 0 : index
    %145 = vector.load %arg11[%c0_58, %c0_59] : memref<2x512xf32, #tpu.memory_space<vmem>>, vector<2x64xf32>
    tpu.vector_store %arg11[%c0_58, %c0_59], %144 {strides = array<i32>} : memref<2x512xf32, #tpu.memory_space<vmem>>, vector<2x64xf32>,
    %146 = vector.extract_strided_slice %142 {offsets = [0, 1, 0], sizes = [2, 1, 64], strides = [1, 1, 1]} : vector<2x8x64xf32> to vector<2x1x64xf32>
    %147 = vector.shape_cast %146 : vector<2x1x64xf32> to vector<2x64xf32>
    %c0_60 = arith.constant 0 : index
    %c64 = arith.constant 64 : index
    %148 = vector.load %arg11[%c0_60, %c64] : memref<2x512xf32, #tpu.memory_space<vmem>>, vector<2x64xf32>
    tpu.vector_store %arg11[%c0_60, %c64], %147 {strides = array<i32>} : memref<2x512xf32, #tpu.memory_space<vmem>>, vector<2x64xf32>,
    %149 = vector.extract_strided_slice %142 {offsets = [0, 2, 0], sizes = [2, 1, 64], strides = [1, 1, 1]} : vector<2x8x64xf32> to vector<2x1x64xf32>
    %150 = vector.shape_cast %149 : vector<2x1x64xf32> to vector<2x64xf32>
    %c0_61 = arith.constant 0 : index
    %c128 = arith.constant 128 : index
    %151 = vector.load %arg11[%c0_61, %c128] : memref<2x512xf32, #tpu.memory_space<vmem>>, vector<2x64xf32>
    tpu.vector_store %arg11[%c0_61, %c128], %150 {strides = array<i32>} : memref<2x512xf32, #tpu.memory_space<vmem>>, vector<2x64xf32>,
    %152 = vector.extract_strided_slice %142 {offsets = [0, 3, 0], sizes = [2, 1, 64], strides = [1, 1, 1]} : vector<2x8x64xf32> to vector<2x1x64xf32>
    %153 = vector.shape_cast %152 : vector<2x1x64xf32> to vector<2x64xf32>
    %c0_62 = arith.constant 0 : index
    %c192 = arith.constant 192 : index
    %154 = vector.load %arg11[%c0_62, %c192] : memref<2x512xf32, #tpu.memory_space<vmem>>, vector<2x64xf32>
    tpu.vector_store %arg11[%c0_62, %c192], %153 {strides = array<i32>} : memref<2x512xf32, #tpu.memory_space<vmem>>, vector<2x64xf32>,
    %155 = vector.extract_strided_slice %142 {offsets = [0, 4, 0], sizes = [2, 1, 64], strides = [1, 1, 1]} : vector<2x8x64xf32> to vector<2x1x64xf32>
    %156 = vector.shape_cast %155 : vector<2x1x64xf32> to vector<2x64xf32>
    %c0_63 = arith.constant 0 : index
    %c256 = arith.constant 256 : index
    %157 = vector.load %arg11[%c0_63, %c256] : memref<2x512xf32, #tpu.memory_space<vmem>>, vector<2x64xf32>
    tpu.vector_store %arg11[%c0_63, %c256], %156 {strides = array<i32>} : memref<2x512xf32, #tpu.memory_space<vmem>>, vector<2x64xf32>,
    %158 = vector.extract_strided_slice %142 {offsets = [0, 5, 0], sizes = [2, 1, 64], strides = [1, 1, 1]} : vector<2x8x64xf32> to vector<2x1x64xf32>
    %159 = vector.shape_cast %158 : vector<2x1x64xf32> to vector<2x64xf32>
    %c0_64 = arith.constant 0 : index
    %c320 = arith.constant 320 : index
    %160 = vector.load %arg11[%c0_64, %c320] : memref<2x512xf32, #tpu.memory_space<vmem>>, vector<2x64xf32>
    tpu.vector_store %arg11[%c0_64, %c320], %159 {strides = array<i32>} : memref<2x512xf32, #tpu.memory_space<vmem>>, vector<2x64xf32>,
    %161 = vector.extract_strided_slice %142 {offsets = [0, 6, 0], sizes = [2, 1, 64], strides = [1, 1, 1]} : vector<2x8x64xf32> to vector<2x1x64xf32>
    %162 = vector.shape_cast %161 : vector<2x1x64xf32> to vector<2x64xf32>
    %c0_65 = arith.constant 0 : index
    %c384 = arith.constant 384 : index
    %163 = vector.load %arg11[%c0_65, %c384] : memref<2x512xf32, #tpu.memory_space<vmem>>, vector<2x64xf32>
    tpu.vector_store %arg11[%c0_65, %c384], %162 {strides = array<i32>} : memref<2x512xf32, #tpu.memory_space<vmem>>, vector<2x64xf32>,
    %164 = vector.extract_strided_slice %142 {offsets = [0, 7, 0], sizes = [2, 1, 64], strides = [1, 1, 1]} : vector<2x8x64xf32> to vector<2x1x64xf32>
    %165 = vector.shape_cast %164 : vector<2x1x64xf32> to vector<2x64xf32>
    %c0_66 = arith.constant 0 : index
    %c448 = arith.constant 448 : index
    %166 = vector.load %arg11[%c0_66, %c448] : memref<2x512xf32, #tpu.memory_space<vmem>>, vector<2x64xf32>
    tpu.vector_store %arg11[%c0_66, %c448], %165 {strides = array<i32>} : memref<2x512xf32, #tpu.memory_space<vmem>>, vector<2x64xf32>,
    %c0_67 = arith.constant 0 : index
    %c0_68 = arith.constant 0 : index
    %167 = vector.load %arg11[%c0_67, %c0_68] : memref<2x512xf32, #tpu.memory_space<vmem>>, vector<2x512xf32>
    %168 = arith.truncf %167 : vector<2x512xf32> to vector<2x512xbf16>
    %c0_69 = arith.constant 0 : index
    %c0_70 = arith.constant 0 : index
    %169 = vector.load %arg6[%c0_69, %c0_70] : memref<512x32xbf16, #tpu.memory_space<vmem>>, vector<512x32xbf16>
    %cst_71 = arith.constant dense<0.000000e+00> : vector<2x32xf32>
    %170 = tpu.matmul %168, %169, %cst_71 {dimension_numbers = #tpu.dot_dimension_numbers<[1], [0], [0], [1], [0, 0, 1, 1], [], []>} : vector<2x512xbf16>, vector<512x32xbf16>, vector<2x32xf32> -> vector<2x32xf32>
    %c0_72 = arith.constant 0 : index
    %c0_73 = arith.constant 0 : index
    %171 = vector.load %arg7[%c0_72, %c0_73] : memref<1x32xf32, #tpu.memory_space<vmem>>, vector<1x32xf32>
    %172 = vector.broadcast %171 : vector<1x32xf32> to vector<2x32xf32>
    %173 = arith.addf %170, %172 : vector<2x32xf32>
    %174 = math.tanh %173 : vector<2x32xf32>
    %175 = arith.truncf %174 : vector<2x32xf32> to vector<2x32xbf16>
    %c0_74 = arith.constant 0 : index
    %c0_75 = arith.constant 0 : index
    %176 = vector.load %arg8[%c0_74, %c0_75] : memref<32x128xbf16, #tpu.memory_space<vmem>>, vector<32x128xbf16>
    %cst_76 = arith.constant dense<0.000000e+00> : vector<2x128xf32>
    %177 = tpu.matmul %175, %176, %cst_76 {dimension_numbers = #tpu.dot_dimension_numbers<[1], [0], [0], [1], [0, 0, 1, 1], [], []>} : vector<2x32xbf16>, vector<32x128xbf16>, vector<2x128xf32> -> vector<2x128xf32>
    %c0_77 = arith.constant 0 : index
    %c0_78 = arith.constant 0 : index
    %178 = vector.load %arg9[%c0_77, %c0_78] : memref<1x128xf32, #tpu.memory_space<vmem>>, vector<1x128xf32>
    %179 = vector.broadcast %178 : vector<1x128xf32> to vector<2x128xf32>
    %180 = arith.addf %177, %179 : vector<2x128xf32>
    %c0_79 = arith.constant 0 : index
    %c0_80 = arith.constant 0 : index
    %181 = vector.load %arg10[%c0_79, %c0_80] : memref<2x128xf32, #tpu.memory_space<vmem>>, vector<2x128xf32>
    tpu.vector_store %arg10[%c0_79, %c0_80], %180 {strides = array<i32>} : memref<2x128xf32, #tpu.memory_space<vmem>>, vector<2x128xf32>,
    return
  }
  func.func @transform_0(%arg0: i32) -> (i32, i32, i32) {
    %c0_i32 = arith.constant 0 : i32
    %c0_i32_0 = arith.constant 0 : i32
    %c0_i32_1 = arith.constant 0 : i32
    return %arg0, %c0_i32, %c0_i32_0 : i32, i32, i32
  }
  func.func @transform_1(%arg0: i32) -> (i32, i32, i32) {
    %c0_i32 = arith.constant 0 : i32
    %c0_i32_0 = arith.constant 0 : i32
    %c0_i32_1 = arith.constant 0 : i32
    %c0_i32_2 = arith.constant 0 : i32
    return %c0_i32, %c0_i32_0, %c0_i32_1 : i32, i32, i32
  }
  func.func @transform_2(%arg0: i32) -> (i32, i32) {
    %c0_i32 = arith.constant 0 : i32
    %c0_i32_0 = arith.constant 0 : i32
    %c0_i32_1 = arith.constant 0 : i32
    return %c0_i32, %c0_i32_0 : i32, i32
  }
  func.func @transform_3(%arg0: i32) -> (i32, i32, i32) {
    %c0_i32 = arith.constant 0 : i32
    %c0_i32_0 = arith.constant 0 : i32
    %c0_i32_1 = arith.constant 0 : i32
    %c0_i32_2 = arith.constant 0 : i32
    return %c0_i32, %c0_i32_0, %c0_i32_1 : i32, i32, i32
  }
  func.func @transform_4(%arg0: i32) -> (i32, i32) {
    %c0_i32 = arith.constant 0 : i32
    %c0_i32_0 = arith.constant 0 : i32
    %c0_i32_1 = arith.constant 0 : i32
    return %c0_i32, %c0_i32_0 : i32, i32
  }
  func.func @transform_5(%arg0: i32) -> (i32, i32) {
    %c0_i32 = arith.constant 0 : i32
    %c0_i32_0 = arith.constant 0 : i32
    %c0_i32_1 = arith.constant 0 : i32
    return %c0_i32, %c0_i32_0 : i32, i32
  }
  func.func @transform_6(%arg0: i32) -> (i32, i32) {
    %c0_i32 = arith.constant 0 : i32
    %c0_i32_0 = arith.constant 0 : i32
    %c0_i32_1 = arith.constant 0 : i32
    return %c0_i32, %c0_i32_0 : i32, i32
  }
  func.func @transform_7(%arg0: i32) -> (i32, i32) {
    %c0_i32 = arith.constant 0 : i32
    %c0_i32_0 = arith.constant 0 : i32
    %c0_i32_1 = arith.constant 0 : i32
    return %c0_i32, %c0_i32_0 : i32, i32
  }
  func.func @transform_8(%arg0: i32) -> (i32, i32) {
    %c0_i32 = arith.constant 0 : i32
    %c0_i32_0 = arith.constant 0 : i32
    %c0_i32_1 = arith.constant 0 : i32
    return %c0_i32, %c0_i32_0 : i32, i32
  }
  func.func @transform_9(%arg0: i32) -> (i32, i32) {
    %c0_i32 = arith.constant 0 : i32
    %c0_i32_0 = arith.constant 0 : i32
    return %arg0, %c0_i32 : i32, i32
  }
}

</mosaic_0001>

<bundles_post_ra>
// kernel: tile.13
= control target key start
LH: loop header
LB: loop body
LE: loop exit
PB: predicated region body
PF: predicated region fallthrough
CT: control target
= control target key end

     0   :  { %s40_s0 = inlined_call_operand.vmem [shape: f32[16], index: 0, kind: input, shape index: {}]   ;;  %s41_s1 = inlined_call_operand.vmem [shape: f32[32,16], index: 1, kind: output, shape index: {}]  }
   0x1   :  { %v4_v0 = vld [vmem:[%s40_s0] ss:$0 sm:$0xff] }
   0x2   :  { %5 = vst [vmem:[%s41_s1] sm:$0xff] %v4_v0  ;;  %12 = vst [vmem:[%s41_s1 + $0x8] sm:$0xff] %v4_v0 }
   0x3   :  { %13 = vst [vmem:[%s41_s1 + $0x10] sm:$0xff] %v4_v0  ;;  %14 = vst [vmem:[%s41_s1 + $0x18] sm:$0xff] %v4_v0 }

// kernel: tile.14
= control target key start
LH: loop header
LB: loop body
LE: loop exit
PB: predicated region body
PF: predicated region fallthrough
CT: control target
= control target key end

     0   :  { %s89_s8 = smov 112   ;;  %s90_s11 = smov 80   ;;  %vm3_vm0 = vcmask 130048   ;;  %vm9_vm1 = vcmask 1048448   ;;  %vm15_vm2 = vcmask 917248   ;;  %vm21_vm3 = vcmask 786048   ;;  %s142_s0 = inlined_call_operand.vmem [shape: f32[32,16], index: 0, kind: input, shape index: {}]   ;;  %s143_s1 = inlined_call_operand.vmem [shape: f32[1,512], index: 1, kind: output, shape index: {}]  }
   0x1   :  { %v72_v0 = vld [vmem:[%s142_s0 + $0x7] ss:$8 sm:$0xf]   ;;  %v74_v1 = vld [vmem:[%s142_s0 + $0x5] ss:$8 sm:$0xf]  }
   0x2   :  { %7 = vrot.lane.b32.xlu0 %v72_v0, %s89_s8  ;;  %19 = vrot.lane.b32.xlu1 %v74_v1, %s90_s11  ;;  %v73_v2 = vld [vmem:[%s142_s0 + $0x6] ss:$8 sm:$0xf]   ;;  %v75_v3 = vld [vmem:[%s142_s0 + $0x4] ss:$8 sm:$0xf]  }
   0x3   :  { %s91_s16 = smov 96   ;;  %v2_v4 = vld [vmem:[%s142_s0] ss:$8 sm:$0xf]   ;;  %s92_s19 = smov 64   ;;  %vm27_vm4 = vcmask 654848  }
   0x4   :  { %v76_v5 = vld [vmem:[%s142_s0 + $0x3] ss:$8 sm:$0xf]   ;;  %4 = vst.msk [vmem:[#allocation0] ss:$8 sm:$0xf] %vm3_vm0, %v2_v4  }
   0x5   :  { %v77_v6 = vld [vmem:[%s142_s0 + $0x2] ss:$8 sm:$0xf]   ;;  %s93_s24 = smov 48   ;;  %s94_s25 = smov 32   ;;  %vm33_vm5 = vcmask 523648  }
   0x6   :  { %13 = vrot.lane.b32.xlu0 %v73_v2, %s91_s16  ;;  %25 = vrot.lane.b32.xlu1 %v75_v3, %s92_s19  ;;  %v78_v7 = vld [vmem:[%s142_s0 + $0x1] ss:$8 sm:$0xf]   ;;  %s95_s0 = smov 16   ;;  %vm39_vm6 = vcmask 392448   ;;  %vm45_vm7 = vcmask 261248  }
   0xa   :  { %31 = vrot.lane.b32.xlu0 %v76_v5, %s93_s24  ;;  %37 = vrot.lane.b32.xlu1 %v77_v6, %s94_s25 }
   0xe   :  { %43 = vrot.lane.b32.xlu0 %v78_v7, %s95_s0 }
  0x74   :  { %v8_v8 = vpop.permute.xlu0 %7   ;;  %v20_v9 = vpop.permute.xlu1 %19  }
  0x75   :  { %10 = vst.msk [vmem:[#allocation0] ss:$8 sm:$0xf] %vm9_vm1, %v8_v8  }
  0x78   :  { %v14_v10 = vpop.permute.xlu0 %13   ;;  %v26_v11 = vpop.permute.xlu1 %25  }
  0x79   :  { %16 = vst.msk [vmem:[#allocation0] ss:$8 sm:$0xf] %vm15_vm2, %v14_v10  }
  0x7a   :  { %22 = vst.msk [vmem:[#allocation0] ss:$8 sm:$0xf] %vm21_vm3, %v20_v9  }
  0x7b   :  { %28 = vst.msk [vmem:[#allocation0] ss:$8 sm:$0xf] %vm27_vm4, %v26_v11  }
  0x7c   :  { %v32_v12 = vpop.permute.xlu0 %31   ;;  %v38_v13 = vpop.permute.xlu1 %37  }
  0x7d   :  { %34 = vst.msk [vmem:[#allocation0] ss:$8 sm:$0xf] %vm33_vm5, %v32_v12  }
  0x7e   :  { %40 = vst.msk [vmem:[#allocation0] ss:$8 sm:$0xf] %vm39_vm6, %v38_v13  }
  0x80   :  { %v44_v14 = vpop.permute.xlu0 %43  }
  0x81   :  { %46 = vst.msk [vmem:[#allocation0] ss:$8 sm:$0xf] %vm45_vm7, %v44_v14  }
  0x88   :  { %v50_v15 = vld [vmem:[#allocation0] sm:$0x1]  ;;  %v54_v16 = vld [vmem:[#allocation0 + $0x8] sm:$0x1]  ;;  %v59_v17 = vld [vmem:[#allocation0 + $0x10] sm:$0x1] }
  0x89   :  { %52 = vst [vmem:[%s143_s1] sm:$0x1] %v50_v15  ;;  %79 = vst [vmem:[%s143_s1 + $0x1] sm:$0x1] %v54_v16  ;;  %v65_v18 = vld [vmem:[#allocation0 + $0x18] sm:$0x1] }
  0x8a   :  { %80 = vst [vmem:[%s143_s1 + $0x2] sm:$0x1] %v59_v17  ;;  %81 = vst [vmem:[%s143_s1 + $0x3] sm:$0x1] %v65_v18 }

// kernel: tile.18
= control target key start
LH: loop header
LB: loop body
LE: loop exit
PB: predicated region body
PF: predicated region fallthrough
CT: control target
= control target key end

     0   :  { %s28_s0 = inlined_call_operand.vmem [shape: f32[8], index: 0, kind: input, shape index: {}]   ;;  %s29_s1 = inlined_call_operand.vmem [shape: f32[16,8], index: 1, kind: output, shape index: {}]  }
   0x1   :  { %v4_v0 = vld [vmem:[%s28_s0] ss:$0 sm:$0xff] }
   0x2   :  { %5 = vst [vmem:[%s29_s1] sm:$0xff] %v4_v0  ;;  %8 = vst [vmem:[%s29_s1 + $0x8] sm:$0xff] %v4_v0 }

// kernel: tile.19
= control target key start
LH: loop header
LB: loop body
LE: loop exit
PB: predicated region body
PF: predicated region fallthrough
CT: control target
= control target key end

     0   :  { %s131_s10 = smov 120   ;;  %s132_s11 = smov 104   ;;  %vm3_vm0 = vcmask 64512   ;;  %vm9_vm1 = vcmask 1048512   ;;  %vm15_vm2 = vcmask 982912   ;;  %vm21_vm3 = vcmask 917312   ;;  %s207_s0 = inlined_call_operand.vmem [shape: f32[16,8], index: 0, kind: input, shape index: {}]   ;;  %s208_s1 = inlined_call_operand.vmem [shape: f32[1,128], index: 1, kind: output, shape index: {}]  }
   0x1   :  { %v101_v0 = vld [vmem:[%s207_s0 + $0xf] sm:$0x1]   ;;  %v103_v1 = vld [vmem:[%s207_s0 + $0xd] sm:$0x1]   ;;  %v102_v2 = vld [vmem:[%s207_s0 + $0xe] sm:$0x1]  }
   0x2   :  { %7 = vrot.lane.b32.xlu0 %v101_v0, %s131_s10  ;;  %19 = vrot.lane.b32.xlu1 %v103_v1, %s132_s11  ;;  %v104_v3 = vld [vmem:[%s207_s0 + $0xc] sm:$0x1]   ;;  %s133_s16 = smov 112   ;;  %s134_s17 = smov 96   ;;  %v105_v4 = vld [vmem:[%s207_s0 + $0xb] sm:$0x1]  }
   0x3   :  { %v106_v5 = vld [vmem:[%s207_s0 + $0xa] sm:$0x1]   ;;  %v2_v6 = vld [vmem:[%s207_s0] sm:$0x1]   ;;  %s135_s24 = smov 88   ;;  %s136_s25 = smov 80  }
   0x4   :  { %4 = vst.msk [vmem:[#allocation0] sm:$0x1] %vm3_vm0, %v2_v6   ;;  %v107_v7 = vld [vmem:[%s207_s0 + $0x9] sm:$0x1]   ;;  %v108_v8 = vld [vmem:[%s207_s0 + $0x8] sm:$0x1]  }
   0x5   :  { %s137_s30 = smov 72   ;;  %s138_s2 = smov 64   ;;  %v109_v9 = vld [vmem:[%s207_s0 + $0x7] sm:$0x1]   ;;  %v110_v10 = vld [vmem:[%s207_s0 + $0x6] sm:$0x1]  }
   0x6   :  { %13 = vrot.lane.b32.xlu0 %v102_v2, %s133_s16  ;;  %25 = vrot.lane.b32.xlu1 %v104_v3, %s134_s17  ;;  %s139_s7 = smov 56   ;;  %s140_s8 = smov 48   ;;  %v111_v11 = vld [vmem:[%s207_s0 + $0x5] sm:$0x1]   ;;  %v112_v12 = vld [vmem:[%s207_s0 + $0x4] sm:$0x1]  }
   0x7   :  { %s141_s13 = smov 40   ;;  %s142_s14 = smov 32   ;;  %v113_v13 = vld [vmem:[%s207_s0 + $0x3] sm:$0x1]   ;;  %v114_v14 = vld [vmem:[%s207_s0 + $0x2] sm:$0x1]  }
   0x8   :  { %s143_s19 = smov 24   ;;  %s144_s20 = smov 16   ;;  %v115_v15 = vld [vmem:[%s207_s0 + $0x1] sm:$0x1]   ;;  %vm27_vm4 = vcmask 851712   ;;  %vm33_vm5 = vcmask 786112  }
   0x9   :  { %s145_s0 = smov 8   ;;  %vm39_vm6 = vcmask 720512   ;;  %vm45_vm7 = vcmask 654912   ;;  %vm51_vm8 = vcmask 589312   ;;  %vm57_vm9 = vcmask 523712  }
   0xa   :  { %31 = vrot.lane.b32.xlu0 %v105_v4, %s135_s24  ;;  %37 = vrot.lane.b32.xlu1 %v106_v5, %s136_s25  ;;  %vm63_vm10 = vcmask 458112   ;;  %vm69_vm11 = vcmask 392512   ;;  %vm75_vm12 = vcmask 326912   ;;  %vm81_vm13 = vcmask 261312  }
   0xb   :  { %vm87_vm14 = vcmask 195712   ;;  %vm93_vm15 = vcmask 130112  }
   0xe   :  { %43 = vrot.lane.b32.xlu0 %v107_v7, %s137_s30  ;;  %49 = vrot.lane.b32.xlu1 %v108_v8, %s138_s2 }
  0x12   :  { %55 = vrot.lane.b32.xlu0 %v109_v9, %s139_s7  ;;  %61 = vrot.lane.b32.xlu1 %v110_v10, %s140_s8 }
  0x16   :  { %67 = vrot.lane.b32.xlu0 %v111_v11, %s141_s13  ;;  %73 = vrot.lane.b32.xlu1 %v112_v12, %s142_s14 }
  0x1a   :  { %79 = vrot.lane.b32.xlu0 %v113_v13, %s143_s19  ;;  %85 = vrot.lane.b32.xlu1 %v114_v14, %s144_s20 }
  0x1e   :  { %91 = vrot.lane.b32.xlu0 %v115_v15, %s145_s0 }
  0x74   :  { %v8_v16 = vpop.permute.xlu0 %7   ;;  %v20_v17 = vpop.permute.xlu1 %19  }
  0x75   :  { %10 = vst.msk [vmem:[#allocation0] sm:$0x1] %vm9_vm1, %v8_v16  }
  0x78   :  { %v14_v18 = vpop.permute.xlu0 %13   ;;  %v26_v19 = vpop.permute.xlu1 %25  }
  0x79   :  { %16 = vst.msk [vmem:[#allocation0] sm:$0x1] %vm15_vm2, %v14_v18  }
  0x7a   :  { %22 = vst.msk [vmem:[#allocation0] sm:$0x1] %vm21_vm3, %v20_v17  }
  0x7b   :  { %28 = vst.msk [vmem:[#allocation0] sm:$0x1] %vm27_vm4, %v26_v19  }
  0x7c   :  { %v32_v20 = vpop.permute.xlu0 %31   ;;  %v38_v21 = vpop.permute.xlu1 %37  }
  0x7d   :  { %34 = vst.msk [vmem:[#allocation0] sm:$0x1] %vm33_vm5, %v32_v20  }
  0x7e   :  { %40 = vst.msk [vmem:[#allocation0] sm:$0x1] %vm39_vm6, %v38_v21  }
  0x80   :  { %v44_v22 = vpop.permute.xlu0 %43   ;;  %v50_v23 = vpop.permute.xlu1 %49  }
  0x81   :  { %46 = vst.msk [vmem:[#allocation0] sm:$0x1] %vm45_vm7, %v44_v22  }
  0x82   :  { %52 = vst.msk [vmem:[#allocation0] sm:$0x1] %vm51_vm8, %v50_v23  }
  0x84   :  { %v56_v24 = vpop.permute.xlu0 %55   ;;  %v62_v25 = vpop.permute.xlu1 %61  }
  0x85   :  { %58 = vst.msk [vmem:[#allocation0] sm:$0x1] %vm57_vm9, %v56_v24  }
  0x86   :  { %64 = vst.msk [vmem:[#allocation0] sm:$0x1] %vm63_vm10, %v62_v25  }
  0x88   :  { %v68_v26 = vpop.permute.xlu0 %67   ;;  %v74_v27 = vpop.permute.xlu1 %73  }
  0x89   :  { %70 = vst.msk [vmem:[#allocation0] sm:$0x1] %vm69_vm11, %v68_v26  }
  0x8a   :  { %76 = vst.msk [vmem:[#allocation0] sm:$0x1] %vm75_vm12, %v74_v27  }
  0x8c   :  { %v80_v28 = vpop.permute.xlu0 %79   ;;  %v86_v29 = vpop.permute.xlu1 %85  }
  0x8d   :  { %82 = vst.msk [vmem:[#allocation0] sm:$0x1] %vm81_vm13, %v80_v28  }
  0x8e   :  { %88 = vst.msk [vmem:[#allocation0] sm:$0x1] %vm87_vm14, %v86_v29  }
  0x90   :  { %v92_v30 = vpop.permute.xlu0 %91  }
  0x91   :  { %94 = vst.msk [vmem:[#allocation0] sm:$0x1] %vm93_vm15, %v92_v30  }
  0x98   :  { %v98_v31 = vld [vmem:[#allocation0] sm:$0x1] }
  0x99   :  { %100 = vst [vmem:[%s208_s1] sm:$0x1] %v98_v31 }

// kernel: net_forward.1
= control target key start
LH: loop header
LB: loop body
LE: loop exit
PB: predicated region body
PF: predicated region fallthrough
CT: control target
= control target key end

     0   :  { %v6101_v2 = vmov 0   ;;  %v42_v8 = vlaneseq  ;;  %vm373_vm3 = vcmask 785408   ;;  %s8794_s0 = inlined_call_operand.vmem [shape: f32[2,32,96], index: 0, kind: input, shape index: {}]   ;;  %s8795_s1 = inlined_call_operand.vmem [shape: bf16[3,96,512], index: 1, kind: input, shape index: {}]   ;;  %s8796_s2 = inlined_call_operand.vmem [shape: f32[1,512], index: 2, kind: input, shape index: {}]   ;;  %s8797_s3 = inlined_call_operand.vmem [shape: bf16[3,256,128], index: 3, kind: input, shape index: {}]   ;;  %s8798_s4 = inlined_call_operand.vmem [shape: f32[1,128], index: 4, kind: input, shape index: {}]   ;;  %s8799_s5 = inlined_call_operand.vmem [shape: bf16[512,32], index: 5, kind: input, shape index: {}]   ;;  %s8800_s6 = inlined_call_operand.vmem [shape: f32[1,32], index: 6, kind: input, shape index: {}]   ;;  %s8801_s7 = inlined_call_operand.vmem [shape: bf16[32,128], index: 7, kind: input, shape index: {}]   ;;  %s8802_s8 = inlined_call_operand.vmem [shape: f32[1,128], index: 8, kind: input, shape index: {}]   ;;  %s8803_s9 = inlined_call_operand.hbm [shape: f32[2,128], index: 9, kind: output, shape index: {}]  }
   0x1   :  { %v5812_v0 = vld [vmem:[%s8795_s1 + $0x4] ss:$16 sps:$4 sm:$0xff]   ;;  %v5814_v1 = vld [vmem:[%s8795_s1 + $0xc] ss:$16 sps:$4 sm:$0xff]   ;;  %418 = vmatprep.mubr.bf16.mxu0 %v6101_v2  ;;  %491 = vmatprep.mubr.bf16.mxu1 %v6101_v2  ;;  %v5816_v3 = vld [vmem:[%s8795_s1] ss:$16 sps:$4 sm:$0xff]  }
   0x2   :  { %386 = vmatprep.subr.bf16.mxu0 %v5812_v0  ;;  %v5817_v4 = vld [vmem:[%s8795_s1 + $0x8] ss:$16 sps:$4 sm:$0xff]   ;;  %459 = vmatprep.subr.bf16.mxu1 %v5814_v1  ;;  %v5818_v5 = vld [vmem:[%s8795_s1 + $0x24] ss:$16 sps:$4 sm:$0xff]   ;;  %v5820_v6 = vld [vmem:[%s8795_s1 + $0x2c] ss:$16 sps:$4 sm:$0xff]  }
   0x3   :  { %387 = vmatpush1.bf16.msra.mxu0 %v5816_v3  ;;  %460 = vmatpush1.bf16.msra.mxu1 %v5817_v4  ;;  %v5822_v7 = vld [vmem:[%s8795_s1 + $0x20] ss:$16 sps:$4 sm:$0xff]   ;;  %v5823_v9 = vld [vmem:[%s8795_s1 + $0x28] ss:$16 sps:$4 sm:$0xff]   ;;  %v5824_v10 = vld [vmem:[%s8795_s1 + $0x44] ss:$16 sps:$4 sm:$0xff]  }
   0x4   :  { %388 = vmatprep.subr.bf16.mxu0 %v5818_v5  ;;  %461 = vmatprep.subr.bf16.mxu1 %v5820_v6  ;;  %v5826_v11 = vld [vmem:[%s8795_s1 + $0x4c] ss:$16 sps:$4 sm:$0xff]   ;;  %v5828_v12 = vld [vmem:[%s8795_s1 + $0x40] ss:$16 sps:$4 sm:$0xff]   ;;  %v5829_v13 = vld [vmem:[%s8795_s1 + $0x48] ss:$16 sps:$4 sm:$0xff]  }
   0x5   :  { %v5830_v14 = vld [vmem:[%s8795_s1 + $0x64] ss:$16 sps:$4 sm:$0xff]   ;;  %v6199_v15 = vshrl.u32 %v42_v8, 7  ;;  %v5832_v16 = vld [vmem:[%s8795_s1 + $0x6c] ss:$16 sps:$4 sm:$0xff]  }
   0x6   :  { %v5834_v17 = vld [vmem:[%s8795_s1 + $0x60] ss:$16 sps:$4 sm:$0xff]   ;;  %v5835_v18 = vld [vmem:[%s8795_s1 + $0x68] ss:$16 sps:$4 sm:$0xff]   ;;  %v5836_v19 = vld [vmem:[%s8795_s1 + $0x84] ss:$16 sps:$4 sm:$0xff]  }
   0x7   :  { %389 = vmatpush1.bf16.msra.mxu0 %v5822_v7  ;;  %462 = vmatpush1.bf16.msra.mxu1 %v5823_v9  ;;  %8938 = vst [vmem:[#allocation6_spill] sm:$0xff] %v6199_v15  ;;  %v101_v20 = vand.u32 31, %v6199_v15  ;;  %v5838_v21 = vld [vmem:[%s8795_s1 + $0x8c] ss:$16 sps:$4 sm:$0xff]   ;;  %v5840_v22 = vld [vmem:[%s8795_s1 + $0x80] ss:$16 sps:$4 sm:$0xff]  }
   0x8   :  { %390 = vmatprep.subr.bf16.mxu0 %v5824_v10  ;;  %463 = vmatprep.subr.bf16.mxu1 %v5826_v11  ;;  %v5841_v23 = vld [vmem:[%s8795_s1 + $0x88] ss:$16 sps:$4 sm:$0xff]   ;;  %v5842_v24 = vld [vmem:[%s8795_s1 + $0xa4] ss:$16 sps:$4 sm:$0xff]   ;;  %v5844_v25 = vld [vmem:[%s8795_s1 + $0xac] ss:$16 sps:$4 sm:$0xff]  }
   0x9   :  { %v6232_v26 = vld [vmem:[%s8794_s0] sm:$0xff]  ;;  %v6237_v27 = vld [vmem:[%s8794_s0 + $0x8] sm:$0xff]  ;;  %v6242_v28 = vld [vmem:[%s8794_s0 + $0x38] sm:$0xff]  ;;  %vm88_vm0 = vcmp.lt.s32.totalorder %v6199_v15, 1  ;;  %vm6245_vm1 = vcmp.ne.s32.totalorder %v101_v20, 0  ;;  %vm818_vm2 = vcmp.lt.s32.totalorder %v6199_v15, 7 }
   0xa   :  { %v80_v30 = vrot.slane %v6232_v26, 7  ;;  %v81_v31 = vrot.slane %v6237_v27, 7  ;;  %v87_v32 = vrot.slane %v6242_v28, 7  ;;  %v810_v33 = vrot.slane %v6232_v26, 1  ;;  %v5846_v35 = vld [vmem:[%s8795_s1 + $0xa0] ss:$16 sps:$4 sm:$0xff]  }
   0xb   :  { %391 = vmatpush1.bf16.msra.mxu0 %v5828_v12  ;;  %464 = vmatpush1.bf16.msra.mxu1 %v5829_v13  ;;  %v811_v34 = vrot.slane %v6237_v27, 1  ;;  %v5847_v36 = vld [vmem:[%s8795_s1 + $0xa8] ss:$16 sps:$4 sm:$0xff]   ;;  %v817_v38 = vrot.slane %v6242_v28, 1  ;;  %v5850_v41 = vld [vmem:[%s8795_s1 + $0xc4] ss:$16 sps:$4 sm:$0xff]  }
   0xc   :  { %392 = vmatprep.subr.bf16.mxu0 %v5830_v14  ;;  %465 = vmatprep.subr.bf16.mxu1 %v5832_v16  ;;  %v96_v37 = vsel %vm88_vm0, %v87_v32, %v80_v30  ;;  %v95_v39 = vsel %vm88_vm0, %v80_v30, %v81_v31  ;;  %v5853_v43 = vld [vmem:[%s8795_s1 + $0xcc] ss:$16 sps:$4 sm:$0xff]   ;;  %v5848_v45 = vld [vmem:[%s8795_s1 + $0xc0] ss:$16 sps:$4 sm:$0xff]   ;;  %v50_v47 = vadd.s32 56, %v6199_v15  ;;  %v47_v56 = vadd.s32 32, %v6199_v15 }
   0xd   :  { %v217_v40 = vsel %vm6245_vm1, %v96_v37, 0.0  ;;  %v825_v42 = vsel %vm818_vm2, %v810_v33, %v811_v34  ;;  %v6282_v44 = vsel %vm818_vm2, %v817_v38, %v810_v33  ;;  %v6290_v46 = vld [vmem:[%s8794_s0 + $0x10] sm:$0xff]  ;;  %v6296_v49 = vld [vmem:[%s8794_s0 + $0x18] sm:$0xff]  ;;  %v6321_v59 = vld [vmem:[%s8794_s0 + $0x20] sm:$0xff]  ;;  %v6409_v33 = vadd.s32 24, %v6199_v15 }
   0xe   :  { %v225_v48 = vpack.c.bf16 %v95_v39, %v217_v40  ;;  %v812_v50 = vrot.slane %v6290_v46, 1  ;;  %v5851_v51 = vld [vmem:[%s8795_s1 + $0xc8] ss:$16 sps:$4 sm:$0xff]   ;;  %v82_v52 = vrot.slane %v6290_v46, 7  ;;  %v83_v53 = vrot.slane %v6296_v49, 7  ;;  %v6368_v14 = vld [vmem:[%s8794_s0 + $0x30] sm:$0xff] }
   0xf   :  { %393 = vmatpush1.bf16.msra.mxu0 %v5834_v17  ;;  %466 = vmatpush1.bf16.msra.mxu1 %v5835_v18  ;;  %v5856_v54 = vld [vmem:[%s8795_s1 + $0xe4] ss:$16 sps:$4 sm:$0xff]   ;;  %v5859_v55 = vld [vmem:[%s8795_s1 + $0xec] ss:$16 sps:$4 sm:$0xff]   ;;  %v5854_v58 = vld [vmem:[%s8795_s1 + $0xe0] ss:$16 sps:$4 sm:$0xff]  }
  0x10   :  { %394 = vmatprep.subr.bf16.mxu0 %v5836_v19  ;;  %467 = vmatprep.subr.bf16.mxu1 %v5838_v21  ;;  %v824_v57 = vsel %vm818_vm2, %v811_v34, %v812_v50  ;;  %v150_v61 = vand.u32 31, %v50_v47  ;;  %v5857_v62 = vld [vmem:[%s8795_s1 + $0xe8] ss:$16 sps:$4 sm:$0xff]   ;;  %v93_v63 = vsel %vm88_vm0, %v82_v52, %v83_v53  ;;  %v94_v0 = vsel %vm88_vm0, %v81_v31, %v82_v52  ;;  %v5862_v1 = vld [vmem:[%s8795_s1 + $0x104] ss:$16 sps:$4 sm:$0xff]  }
  0x11   :  { %v6323_v60 = vpack.c.bf16 %v824_v57, %v825_v42  ;;  %v5865_v3 = vld [vmem:[%s8795_s1 + $0x10c] ss:$16 sps:$4 sm:$0xff]   ;;  %v84_v5 = vrot.slane %v6321_v59, 7  ;;  %v129_v6 = vand.u32 31, %v47_v56  ;;  %v226_v8 = vpack.c.bf16 %v93_v63, %v94_v0  ;;  %v5860_v9 = vld [vmem:[%s8795_s1 + $0x100] ss:$16 sps:$4 sm:$0xff]  }
  0x12   :  { %v6343_v4 = vld [vmem:[%s8794_s0 + $0x28] sm:$0xff]  ;;  %vm6348_vm4 = vcmp.ne.s32.totalorder %v150_v61, 31  ;;  %v5868_v17 = vld [vmem:[%s8795_s1 + $0x124] ss:$16 sps:$4 sm:$0xff]   ;;  %v816_v19 = vrot.slane %v6368_v14, 1  ;;  %8945 = vst [vmem:[#allocation7_spill] sm:$0xff] %v6409_v33  ;;  %v51_v57 = vpack.c.bf16 %v6237_v27, %v6232_v26 }
  0x13   :  { %395 = vmatpush1.bf16.msra.mxu0 %v5840_v22  ;;  %468 = vmatpush1.bf16.msra.mxu1 %v5841_v23  ;;  %v5863_v10 = vld [vmem:[%s8795_s1 + $0x108] ss:$16 sps:$4 sm:$0xff]   ;;  %v85_v11 = vrot.slane %v6343_v4, 7  ;;  %v92_v12 = vsel %vm88_vm0, %v83_v53, %v84_v5  ;;  %vm6361_vm5 = vcmp.ne.s32.totalorder %v129_v6, 0  ;;  %v858_v16 = vsel %vm6348_vm4, %v6282_v44, 0.0 }
  0x14   :  { %396 = vmatprep.subr.bf16.mxu0 %v5842_v24  ;;  %469 = vmatprep.subr.bf16.mxu1 %v5844_v25  ;;  %v5871_v18 = vld [vmem:[%s8795_s1 + $0x12c] ss:$16 sps:$4 sm:$0xff]   ;;  %v5866_v20 = vld [vmem:[%s8795_s1 + $0x120] ss:$16 sps:$4 sm:$0xff]   ;;  %v221_v22 = vsel %vm6361_vm5, %v92_v12, 0.0  ;;  %v819_v24 = vsel %vm818_vm2, %v816_v19, %v817_v38  ;;  %v86_v34 = vrot.slane %v6368_v14, 7 }
  0x15   :  { %v91_v21 = vsel %vm88_vm0, %v84_v5, %v85_v11  ;;  %v5869_v23 = vld [vmem:[%s8795_s1 + $0x128] ss:$16 sps:$4 sm:$0xff]   ;;  %v5874_v25 = vld [vmem:[%s8795_s1 + $0x144] ss:$16 sps:$4 sm:$0xff]   ;;  %v5877_v29 = vld [vmem:[%s8795_s1 + $0x14c] ss:$16 sps:$4 sm:$0xff]   ;;  %v6406_v30 = vpack.c.bf16 %v858_v16, %v819_v24 }
  0x16   :  { %v227_v31 = vpack.c.bf16 %v91_v21, %v221_v22  ;;  %v5880_v37 = vld [vmem:[%s8795_s1 + $0x164] ss:$16 sps:$4 sm:$0xff]   ;;  %v5883_v38 = vld [vmem:[%s8795_s1 + $0x16c] ss:$16 sps:$4 sm:$0xff]   ;;  %v122_v39 = vand.u32 31, %v6409_v33  ;;  %v813_v40 = vrot.slane %v6296_v49, 1  ;;  %v89_v42 = vsel %vm88_vm0, %v86_v34, %v87_v32 }
  0x17   :  { %397 = vmatpush1.bf16.msra.mxu0 %v5846_v35  ;;  %470 = vmatpush1.bf16.msra.mxu1 %v5847_v36  ;;  %v5872_v35 = vld [vmem:[%s8795_s1 + $0x140] ss:$16 sps:$4 sm:$0xff]   ;;  %v5875_v36 = vld [vmem:[%s8795_s1 + $0x148] ss:$16 sps:$4 sm:$0xff]   ;;  %v5886_v47 = vld [vmem:[%s8795_s1 + $0x184] ss:$16 sps:$4 sm:$0xff]   ;;  %v54_v21 = vpack.c.bf16 %v6242_v28, %v6368_v14 }
  0x18   :  { %664 = vmatprep.subr.bf16.mxu0 %v5850_v41  ;;  %737 = vmatprep.subr.bf16.mxu1 %v5853_v43  ;;  %v814_v41 = vrot.slane %v6321_v59, 1  ;;  %v90_v43 = vsel %vm88_vm0, %v85_v11, %v86_v34  ;;  %v5878_v44 = vld [vmem:[%s8795_s1 + $0x160] ss:$16 sps:$4 sm:$0xff]   ;;  %v5889_v32 = vld [vmem:[%s8795_s1 + $0x18c] ss:$16 sps:$4 sm:$0xff]   ;;  %vm6457_vm6 = vcmp.ne.s32.totalorder %v122_v39, 31  ;;  %v53_v11 = vpack.c.bf16 %v6343_v4, %v6321_v59 }
  0x19   :  { %v5887_v56 = vld [vmem:[%s8795_s1 + $0x188] ss:$16 sps:$4 sm:$0xff]   ;;  %v5895_v61 = vld [vmem:[%s8795_s1 + $0x1ac] ss:$16 sps:$4 sm:$0xff]   ;;  %v5898_v26 = vld [vmem:[%s8795_s1 + $0x1c4] ss:$16 sps:$4 sm:$0xff]   ;;  %v823_v28 = vsel %vm818_vm2, %v812_v50, %v813_v40 }
  0x1a   :  { %5300 = vmatmul.mubr.msk.bf16.vlgmr.msra.gmra.mrb[0].mxu0 %vm373_vm3, %v225_v48  ;;  %5304 = vmatmul.mubr.msk.bf16.vlgmr.msra.gmra.mrb[0].mxu1 %vm373_vm3, %v225_v48  ;;  %v228_v48 = vpack.c.bf16 %v89_v42, %v90_v43  ;;  %v5893_v63 = vld [vmem:[%s8795_s1 + $0x1a8] ss:$16 sps:$4 sm:$0xff]   ;;  %v5901_v27 = vld [vmem:[%s8795_s1 + $0x1cc] ss:$16 sps:$4 sm:$0xff]   ;;  %v5896_v0 = vld [vmem:[%s8795_s1 + $0x1c0] ss:$16 sps:$4 sm:$0xff]  }
  0x1b   :  { %665 = vmatpush1.bf16.msra.mxu0 %v5848_v45  ;;  %738 = vmatpush1.bf16.msra.mxu1 %v5851_v51  ;;  %v5881_v45 = vld [vmem:[%s8795_s1 + $0x168] ss:$16 sps:$4 sm:$0xff]   ;;  %v6455_v51 = vsel %vm818_vm2, %v813_v40, %v814_v41  ;;  %v5904_v5 = vld [vmem:[%s8795_s1 + $0x1e4] ss:$16 sps:$4 sm:$0xff]   ;;  %v5907_v6 = vld [vmem:[%s8795_s1 + $0x1ec] ss:$16 sps:$4 sm:$0xff]  }
  0x1c   :  { %666 = vmatprep.subr.bf16.mxu0 %v5856_v54  ;;  %739 = vmatprep.subr.bf16.mxu1 %v5859_v55  ;;  %v854_v53 = vsel %vm6457_vm6, %v6455_v51, 0.0  ;;  %v815_v54 = vrot.slane %v6343_v4, 1  ;;  %v5884_v55 = vld [vmem:[%s8795_s1 + $0x180] ss:$16 sps:$4 sm:$0xff]   ;;  %v5911_v13 = vld [vmem:[%s8795_s1 + $0x208] ss:$16 sps:$4 sm:$0xff]  }
  0x1d   :  { %428 = vmatprep.mubr.bf16.mxu0 %v6101_v2  ;;  %501 = vmatprep.mubr.bf16.mxu1 %v6101_v2  ;;  %v5902_v7 = vld [vmem:[%s8795_s1 + $0x1e0] ss:$16 sps:$4 sm:$0xff]   ;;  %v5916_v16 = vld [vmem:[%s8795_s1 + $0x224] ss:$16 sps:$4 sm:$0xff]   ;;  %v860_v22 = vpack.c.bf16 %v854_v53, %v823_v28 }
  0x1e   :  { %v5908_v12 = vld [vmem:[%s8795_s1 + $0x200] ss:$16 sps:$4 sm:$0xff]  }
  0x1f   :  { %667 = vmatpush1.bf16.msra.mxu0 %v5854_v58  ;;  %740 = vmatpush1.bf16.msra.mxu1 %v5857_v62  ;;  %v5892_v58 = vld [vmem:[%s8795_s1 + $0x1a4] ss:$16 sps:$4 sm:$0xff]   ;;  %v5890_v62 = vld [vmem:[%s8795_s1 + $0x1a0] ss:$16 sps:$4 sm:$0xff]  }
  0x20   :  { %668 = vmatprep.subr.bf16.mxu0 %v5862_v1  ;;  %741 = vmatprep.subr.bf16.mxu1 %v5865_v3  ;;  %v5899_v1 = vld [vmem:[%s8795_s1 + $0x1c8] ss:$16 sps:$4 sm:$0xff]   ;;  %v52_v3 = vpack.c.bf16 %v6296_v49, %v6290_v46  ;;  %v820_v46 = vsel %vm818_vm2, %v815_v54, %v816_v19  ;;  %v821_v49 = vsel %vm818_vm2, %v814_v41, %v815_v54 }
  0x21   :  { %v861_v50 = vpack.c.bf16 %v820_v46, %v821_v49 }
  0x22   :  { %5301 = vmatmul.mubr.msk.bf16.gmra.mrb[4].mxu0 %vm373_vm3, %v226_v8  ;;  %5305 = vmatmul.mubr.msk.bf16.gmra.mrb[4].mxu1 %vm373_vm3, %v226_v8  ;;  %v5905_v8 = vld [vmem:[%s8795_s1 + $0x1e8] ss:$16 sps:$4 sm:$0xff]  }
  0x23   :  { %669 = vmatpush1.bf16.msra.mxu0 %v5860_v9  ;;  %742 = vmatpush1.bf16.msra.mxu1 %v5863_v10  ;;  %v5910_v9 = vld [vmem:[%s8795_s1 + $0x204] ss:$16 sps:$4 sm:$0xff]   ;;  %v5913_v10 = vld [vmem:[%s8795_s1 + $0x20c] ss:$16 sps:$4 sm:$0xff]  }
  0x24   :  { %438 = vmatprep.mubr.bf16.mxu0 %v6101_v2  ;;  %511 = vmatprep.mubr.bf16.mxu1 %v6101_v2 }
  0x25   :  { %670 = vmatprep.subr.bf16.mxu0 %v5868_v17  ;;  %743 = vmatprep.subr.bf16.mxu1 %v5871_v18  ;;  %v5919_v17 = vld [vmem:[%s8795_s1 + $0x22c] ss:$16 sps:$4 sm:$0xff]   ;;  %v5914_v18 = vld [vmem:[%s8795_s1 + $0x220] ss:$16 sps:$4 sm:$0xff]  }
  0x27   :  { %671 = vmatpush1.bf16.msra.mxu0 %v5866_v20  ;;  %744 = vmatpush1.bf16.msra.mxu1 %v5869_v23  ;;  %v5917_v20 = vld [vmem:[%s8795_s1 + $0x228] ss:$16 sps:$4 sm:$0xff]  }
  0x28   :  { %672 = vmatprep.subr.bf16.mxu0 %v5874_v25  ;;  %745 = vmatprep.subr.bf16.mxu1 %v5877_v29 }
  0x2a   :  { %5302 = vmatmul.mubr.msk.bf16.gmra.mrb[8].mxu0 %vm373_vm3, %v227_v31  ;;  %5306 = vmatmul.mubr.msk.bf16.gmra.mrb[8].mxu1 %vm373_vm3, %v227_v31 }
  0x2b   :  { %448 = vmatprep.mubr.bf16.mxu0 %v6101_v2  ;;  %521 = vmatprep.mubr.bf16.mxu1 %v6101_v2 }
  0x2c   :  { %673 = vmatpush1.bf16.msra.mxu0 %v5872_v35  ;;  %746 = vmatpush1.bf16.msra.mxu1 %v5875_v36 }
  0x2d   :  { %674 = vmatprep.subr.bf16.mxu0 %v5880_v37  ;;  %747 = vmatprep.subr.bf16.mxu1 %v5883_v38 }
  0x30   :  { %675 = vmatpush1.bf16.msra.mxu0 %v5878_v44  ;;  %748 = vmatpush1.bf16.msra.mxu1 %v5881_v45 }
  0x31   :  { %1020 = vmatprep.subr.bf16.mxu0 %v5886_v47  ;;  %1093 = vmatprep.subr.bf16.mxu1 %v5889_v32 }
  0x32   :  { %5303 = vmatmul.mubr.msk.bf16.gmra.mrb[12].mxu0 %vm373_vm3, %v228_v48  ;;  %5307 = vmatmul.mubr.msk.bf16.gmra.mrb[12].mxu1 %vm373_vm3, %v228_v48 }
  0x33   :  { %696 = vmatprep.mubr.bf16.mxu0 %v6101_v2  ;;  %769 = vmatprep.mubr.bf16.mxu1 %v6101_v2 }
  0x3a   :  { %5332 = vmatmul.mubr.msk.bf16.vlgmr.msra.gmra.mrb[0].mxu0 %vm373_vm3, %v51_v57  ;;  %5336 = vmatmul.mubr.msk.bf16.vlgmr.msra.gmra.mrb[0].mxu1 %vm373_vm3, %v51_v57 }
  0x3b   :  { %1021 = vmatpush1.bf16.msra.mxu0 %v5884_v55  ;;  %1094 = vmatpush1.bf16.msra.mxu1 %v5887_v56 }
  0x3c   :  { %1022 = vmatprep.subr.bf16.mxu0 %v5892_v58  ;;  %1095 = vmatprep.subr.bf16.mxu1 %v5895_v61 }
  0x3d   :  { %706 = vmatprep.mubr.bf16.mxu0 %v6101_v2  ;;  %779 = vmatprep.mubr.bf16.mxu1 %v6101_v2 }
  0x3f   :  { %1023 = vmatpush1.bf16.msra.mxu0 %v5890_v62  ;;  %1096 = vmatpush1.bf16.msra.mxu1 %v5893_v63 }
  0x40   :  { %1024 = vmatprep.subr.bf16.mxu0 %v5898_v26  ;;  %1097 = vmatprep.subr.bf16.mxu1 %v5901_v27 }
  0x42   :  { %5333 = vmatmul.mubr.msk.bf16.gmra.mrb[4].mxu0 %vm373_vm3, %v52_v3  ;;  %5337 = vmatmul.mubr.msk.bf16.gmra.mrb[4].mxu1 %vm373_vm3, %v52_v3 }
  0x43   :  { %1025 = vmatpush1.bf16.msra.mxu0 %v5896_v0  ;;  %1098 = vmatpush1.bf16.msra.mxu1 %v5899_v1 }
  0x44   :  { %716 = vmatprep.mubr.bf16.mxu0 %v6101_v2  ;;  %789 = vmatprep.mubr.bf16.mxu1 %v6101_v2 }
  0x45   :  { %1026 = vmatprep.subr.bf16.mxu0 %v5904_v5  ;;  %1099 = vmatprep.subr.bf16.mxu1 %v5907_v6 }
  0x47   :  { %1027 = vmatpush1.bf16.msra.mxu0 %v5902_v7  ;;  %1100 = vmatpush1.bf16.msra.mxu1 %v5905_v8 }
  0x48   :  { %1028 = vmatprep.subr.bf16.mxu0 %v5910_v9  ;;  %1101 = vmatprep.subr.bf16.mxu1 %v5913_v10 }
  0x4a   :  { %5334 = vmatmul.mubr.msk.bf16.gmra.mrb[8].mxu0 %vm373_vm3, %v53_v11  ;;  %5338 = vmatmul.mubr.msk.bf16.gmra.mrb[8].mxu1 %vm373_vm3, %v53_v11 }
  0x4b   :  { %726 = vmatprep.mubr.bf16.mxu0 %v6101_v2  ;;  %799 = vmatprep.mubr.bf16.mxu1 %v6101_v2 }
  0x4c   :  { %1029 = vmatpush1.bf16.msra.mxu0 %v5908_v12  ;;  %1102 = vmatpush1.bf16.msra.mxu1 %v5911_v13 }
  0x4d   :  { %1030 = vmatprep.subr.bf16.mxu0 %v5916_v16  ;;  %1103 = vmatprep.subr.bf16.mxu1 %v5919_v17 }
  0x50   :  { %1031 = vmatpush1.bf16.msra.mxu0 %v5914_v18  ;;  %1104 = vmatpush1.bf16.msra.mxu1 %v5917_v20 }
  0x52   :  { %5335 = vmatmul.mubr.msk.bf16.gmra.mrb[12].mxu0 %vm373_vm3, %v54_v21  ;;  %5339 = vmatmul.mubr.msk.bf16.gmra.mrb[12].mxu1 %vm373_vm3, %v54_v21 }
  0x53   :  { %1052 = vmatprep.mubr.bf16.mxu0 %v6101_v2  ;;  %1125 = vmatprep.mubr.bf16.mxu1 %v6101_v2 }
  0x5a   :  { %5388 = vmatmul.mubr.msk.bf16.vlgmr.msra.gmra.mrb[0].mxu0 %vm373_vm3, %v6323_v60  ;;  %5392 = vmatmul.mubr.msk.bf16.vlgmr.msra.gmra.mrb[0].mxu1 %vm373_vm3, %v6323_v60 }
  0x5b   :  { %1062 = vmatprep.mubr.bf16.mxu0 %v6101_v2  ;;  %1135 = vmatprep.mubr.bf16.mxu1 %v6101_v2 }
  0x62   :  { %5389 = vmatmul.mubr.msk.bf16.gmra.mrb[4].mxu0 %vm373_vm3, %v860_v22  ;;  %5393 = vmatmul.mubr.msk.bf16.gmra.mrb[4].mxu1 %vm373_vm3, %v860_v22 }
  0x63   :  { %1072 = vmatprep.mubr.bf16.mxu0 %v6101_v2  ;;  %1145 = vmatprep.mubr.bf16.mxu1 %v6101_v2 }
  0x64   :  { %14 = vsyncpa [#allocation4], 0  ;;  %v1202_v59 = vsub.s32 0, %v6199_v15  ;;  %v1210_v60 = vsub.s32 2, %v6199_v15  ;;  %v1198_v4 = vld [vmem:[%s8796_s2] sm:$0xf] }
  0x65   :  { %v1206_v14 = vsub.s32 1, %v6199_v15  ;;  %v1214_v19 = vsub.s32 3, %v6199_v15  ;;  %v6102_v47 = vmov 1983009808   ;;  %vm2276_vm7 = vcmask 1041408  }
  0x66   :  { %v6606_v23 = vrot.slane %v1198_v4, %v1202_v59  ;;  %v1321_v32 = vunpack.c.l.s4 %v6102_v47  ;;  %vm3398_vm8 = vcmask 1041409   ;;  %vm3400_vm9 = vcmask 1042434  }
  0x67   :  { %v6610_v24 = vrot.slane %v1198_v4, %v1206_v14  ;;  %v6612_v25 = vrot.slane %v1198_v4, %v1214_v19  ;;  %vm3402_vm10 = vcmask 1043459   ;;  %vm3404_vm11 = vcmask 1044484  }
  0x68   :  { %v1322_v57 = vunpack.c.0.s8 %v1321_v32  ;;  %vm3406_vm12 = vcmask 1045509   ;;  %vm3408_vm13 = vcmask 1046534   ;;  %vm3410_vm14 = vcmask 1047559  }
  0x69   :  { %vm6103_vm1 = vmmov 1  }
  0x6a   :  { %5390 = vmatmul.mubr.msk.bf16.gmra.mrb[8].mxu0 %vm373_vm3, %v861_v50  ;;  %5394 = vmatmul.mubr.msk.bf16.gmra.mrb[8].mxu1 %vm373_vm3, %v861_v50  ;;  %v6630_v7 = vsub.s32 %v1322_v57, %v6199_v15 }
  0x6b   :  { %1082 = vmatprep.mubr.bf16.mxu0 %v6101_v2  ;;  %1155 = vmatprep.mubr.bf16.mxu1 %v6101_v2  ;;  %v6608_v2 = vrot.slane %v1198_v4, %v1210_v60 }
  0x6c   :  { %8948 = vst [vmem:[#allocation8_spill] sm:$0xff] %v6630_v7 }
  0x72   :  { %5391 = vmatmul.mubr.msk.bf16.gmra.mrb[12].mxu0 %vm373_vm3, %v6406_v30  ;;  %5395 = vmatmul.mubr.msk.bf16.gmra.mrb[12].mxu1 %vm373_vm3, %v6406_v30 }
 0x12d   :  { %v1054_v29 = vpop.f32.mrb[0].mxu0  ;;  %v1127_v30 = vpop.f32.mrb[0].mxu1 }
 0x12e   :  { %v1220_v31 = vadd.f32 %v6606_v23, %v1054_v29  ;;  %v1222_v34 = vadd.f32 %v6608_v2, %v1127_v30  ;;  %v1056_v35 = vpop.f32.mrb[1].mxu0  ;;  %v1129_v36 = vpop.f32.mrb[1].mxu1 }
 0x12f   :  { %v1221_v37 = vadd.f32 %v6610_v24, %v1056_v35  ;;  %v1223_v38 = vadd.f32 %v6612_v25, %v1129_v36  ;;  %v1058_v39 = vpop.f32.mrb[2].mxu0  ;;  %v1131_v40 = vpop.f32.mrb[2].mxu1 }
 0x130   :  { %6003 = vtanh.f32 %v1220_v31  ;;  %v1224_v41 = vadd.f32 %v6606_v23, %v1058_v39  ;;  %v1060_v42 = vpop.f32.mrb[3].mxu0  ;;  %v1133_v43 = vpop.f32.mrb[3].mxu1  ;;  %v1226_v44 = vadd.f32 %v6608_v2, %v1131_v40 }
 0x131   :  { %6005 = vtanh.f32 %v1222_v34  ;;  %v1225_v45 = vadd.f32 %v6610_v24, %v1060_v42  ;;  %v1227_v48 = vadd.f32 %v6612_v25, %v1133_v43 }
 0x132   :  { %6007 = vtanh.f32 %v1221_v37 }
 0x133   :  { %6009 = vtanh.f32 %v1223_v38 }
 0x134   :  { %6011 = vtanh.f32 %v1224_v41 }
 0x135   :  { %6013 = vtanh.f32 %v1226_v44  ;;  %v1064_v51 = vpop.f32.mrb[4].mxu0  ;;  %v1137_v52 = vpop.f32.mrb[4].mxu1 }
 0x136   :  { %6015 = vtanh.f32 %v1225_v45  ;;  %v1228_v53 = vadd.f32 %v6606_v23, %v1064_v51  ;;  %v1230_v54 = vadd.f32 %v6608_v2, %v1137_v52  ;;  %v1066_v55 = vpop.f32.mrb[5].mxu0  ;;  %v1139_v56 = vpop.f32.mrb[5].mxu1 }
 0x137   :  { %6017 = vtanh.f32 %v1227_v48  ;;  %v1229_v58 = vadd.f32 %v6610_v24, %v1066_v55  ;;  %v1231_v61 = vadd.f32 %v6612_v25, %v1139_v56  ;;  %v1068_v62 = vpop.f32.mrb[6].mxu0  ;;  %v1141_v63 = vpop.f32.mrb[6].mxu1 }
 0x138   :  { %6019 = vtanh.f32 %v1228_v53  ;;  %v1232_v26 = vadd.f32 %v6606_v23, %v1068_v62  ;;  %v1070_v27 = vpop.f32.mrb[7].mxu0  ;;  %v1143_v0 = vpop.f32.mrb[7].mxu1  ;;  %v1234_v1 = vadd.f32 %v6608_v2, %v1141_v63 }
 0x139   :  { %6021 = vtanh.f32 %v1230_v54  ;;  %v1233_v5 = vadd.f32 %v6610_v24, %v1070_v27  ;;  %v1235_v8 = vadd.f32 %v6612_v25, %v1143_v0 }
 0x13a   :  { %v6004_v3 = vpop.eup %6003  ;;  %6023 = vtanh.f32 %v1229_v58 }
 0x13b   :  { %v6006_v6 = vpop.eup %6005  ;;  %6025 = vtanh.f32 %v1231_v61 }
 0x13c   :  { %v6008_v9 = vpop.eup %6007  ;;  %6027 = vtanh.f32 %v1232_v26 }
 0x13d   :  { %v6010_v10 = vpop.eup %6009  ;;  %v1316_v11 = vcombine.low %v6004_v3, %v6008_v9  ;;  %v1317_v12 = vcombine.high %v6004_v3, %v6008_v9  ;;  %6029 = vtanh.f32 %v1234_v1  ;;  %v1074_v13 = vpop.f32.mrb[8].mxu0 }
 0x13e   :  { %v1147_v16 = vpop.f32.mrb[8].mxu1  ;;  %v6633_v17 = vpop.eup %6011  ;;  %v1318_v18 = vcombine.low %v6006_v6, %v6010_v10  ;;  %v1319_v20 = vcombine.high %v6006_v6, %v6010_v10  ;;  %6031 = vtanh.f32 %v1233_v5  ;;  %v1236_v21 = vadd.f32 %v6606_v23, %v1074_v13 }
 0x13f   :  { %v1076_v28 = vpop.f32.mrb[9].mxu0  ;;  %v1149_v22 = vpop.f32.mrb[9].mxu1  ;;  %v1326_v49 = vrot.slane %v1316_v11, %v6630_v7  ;;  %v1333_v50 = vrot.slane %v1317_v12, %v6630_v7  ;;  %6033 = vtanh.f32 %v1235_v8  ;;  %v1238_v59 = vadd.f32 %v6608_v2, %v1147_v16 }
 0x140   :  { %v6636_v46 = vpop.eup %6013  ;;  %v6641_v60 = vpop.f32.mrb[10].mxu0  ;;  %v1340_v19 = vrot.slane %v1318_v18, %v6630_v7  ;;  %v1347_v29 = vrot.slane %v1319_v20, %v6630_v7  ;;  %6035 = vtanh.f32 %v1236_v21  ;;  %v6660_v37 = vadd.f32 %v6610_v24, %v1076_v28 }
 0x141   :  { %v6643_v4 = vpop.f32.mrb[10].mxu1  ;;  %v6645_v14 = vpop.eup %6015  ;;  %6037 = vtanh.f32 %v1238_v59  ;;  %v6684_v61 = vadd.f32 %v6612_v25, %v1149_v22 }
 0x142   :  { %v6649_v30 = vpop.f32.mrb[11].mxu0  ;;  %v6651_v31 = vpop.f32.mrb[11].mxu1  ;;  %v1348_v39 = vcombine.low %v1326_v49, %v1340_v19  ;;  %v1349_v40 = vcombine.high %v1326_v49, %v1340_v19  ;;  %v1350_v41 = vcombine.low %v1333_v50, %v1347_v29  ;;  %v1351_v42 = vcombine.high %v1333_v50, %v1347_v29 }
 0x143   :  { %v6653_v34 = vpop.eup %6017  ;;  %v5396_v44 = vcombine.low %v1340_v19, %v1340_v19  ;;  %v5397_v45 = vcombine.high %v1340_v19, %v1340_v19  ;;  %v5398_v47 = vcombine.low %v1347_v29, %v1347_v29  ;;  %v5399_v32 = vcombine.high %v1347_v29, %v1347_v29 }
 0x144   :  { %v6662_v38 = vpop.eup %6019  ;;  %v1611_v51 = vrot.slane %v1348_v39, %v6630_v7  ;;  %v1628_v52 = vrot.slane %v1349_v40, %v6630_v7  ;;  %v6671_v53 = vrot.slane %v1350_v41, %v6630_v7  ;;  %v6674_v54 = vrot.slane %v1351_v42, %v6630_v7 }
 0x145   :  { %v6664_v43 = vpop.eup %6021  ;;  %v1618_v56 = vrot.slane %v5396_v44, %v6630_v7  ;;  %v1635_v57 = vrot.slane %v5397_v45, %v6630_v7  ;;  %v6681_v58 = vrot.slane %v5398_v47, %v6630_v7  ;;  %v6686_v62 = vpop.f32.mrb[12].mxu0  ;;  %v6695_v3 = vrot.slane %v5399_v32, %v6630_v7 }
 0x146   :  { %v6666_v48 = vpop.eup %6023  ;;  %8949 = vst [vmem:[#allocation9_spill] sm:$0xff] %v6674_v54  ;;  %v6688_v63 = vpop.f32.mrb[12].mxu1  ;;  %v1619_v27 = vcombine.high %v1611_v51, %v1611_v51  ;;  %v1636_v0 = vcombine.high %v1628_v52, %v1628_v52  ;;  %v1653_v1 = vcombine.high %v6671_v53, %v6671_v53  ;;  %v2277_v20 = vsel %vm2276_vm7, %v1611_v51, -inf }
 0x147   :  { %v6676_v55 = vpop.eup %6025  ;;  %8950 = vst [vmem:[#allocation10_spill] sm:$0xff] %v6695_v3  ;;  %v6697_v5 = vpop.f32.mrb[13].mxu0  ;;  %v1620_v9 = vcombine.high %v1618_v56, %v1618_v56  ;;  %v1637_v10 = vcombine.high %v1635_v57, %v1635_v57  ;;  %v1654_v11 = vcombine.high %v6681_v58, %v6681_v58  ;;  %v2291_v28 = vsel %vm2276_vm7, %v1618_v56, -inf }
 0x148   :  { %v6690_v26 = vpop.eup %6027  ;;  %v6699_v6 = vpop.f32.mrb[13].mxu1  ;;  %v2284_v21 = vsel %vm2276_vm7, %v1619_v27, -inf  ;;  %v2305_v22 = vsel %vm2276_vm7, %v1628_v52, -inf  ;;  %v2278_v19 = vrot.slane %v2277_v20, 4  ;;  %v2292_v39 = vrot.slane %v2291_v28, 4 }
 0x149   :  { %v6701_v8 = vpop.eup %6029  ;;  %v6707_v13 = vpop.f32.mrb[14].mxu0  ;;  %v2285_v29 = vrot.slane %v2284_v21, 4  ;;  %v2298_v40 = vsel %vm2276_vm7, %v1620_v9, -inf  ;;  %v2306_v44 = vrot.slane %v2305_v22, 4  ;;  %v2312_v45 = vsel %vm2276_vm7, %v1636_v0, -inf }
 0x14a   :  { %v6709_v16 = vpop.f32.mrb[14].mxu1  ;;  %v6711_v18 = vpop.eup %6031  ;;  %v2299_v42 = vrot.slane %v2298_v40, 4  ;;  %v2319_v47 = vsel %vm2276_vm7, %v1635_v57, -inf  ;;  %v2279_v51 = vmax.f32 %v2277_v20, %v2278_v19  ;;  %v2293_v56 = vmax.f32 %v2291_v28, %v2292_v39 }
 0x14b   :  { %v6717_v49 = vpop.f32.mrb[15].mxu0  ;;  %v6719_v50 = vpop.f32.mrb[15].mxu1  ;;  %v6730_v52 = vmax.f32 %v2284_v21, %v2285_v29  ;;  %v2313_v27 = vrot.slane %v2312_v45, 4  ;;  %v2307_v36 = vmax.f32 %v2305_v22, %v2306_v44  ;;  %v2320_v35 = vrot.slane %v2319_v47, 4 }
 0x14c   :  { %8951 = vst [vmem:[#allocation11_spill] sm:$0xff] %v6717_v49  ;;  %8952 = vst [vmem:[#allocation12_spill] sm:$0xff] %v6719_v50  ;;  %v6721_v59 = vpop.eup %6033  ;;  %v6732_v12 = vmax.f32 %v2298_v40, %v2299_v42  ;;  %v2326_v9 = vsel %vm2276_vm7, %v1637_v10, -inf  ;;  %v2280_v15 = vrot.slane %v2279_v51, 2  ;;  %v2294_v57 = vrot.slane %v2293_v56, 2 }
 0x14d   :  { %v6724_v41 = vpop.eup %6035  ;;  %8953 = vst [vmem:[#allocation13_spill] sm:$0xff] %v6730_v52  ;;  %v2308_v50 = vrot.slane %v2307_v36, 2  ;;  %v6738_v49 = vmax.f32 %v2312_v45, %v2313_v27  ;;  %v2321_v20 = vmax.f32 %v2319_v47, %v2320_v35  ;;  %v2327_v21 = vrot.slane %v2326_v9, 4 }
 0x14e   :  { %v6728_v32 = vpop.eup %6037  ;;  %8954 = vst [vmem:[#allocation14_spill] sm:$0xff] %v6732_v12  ;;  %v2281_v28 = vmax.f32 %v2279_v51, %v2280_v15  ;;  %v2295_v19 = vmax.f32 %v2293_v56, %v2294_v57  ;;  %v2333_v22 = vsel %vm2276_vm7, %v6671_v53, -inf  ;;  %v2340_v0 = vsel %vm2276_vm7, %v1653_v1, -inf }
 0x14f   :  { %v2309_v10 = vmax.f32 %v2307_v36, %v2308_v50  ;;  %v2322_v39 = vrot.slane %v2321_v20, 2  ;;  %v6743_v40 = vmax.f32 %v2326_v9, %v2327_v21  ;;  %v2334_v42 = vrot.slane %v2333_v22, 4 }
 0x150   :  { %v2282_v44 = vrot.slane %v2281_v28, 1  ;;  %v2296_v33 = vrot.slane %v2295_v19, 1  ;;  %v2347_v35 = vsel %vm2276_vm7, %v6681_v58, -inf  ;;  %v2341_v53 = vrot.slane %v2340_v0, 4 }
 0x151   :  { %v2310_v45 = vrot.slane %v2309_v10, 1  ;;  %v2323_v47 = vmax.f32 %v2321_v20, %v2322_v39  ;;  %v2335_v51 = vmax.f32 %v2333_v22, %v2334_v42  ;;  %v2348_v36 = vrot.slane %v2347_v35, 4 }
 0x152   :  { %v2283_v56 = vmax.f32 %v2281_v28, %v2282_v44  ;;  %v2297_v27 = vmax.f32 %v2295_v19, %v2296_v33  ;;  %v2354_v21 = vsel %vm2276_vm7, %v1654_v11, -inf  ;;  %v2361_v58 = vsel %vm2276_vm7, %v6674_v54, -inf }
 0x153   :  { %v2311_v50 = vmax.f32 %v2309_v10, %v2310_v45  ;;  %v2324_v9 = vrot.slane %v2323_v47, 1  ;;  %v2336_v57 = vrot.slane %v2335_v51, 2  ;;  %v2349_v1 = vmax.f32 %v2347_v35, %v2348_v36  ;;  %v5920_v36 = vld [vmem:[%s8797_s3 + $0xc0] sm:$0xff]  }
 0x154   :  { %v2355_v12 = vrot.slane %v2354_v21, 4  ;;  %v2362_v20 = vrot.slane %v2361_v58, 4  ;;  %v2375_v33 = vsel %vm2276_vm7, %v6695_v3, -inf  ;;  %v6755_v28 = vmax.f32 %v2340_v0, %v2341_v53  ;;  %5630 = vmatprep.subr.bf16.mxu1 %v5920_v36  ;;  %v5931_v36 = vld [vmem:[%s8797_s3 + $0xa0] sm:$0xff]  }
 0x155   :  { %v2325_v52 = vmax.f32 %v2323_v47, %v2324_v9  ;;  %v2337_v15 = vmax.f32 %v2335_v51, %v2336_v57  ;;  %v2350_v19 = vrot.slane %v2349_v1, 2  ;;  %v2376_v22 = vrot.slane %v2375_v33, 4 }
 0x156   :  { %v6757_v10 = vmax.f32 %v2283_v56, %v2297_v27  ;;  %v6759_v39 = vmax.f32 %v2354_v21, %v2355_v12  ;;  %v2363_v42 = vmax.f32 %v2361_v58, %v2362_v20  ;;  %v8957_v47 = vcombine.low %v6633_v17, %v6645_v14 }
 0x157   :  { %v2338_v11 = vrot.slane %v2337_v15, 1  ;;  %v6761_v44 = vmax.f32 %v2311_v50, %v2325_v52  ;;  %v2351_v35 = vmax.f32 %v2349_v1, %v2350_v19  ;;  %v2377_v45 = vmax.f32 %v2375_v33, %v2376_v22 }
 0x158   :  { %8955 = vst [vmem:[#allocation15_spill] sm:$0xff] %v6757_v10  ;;  %v1362_v51 = vrot.slane %v8957_v47, %v6630_v7  ;;  %v1354_v0 = vcombine.low %v6636_v46, %v6653_v34  ;;  %v2364_v53 = vrot.slane %v2363_v42, 2  ;;  %v8958_v56 = vcombine.high %v6633_v17, %v6645_v14  ;;  %v5921_v17 = vld [vmem:[%s8797_s3 + $0x80] sm:$0xff]  }
 0x159   :  { %8956 = vst [vmem:[#allocation16_spill] sm:$0xff] %v6761_v44  ;;  %v1355_v52 = vcombine.high %v6636_v46, %v6653_v34  ;;  %v1388_v27 = vcombine.low %v6662_v38, %v6666_v48  ;;  %v2352_v50 = vrot.slane %v2351_v35, 1  ;;  %v2378_v9 = vrot.slane %v2377_v45, 2  ;;  %5631 = vmatpush3.bf16.msra.mxu1 %v5921_v17 }
 0x15a   :  { %v6773_v12 = vrot.slane %v8958_v56, %v6630_v7  ;;  %v1376_v57 = vrot.slane %v1354_v0, %v6630_v7  ;;  %v1389_v21 = vcombine.high %v6662_v38, %v6666_v48  ;;  %v6788_v14 = vmax.f32 %v2337_v15, %v2338_v11  ;;  %v5922_v11 = vld [vmem:[%s8797_s3 + $0xc8] sm:$0xff]  }
 0x15b   :  { %v6790_v46 = vmax.f32 %v2363_v42, %v2364_v53  ;;  %v6793_v34 = vrot.slane %v1355_v52, %v6630_v7  ;;  %v1390_v1 = vcombine.low %v6664_v43, %v6676_v55  ;;  %v6797_v58 = vmax.f32 %v2377_v45, %v2378_v9  ;;  %5632 = vmatprep.subr.bf16.mxu1 %v5922_v11 }
 0x15c   :  { %8959 = vst [vmem:[#allocation17_spill] sm:$0xff] %v6788_v14  ;;  %v1384_v20 = vcombine.low %v1362_v51, %v1376_v57  ;;  %v1385_v33 = vcombine.high %v1362_v51, %v1376_v57  ;;  %v6800_v38 = vrot.slane %v1388_v27, %v6630_v7  ;;  %v6802_v48 = vmax.f32 %v2351_v35, %v2352_v50  ;;  %v5923_v51 = vld [vmem:[%s8797_s3 + $0x88] sm:$0xff]  }
 0x15d   :  { %8960 = vst [vmem:[#allocation18_spill] sm:$0xff] %v6790_v46  ;;  %8961 = vst [vmem:[#allocation19_spill] sm:$0xff] %v6797_v58  ;;  %v1386_v15 = vcombine.low %v6773_v12, %v6793_v34  ;;  %v5400_v22 = vcombine.low %v1376_v57, %v1376_v57  ;;  %v5401_v47 = vcombine.high %v1376_v57, %v1376_v57  ;;  %5633 = vmatpush3.bf16.msra.mxu1 %v5923_v51 }
 0x15e   :  { %8962 = vst [vmem:[#allocation20_spill] sm:$0xff] %v6802_v48  ;;  %v6813_v45 = vrot.slane %v1384_v20, %v6630_v7  ;;  %v6816_v35 = vrot.slane %v1385_v33, %v6630_v7  ;;  %v5402_v56 = vcombine.low %v6793_v34, %v6793_v34  ;;  %v1405_v58 = vrot.slane %v1389_v21, %v6630_v7 }
 0x15f   :  { %v6823_v53 = vrot.slane %v5400_v22, %v6630_v7  ;;  %v6828_v52 = vrot.slane %v1386_v15, %v6630_v7  ;;  %v6831_v27 = vrot.slane %v5401_v47, %v6630_v7  ;;  %v5924_v15 = vld [vmem:[%s8797_s3 + $0xd0] sm:$0xff]   ;;  %6039 = vtanh.f32 %v6660_v37 }
 0x160   :  { %8963 = vst [vmem:[#allocation21_spill] sm:$0xff] %v6813_v45  ;;  %v2389_v50 = vsel %vm2276_vm7, %v6813_v45, -inf  ;;  %v2417_v9 = vsel %vm2276_vm7, %v6816_v35, -inf  ;;  %v6842_v17 = vrot.slane %v5402_v56, %v6630_v7  ;;  %v5925_v56 = vld [vmem:[%s8797_s3 + $0x90] sm:$0xff]   ;;  %5634 = vmatprep.subr.bf16.mxu1 %v5924_v15  ;;  %6041 = vtanh.f32 %v6684_v61 }
 0x161   :  { %8964 = vst [vmem:[#allocation22_spill] sm:$0xff] %v6823_v53  ;;  %v2390_v20 = vrot.slane %v2389_v50, 4  ;;  %v2403_v33 = vsel %vm2276_vm7, %v6823_v53, -inf  ;;  %v2418_v11 = vrot.slane %v2417_v9, 4  ;;  %v2431_v47 = vsel %vm2276_vm7, %v6831_v27, -inf  ;;  %5635 = vmatpush3.bf16.msra.mxu1 %v5925_v56  ;;  %v5938_v53 = vld [vmem:[%s8797_s3 + $0xf0] sm:$0xff]  }
 0x162   :  { %v2404_v22 = vrot.slane %v2403_v33, 4  ;;  %v2445_v51 = vsel %vm2276_vm7, %v6828_v52, -inf  ;;  %v2432_v42 = vrot.slane %v2431_v47, 4  ;;  %v2459_v29 = vsel %vm2276_vm7, %v6842_v17, -inf }
 0x163   :  { %v2391_v0 = vmax.f32 %v2389_v50, %v2390_v20  ;;  %v2446_v57 = vrot.slane %v2445_v51, 4  ;;  %v6860_v44 = vmax.f32 %v2417_v9, %v2418_v11  ;;  %v2460_v10 = vrot.slane %v2459_v29, 4  ;;  %v5926_v20 = vld [vmem:[%s8797_s3 + $0xd8] sm:$0xff]  }
 0x164   :  { %v2405_v19 = vmax.f32 %v2403_v33, %v2404_v22  ;;  %v6862_v48 = vmax.f32 %v2431_v47, %v2432_v42  ;;  %v1391_v50 = vcombine.high %v6664_v43, %v6676_v55  ;;  %v1412_v9 = vrot.slane %v1390_v1, %v6630_v7  ;;  %v5927_v42 = vld [vmem:[%s8797_s3 + $0x98] sm:$0xff]   ;;  %5636 = vmatprep.subr.bf16.mxu1 %v5926_v20 }
 0x165   :  { %8965 = vst [vmem:[#allocation23_spill] sm:$0xff] %v6860_v44  ;;  %v2392_v14 = vrot.slane %v2391_v0, 2  ;;  %v6871_v33 = vmax.f32 %v2445_v51, %v2446_v57  ;;  %v6879_v21 = vmax.f32 %v2459_v29, %v2460_v10  ;;  %v5928_v57 = vld [vmem:[%s8797_s3 + $0x40] sm:$0xff]   ;;  %5637 = vmatpush3.bf16.msra.mxu1 %v5927_v42 }
 0x166   :  { %8966 = vst [vmem:[#allocation24_spill] sm:$0xff] %v6862_v48  ;;  %v2406_v15 = vrot.slane %v2405_v19, 2  ;;  %v1419_v43 = vrot.slane %v1391_v50, %v6630_v7  ;;  %v1420_v11 = vcombine.low %v6800_v38, %v1412_v9  ;;  %v1421_v47 = vcombine.high %v6800_v38, %v1412_v9  ;;  %v5929_v29 = vld [vmem:[%s8797_s3] sm:$0xff]   ;;  %5602 = vmatprep.subr.bf16.mxu0 %v5928_v57 }
 0x167   :  { %8967 = vst [vmem:[#allocation25_spill] sm:$0xff] %v6871_v33  ;;  %v6877_v22 = vmax.f32 %v2391_v0, %v2392_v14  ;;  %8969 = vst [vmem:[#allocation27_spill] sm:$0xff] %v6879_v21  ;;  %v5404_v14 = vcombine.low %v1412_v9, %v1412_v9  ;;  %v5405_v51 = vcombine.high %v1412_v9, %v1412_v9  ;;  %v5930_v50 = vld [vmem:[%s8797_s3 + $0xe0] sm:$0xff]   ;;  %5603 = vmatpush3.bf16.msra.mxu0 %v5929_v29 }
 0x168   :  { %v1422_v10 = vcombine.low %v1405_v58, %v1419_v43  ;;  %v1423_v0 = vcombine.high %v1405_v58, %v1419_v43  ;;  %v5406_v56 = vcombine.low %v1419_v43, %v1419_v43  ;;  %v1747_v20 = vrot.slane %v1420_v11, %v6630_v7  ;;  %5638 = vmatprep.subr.bf16.mxu1 %v5930_v50 }
 0x169   :  { %8968 = vst [vmem:[#allocation26_spill] sm:$0xff] %v6877_v22  ;;  %v1754_v1 = vrot.slane %v5404_v14, %v6630_v7  ;;  %v1764_v38 = vrot.slane %v1421_v47, %v6630_v7  ;;  %v5407_v42 = vcombine.high %v1419_v43, %v1419_v43  ;;  %v1771_v58 = vrot.slane %v5405_v51, %v6630_v7  ;;  %v5932_v43 = vld [vmem:[%s8797_s3 + $0x48] sm:$0xff]  }
 0x16a   :  { %v6904_v9 = vrot.slane %v1422_v10, %v6630_v7  ;;  %v6907_v57 = vrot.slane %v5406_v56, %v6630_v7  ;;  %v6910_v11 = vrot.slane %v1423_v0, %v6630_v7  ;;  %v6915_v47 = vmax.f32 %v2405_v19, %v2406_v15  ;;  %5639 = vmatpush3.bf16.msra.mxu1 %v5931_v36  ;;  %v5933_v10 = vld [vmem:[%s8797_s3 + $0x8] sm:$0xff]   ;;  %v5936_v36 = vld [vmem:[%s8797_s3 + $0x50] sm:$0xff]  }
 0x16b   :  { %v1755_v14 = vcombine.high %v1747_v20, %v1747_v20  ;;  %v1756_v29 = vcombine.high %v1754_v1, %v1754_v1  ;;  %v1772_v55 = vcombine.high %v1764_v38, %v1764_v38  ;;  %v1773_v51 = vcombine.high %v1771_v58, %v1771_v58  ;;  %5604 = vmatprep.subr.bf16.mxu0 %v5932_v43  ;;  %v5934_v19 = vld [vmem:[%s8797_s3 + $0xe8] sm:$0xff]  }
 0x16c   :  { %8970 = vst [vmem:[#allocation28_spill] sm:$0xff] %v6910_v11  ;;  %8971 = vst [vmem:[#allocation29_spill] sm:$0xff] %v6915_v47  ;;  %v1789_v0 = vcombine.high %v6904_v9, %v6904_v9  ;;  %v6925_v50 = vrot.slane %v5407_v42, %v6630_v7  ;;  %v2501_v15 = vsel %vm2276_vm7, %v1747_v20, -inf  ;;  %v2515_v33 = vsel %vm2276_vm7, %v1754_v1, -inf  ;;  %5605 = vmatpush3.bf16.msra.mxu0 %v5933_v10  ;;  %v5935_v42 = vld [vmem:[%s8797_s3 + $0xa8] sm:$0xff]   ;;  %v5937_v47 = vld [vmem:[%s8797_s3 + $0x10] sm:$0xff]  }
 0x16d   :  { %v2508_v21 = vsel %vm2276_vm7, %v1755_v14, -inf  ;;  %v2502_v56 = vrot.slane %v2501_v15, 4  ;;  %v2516_v48 = vrot.slane %v2515_v33, 4  ;;  %v2522_v44 = vsel %vm2276_vm7, %v1756_v29, -inf  ;;  %5640 = vmatprep.subr.bf16.mxu1 %v5934_v19  ;;  %5606 = vmatprep.subr.bf16.mxu0 %v5936_v36 }
 0x16e   :  { %8972 = vst [vmem:[#allocation30_spill] sm:$0xff] %v6925_v50  ;;  %v2509_v43 = vrot.slane %v2508_v21, 4  ;;  %v2523_v20 = vrot.slane %v2522_v44, 4  ;;  %v2529_v14 = vsel %vm2276_vm7, %v1764_v38, -inf  ;;  %v2536_v1 = vsel %vm2276_vm7, %v1772_v55, -inf  ;;  %5641 = vmatpush3.bf16.msra.mxu1 %v5935_v42 }
 0x16f   :  { %v2543_v10 = vsel %vm2276_vm7, %v1771_v58, -inf  ;;  %v2503_v22 = vmax.f32 %v2501_v15, %v2502_v56  ;;  %v2517_v29 = vmax.f32 %v2515_v33, %v2516_v48  ;;  %v2530_v19 = vrot.slane %v2529_v14, 4  ;;  %v5939_v56 = vld [vmem:[%s8797_s3 + $0xb0] sm:$0xff]   ;;  %5642 = vmatprep.subr.bf16.mxu1 %v5938_v53 }
 0x170   :  { %v6948_v46 = vmax.f32 %v2508_v21, %v2509_v43  ;;  %v6953_v38 = vmax.f32 %v2522_v44, %v2523_v20  ;;  %v2537_v55 = vrot.slane %v2536_v1, 4  ;;  %v2544_v45 = vrot.slane %v2543_v10, 4  ;;  %5607 = vmatpush3.bf16.msra.mxu0 %v5937_v47  ;;  %v5940_v44 = vld [vmem:[%s8797_s3 + $0x58] sm:$0xff]  }
 0x171   :  { %v2550_v58 = vsel %vm2276_vm7, %v1773_v51, -inf  ;;  %v2504_v33 = vrot.slane %v2503_v22, 2  ;;  %v2518_v21 = vrot.slane %v2517_v29, 2  ;;  %v2531_v36 = vmax.f32 %v2529_v14, %v2530_v19  ;;  %v5941_v43 = vld [vmem:[%s8797_s3 + $0x18] sm:$0xff]   ;;  %5608 = vmatprep.subr.bf16.mxu0 %v5940_v44 }
 0x172   :  { %8973 = vst [vmem:[#allocation31_spill] sm:$0xff] %v6948_v46  ;;  %8974 = vst [vmem:[#allocation32_spill] sm:$0xff] %v6953_v38  ;;  %v6965_v42 = vmax.f32 %v2536_v1, %v2537_v55  ;;  %v2545_v47 = vmax.f32 %v2543_v10, %v2544_v45  ;;  %v2551_v51 = vrot.slane %v2550_v58, 4  ;;  %5643 = vmatpush3.bf16.msra.mxu1 %v5939_v56  ;;  %v2557_v53 = vsel %vm2276_vm7, %v6904_v9, -inf  ;;  %v5942_v14 = vld [vmem:[%s8797_s3 + $0xf8] sm:$0xff]  }
 0x173   :  { %v2505_v20 = vmax.f32 %v2503_v22, %v2504_v33  ;;  %v2519_v48 = vmax.f32 %v2517_v29, %v2518_v21  ;;  %v2532_v3 = vrot.slane %v2531_v36, 2  ;;  %v2558_v19 = vrot.slane %v2557_v53, 4  ;;  %v5943_v22 = vld [vmem:[%s8797_s3 + $0xb8] sm:$0xff]   ;;  %5644 = vmatprep.subr.bf16.mxu1 %v5942_v14  ;;  %v5944_v33 = vld [vmem:[%s8797_s3 + $0x60] sm:$0xff]  }
 0x174   :  { %v2546_v45 = vrot.slane %v2545_v47, 2  ;;  %v6976_v10 = vmax.f32 %v2550_v58, %v2551_v51  ;;  %5609 = vmatpush3.bf16.msra.mxu0 %v5941_v43  ;;  %v2564_v9 = vsel %vm2276_vm7, %v1789_v0, -inf  ;;  %v5945_v58 = vld [vmem:[%s8797_s3 + $0x20] sm:$0xff]   ;;  %v2571_v0 = vsel %vm2276_vm7, %v6907_v57, -inf }
 0x175   :  { %v2506_v29 = vrot.slane %v2505_v20, 1  ;;  %v2520_v55 = vrot.slane %v2519_v48, 1  ;;  %v2533_v56 = vmax.f32 %v2531_v36, %v2532_v3  ;;  %v2559_v43 = vmax.f32 %v2557_v53, %v2558_v19  ;;  %5610 = vmatprep.subr.bf16.mxu0 %v5944_v33 }
 0x176   :  { %v2547_v44 = vmax.f32 %v2545_v47, %v2546_v45  ;;  %5645 = vmatpush3.bf16.msra.mxu1 %v5943_v22  ;;  %v2565_v38 = vrot.slane %v2564_v9, 4  ;;  %v2572_v46 = vrot.slane %v2571_v0, 4  ;;  %v8975_v47 = vcombine.high %v6907_v57, %v6907_v57 }
 0x177   :  { %v2507_v1 = vmax.f32 %v2505_v20, %v2506_v29  ;;  %v2521_v3 = vmax.f32 %v2519_v48, %v2520_v55  ;;  %v2534_v36 = vrot.slane %v2533_v56, 1  ;;  %v2560_v15 = vrot.slane %v2559_v43, 2 }
 0x178   :  { %v2548_v14 = vrot.slane %v2547_v44, 1  ;;  %5611 = vmatpush3.bf16.msra.mxu0 %v5945_v58  ;;  %v2578_v45 = vsel %vm2276_vm7, %v8975_v47, -inf  ;;  %v2585_v20 = vsel %vm2276_vm7, %v6910_v11, -inf  ;;  %v2599_v48 = vsel %vm2276_vm7, %v6925_v50, -inf }
 0x179   :  { %v2535_v54 = vmax.f32 %v2533_v56, %v2534_v36  ;;  %v2561_v19 = vmax.f32 %v2559_v43, %v2560_v15  ;;  %v2573_v22 = vmax.f32 %v2571_v0, %v2572_v46  ;;  %v2579_v29 = vrot.slane %v2578_v45, 4 }
 0x17a   :  { %v2549_v53 = vmax.f32 %v2547_v44, %v2548_v14  ;;  %v2586_v55 = vrot.slane %v2585_v20, 4  ;;  %v2600_v33 = vrot.slane %v2599_v48, 4  ;;  %v7000_v51 = vmax.f32 %v2507_v1, %v2521_v3 }
 0x17b   :  { %v1425_v56 = vcombine.high %v6690_v26, %v6711_v18  ;;  %v2562_v57 = vrot.slane %v2561_v19, 1  ;;  %v7004_v58 = vmax.f32 %v2564_v9, %v2565_v38  ;;  %v2574_v36 = vrot.slane %v2573_v22, 2 }
 0x17c   :  { %8976 = vst [vmem:[#allocation33_spill] sm:$0xff] %v7000_v51  ;;  %v7006_v47 = vmax.f32 %v2535_v54, %v2549_v53  ;;  %v7008_v21 = vmax.f32 %v2578_v45, %v2579_v29  ;;  %v2587_v50 = vmax.f32 %v2585_v20, %v2586_v55  ;;  %v2601_v44 = vmax.f32 %v2599_v48, %v2600_v33 }
 0x17d   :  { %8977 = vst [vmem:[#allocation34_spill] sm:$0xff] %v7004_v58  ;;  %v8980_v46 = vcombine.low %v6690_v26, %v6711_v18  ;;  %v2575_v1 = vmax.f32 %v2573_v22, %v2574_v36  ;;  %v7015_v43 = vrot.slane %v1425_v56, %v6630_v7  ;;  %v1426_v38 = vcombine.low %v6701_v8, %v6721_v59 }
 0x17e   :  { %8978 = vst [vmem:[#allocation35_spill] sm:$0xff] %v7006_v47  ;;  %8979 = vst [vmem:[#allocation36_spill] sm:$0xff] %v7008_v21  ;;  %v1427_v54 = vcombine.high %v6701_v8, %v6721_v59  ;;  %v2588_v9 = vrot.slane %v2587_v50, 2  ;;  %v2602_v3 = vrot.slane %v2601_v44, 2  ;;  %v1240_v0 = vadd.f32 %v6606_v23, %v6641_v60 }
 0x17f   :  { %v1434_v15 = vrot.slane %v8980_v46, %v6630_v7  ;;  %v2576_v14 = vrot.slane %v2575_v1, 1  ;;  %v1448_v26 = vrot.slane %v1426_v38, %v6630_v7  ;;  %v7029_v45 = vmax.f32 %v2561_v19, %v2562_v57 }
 0x180   :  { %v7026_v18 = vrot.slane %v1427_v54, %v6630_v7  ;;  %v7031_v20 = vmax.f32 %v2587_v50, %v2588_v9  ;;  %v7033_v8 = vmax.f32 %v2601_v44, %v2602_v3  ;;  %6043 = vtanh.f32 %v1240_v0 }
 0x181   :  { %8981 = vst [vmem:[#allocation37_spill] sm:$0xff] %v7029_v45  ;;  %v1456_v59 = vcombine.low %v1434_v15, %v1448_v26  ;;  %v1457_v37 = vcombine.high %v1434_v15, %v1448_v26  ;;  %v1242_v48 = vadd.f32 %v6608_v2, %v6643_v4  ;;  %v7039_v53 = vmax.f32 %v2575_v1, %v2576_v14 }
 0x182   :  { %8982 = vst [vmem:[#allocation38_spill] sm:$0xff] %v7031_v20  ;;  %8983 = vst [vmem:[#allocation39_spill] sm:$0xff] %v7033_v8  ;;  %v1458_v60 = vcombine.low %v7015_v43, %v7026_v18  ;;  %v5408_v50 = vcombine.low %v1448_v26, %v1448_v26  ;;  %v5409_v29 = vcombine.high %v1448_v26, %v1448_v26 }
 0x183   :  { %8984 = vst [vmem:[#allocation40_spill] sm:$0xff] %v7039_v53  ;;  %v7045_v19 = vrot.slane %v1456_v59, %v6630_v7  ;;  %v7048_v55 = vrot.slane %v1457_v37, %v6630_v7  ;;  %v5410_v33 = vcombine.low %v7026_v18, %v7026_v18  ;;  %6045 = vtanh.f32 %v1242_v48  ;;  %v6040_v59 = vpop.eup %6039 }
 0x184   :  { %v7054_v56 = vrot.slane %v5408_v50, %v6630_v7  ;;  %v7057_v57 = vrot.slane %v1458_v60, %v6630_v7  ;;  %v7062_v44 = vrot.slane %v5409_v29, %v6630_v7  ;;  %v6042_v29 = vpop.eup %6041  ;;  %v1460_v1 = vcombine.low %v6724_v41, %v6040_v59 }
 0x185   :  { %8985 = vst [vmem:[#allocation41_spill] sm:$0xff] %v7045_v19  ;;  %v7065_v46 = vrot.slane %v5410_v33, %v6630_v7  ;;  %v2613_v15 = vsel %vm2276_vm7, %v7045_v19, -inf  ;;  %v2641_v9 = vsel %vm2276_vm7, %v7048_v55, -inf  ;;  %v1462_v61 = vcombine.low %v6728_v32, %v6042_v29 }
 0x186   :  { %8986 = vst [vmem:[#allocation42_spill] sm:$0xff] %v7054_v56  ;;  %v2614_v38 = vrot.slane %v2613_v15, 4  ;;  %v2627_v54 = vsel %vm2276_vm7, %v7054_v56, -inf  ;;  %v2642_v0 = vrot.slane %v2641_v9, 4  ;;  %v2655_v14 = vsel %vm2276_vm7, %v7062_v44, -inf }
 0x187   :  { %v2628_v3 = vrot.slane %v2627_v54, 4  ;;  %v2669_v26 = vsel %vm2276_vm7, %v7057_v57, -inf  ;;  %v2656_v60 = vrot.slane %v2655_v14, 4  ;;  %v2683_v50 = vsel %vm2276_vm7, %v7065_v46, -inf }
 0x188   :  { %v2615_v37 = vmax.f32 %v2613_v15, %v2614_v38  ;;  %v2670_v48 = vrot.slane %v2669_v26, 4  ;;  %v7081_v4 = vmax.f32 %v2641_v9, %v2642_v0  ;;  %v2684_v22 = vrot.slane %v2683_v50, 4 }
 0x189   :  { %v2629_v33 = vmax.f32 %v2627_v54, %v2628_v3  ;;  %v7088_v51 = vmax.f32 %v2655_v14, %v2656_v60  ;;  %v1461_v15 = vcombine.high %v6724_v41, %v6040_v59  ;;  %v1470_v0 = vrot.slane %v1460_v1, %v6630_v7 }
 0x18a   :  { %8987 = vst [vmem:[#allocation43_spill] sm:$0xff] %v7081_v4  ;;  %v7084_v36 = vpop.eup %6043  ;;  %v2616_v47 = vrot.slane %v2615_v37, 2  ;;  %v7092_v53 = vmax.f32 %v2669_v26, %v2670_v48  ;;  %v7094_v54 = vmax.f32 %v2683_v50, %v2684_v22  ;;  %v1463_v41 = vcombine.high %v6728_v32, %v6042_v29 }
 0x18b   :  { %8988 = vst [vmem:[#allocation44_spill] sm:$0xff] %v7088_v51  ;;  %v2630_v38 = vrot.slane %v2629_v33, 2  ;;  %v1477_v14 = vrot.slane %v1461_v15, %v6630_v7  ;;  %v1241_v26 = vadd.f32 %v6610_v24, %v6649_v30  ;;  %v1484_v22 = vrot.slane %v1462_v61, %v6630_v7 }
 0x18c   :  { %8989 = vst [vmem:[#allocation45_spill] sm:$0xff] %v7092_v53  ;;  %8990 = vst [vmem:[#allocation46_spill] sm:$0xff] %v7094_v54  ;;  %v7096_v9 = vmax.f32 %v2615_v37, %v2616_v47  ;;  %v7110_v47 = vadd.f32 %v6612_v25, %v6651_v31  ;;  %v7114_v1 = vadd.f32 %v6606_v23, %v6686_v62 }
 0x18d   :  { %v7101_v8 = vmax.f32 %v2629_v33, %v2630_v38  ;;  %v7118_v59 = vadd.f32 %v6608_v2, %v6688_v63  ;;  %v7120_v37 = vpop.eup %6045  ;;  %v1491_v32 = vrot.slane %v1463_v41, %v6630_v7  ;;  %6047 = vtanh.f32 %v1241_v26 }
 0x18e   :  { %8991 = vst [vmem:[#allocation47_spill] sm:$0xff] %v7096_v9  ;;  %v7125_v30 = vadd.f32 %v6610_v24, %v6697_v5  ;;  %v7129_v31 = vadd.f32 %v6612_v25, %v6699_v6  ;;  %v1492_v61 = vcombine.low %v1470_v0, %v1484_v22  ;;  %v1493_v62 = vcombine.high %v1470_v0, %v1484_v22 }
 0x18f   :  { %8992 = vst [vmem:[#allocation48_spill] sm:$0xff] %v7101_v8  ;;  %v5412_v60 = vcombine.low %v1484_v22, %v1484_v22  ;;  %v5413_v48 = vcombine.high %v1484_v22, %v1484_v22  ;;  %v1494_v50 = vcombine.low %v1477_v14, %v1491_v32  ;;  %v1495_v63 = vcombine.high %v1477_v14, %v1491_v32 }
 0x190   :  { %v5414_v29 = vcombine.low %v1491_v32, %v1491_v32  ;;  %v5415_v33 = vcombine.high %v1491_v32, %v1491_v32  ;;  %v1883_v15 = vrot.slane %v1492_v61, %v6630_v7  ;;  %v1900_v41 = vrot.slane %v1493_v62, %v6630_v7 }
 0x191   :  { %v1890_v38 = vrot.slane %v5412_v60, %v6630_v7  ;;  %v1907_v5 = vrot.slane %v5413_v48, %v6630_v7  ;;  %v1917_v26 = vrot.slane %v1494_v50, %v6630_v7  ;;  %v7138_v0 = vrot.slane %v1495_v63, %v6630_v7 }
 0x192   :  { %v1924_v6 = vrot.slane %v5414_v29, %v6630_v7  ;;  %v7142_v14 = vadd.f32 %v6606_v23, %v6707_v13  ;;  %v1891_v22 = vcombine.high %v1883_v15, %v1883_v15  ;;  %v1908_v61 = vcombine.high %v1900_v41, %v1900_v41 }
 0x193   :  { %8993 = vst [vmem:[#allocation49_spill] sm:$0xff] %v7138_v0  ;;  %v1892_v32 = vcombine.high %v1890_v38, %v1890_v38  ;;  %v1909_v3 = vcombine.high %v1907_v5, %v1907_v5  ;;  %v1925_v60 = vcombine.high %v1917_v26, %v1917_v26  ;;  %v7145_v62 = vrot.slane %v5415_v33, %v6630_v7 }
 0x194   :  { %v1926_v45 = vcombine.high %v1924_v6, %v1924_v6  ;;  %v2725_v50 = vsel %vm2276_vm7, %v1883_v15, -inf  ;;  %v2732_v63 = vsel %vm2276_vm7, %v1891_v22, -inf  ;;  %v2739_v29 = vsel %vm2276_vm7, %v1890_v38, -inf }
 0x195   :  { %8994 = vst [vmem:[#allocation50_spill] sm:$0xff] %v7145_v62  ;;  %v2746_v23 = vsel %vm2276_vm7, %v1892_v32, -inf  ;;  %v2726_v13 = vrot.slane %v2725_v50, 4  ;;  %v2733_v54 = vrot.slane %v2732_v63, 4  ;;  %v2740_v53 = vrot.slane %v2739_v29, 4 }
 0x196   :  { %v2747_v51 = vrot.slane %v2746_v23, 4  ;;  %v2753_v4 = vsel %vm2276_vm7, %v1900_v41, -inf  ;;  %v2760_v33 = vsel %vm2276_vm7, %v1908_v61, -inf  ;;  %v2767_v8 = vsel %vm2276_vm7, %v1907_v5, -inf }
 0x197   :  { %v2774_v48 = vsel %vm2276_vm7, %v1909_v3, -inf  ;;  %v6048_v9 = vpop.eup %6047  ;;  %v2727_v15 = vmax.f32 %v2725_v50, %v2726_v13  ;;  %v7157_v20 = vmax.f32 %v2732_v63, %v2733_v54  ;;  %v2741_v22 = vmax.f32 %v2739_v29, %v2740_v53 }
 0x198   :  { %v7159_v38 = vmax.f32 %v2746_v23, %v2747_v51  ;;  %v2754_v32 = vrot.slane %v2753_v4, 4  ;;  %v2761_v56 = vrot.slane %v2760_v33, 4  ;;  %v2768_v19 = vrot.slane %v2767_v8, 4 }
 0x199   :  { %8995 = vst [vmem:[#allocation51_spill] sm:$0xff] %v7157_v20  ;;  %v2775_v11 = vrot.slane %v2774_v48, 4  ;;  %v2728_v21 = vrot.slane %v2727_v15, 2  ;;  %v2742_v5 = vrot.slane %v2741_v22, 2  ;;  %v2781_v63 = vsel %vm2276_vm7, %v1917_v26, -inf }
 0x19a   :  { %8996 = vst [vmem:[#allocation52_spill] sm:$0xff] %v7159_v38  ;;  %v2755_v58 = vmax.f32 %v2753_v4, %v2754_v32  ;;  %v7164_v3 = vmax.f32 %v2760_v33, %v2761_v56  ;;  %v2769_v50 = vmax.f32 %v2767_v8, %v2768_v19  ;;  %v2788_v29 = vsel %vm2276_vm7, %v1925_v60, -inf }
 0x19b   :  { %v7166_v54 = vmax.f32 %v2774_v48, %v2775_v11  ;;  %v7168_v53 = vmax.f32 %v2727_v15, %v2728_v21  ;;  %v7173_v23 = vmax.f32 %v2741_v22, %v2742_v5  ;;  %v2782_v4 = vrot.slane %v2781_v63, 4 }
 0x19c   :  { %8997 = vst [vmem:[#allocation53_spill] sm:$0xff] %v7164_v3  ;;  %v2756_v13 = vrot.slane %v2755_v58, 2  ;;  %v2770_v61 = vrot.slane %v2769_v50, 2  ;;  %v2789_v56 = vrot.slane %v2788_v29, 4  ;;  %v2795_v8 = vsel %vm2276_vm7, %v1924_v6, -inf }
 0x19d   :  { %8998 = vst [vmem:[#allocation54_spill] sm:$0xff] %v7166_v54  ;;  %8999 = vst [vmem:[#allocation55_spill] sm:$0xff] %v7168_v53  ;;  %v2802_v11 = vsel %vm2276_vm7, %v1926_v45, -inf  ;;  %v2796_v48 = vrot.slane %v2795_v8, 4  ;;  %v7183_v60 = vmax.f32 %v2781_v63, %v2782_v4  ;;  %v7187_v15 = vsel %vm2276_vm7, %v7138_v0, -inf }
 0x19e   :  { %9000 = vst [vmem:[#allocation56_spill] sm:$0xff] %v7173_v23  ;;  %v7178_v21 = vmax.f32 %v2755_v58, %v2756_v13  ;;  %v2803_v26 = vrot.slane %v2802_v11, 4  ;;  %v7181_v33 = vmax.f32 %v2769_v50, %v2770_v61  ;;  %9004 = vst [vmem:[#allocation60_spill] sm:$0xff] %v7187_v15  ;;  %v7191_v22 = vsel %vm2276_vm7, %v7145_v62, -inf }
 0x19f   :  { %9003 = vst [vmem:[#allocation59_spill] sm:$0xff] %v7183_v60  ;;  %9005 = vst [vmem:[#allocation61_spill] sm:$0xff] %v7191_v22  ;;  %v7193_v6 = vmax.f32 %v2788_v29, %v2789_v56  ;;  %v7195_v58 = vmax.f32 %v2795_v8, %v2796_v48  ;;  %v1496_v5 = vcombine.low %v7084_v36, %v6048_v9  ;;  %6049 = vtanh.f32 %v7110_v47  ;;  %v9011_v47 = vld [vmem:[#allocation12_spill] sm:$0xff] }
 0x1a0   :  { %9001 = vst [vmem:[#allocation57_spill] sm:$0xff] %v7178_v21  ;;  %9002 = vst [vmem:[#allocation58_spill] sm:$0xff] %v7181_v33  ;;  %v7197_v45 = vmax.f32 %v2802_v11, %v2803_v26  ;;  %v1497_v50 = vcombine.high %v7084_v36, %v6048_v9  ;;  %6051 = vtanh.f32 %v7114_v1  ;;  %v1250_v29 = vadd.f32 %v6608_v2, %v6709_v16  ;;  %v9010_v36 = vld [vmem:[#allocation11_spill] sm:$0xff] }
 0x1a1   :  { %9006 = vst [vmem:[#allocation62_spill] sm:$0xff] %v7193_v6  ;;  %9007 = vst [vmem:[#allocation63_spill] sm:$0xff] %v7195_v58  ;;  %v7210_v4 = vrot.slane %v1496_v5, %v6630_v7  ;;  %6053 = vtanh.f32 %v7118_v59  ;;  %v1249_v9 = vadd.f32 %v6610_v24, %v9010_v36  ;;  %v1251_v8 = vadd.f32 %v6612_v25, %v9011_v47  ;;  %v9016_v36 = vld [vmem:[#allocation13_spill] sm:$0xff] }
 0x1a2   :  { %9008 = vst [vmem:[#allocation64_spill] sm:$0xff] %v7197_v45  ;;  %v7213_v56 = vrot.slane %v1497_v50, %v6630_v7  ;;  %6055 = vtanh.f32 %v7125_v30  ;;  %v9012_v24 = vcombine.high %v6773_v12, %v6793_v34  ;;  %v9013_v25 = vcombine.high %v6793_v34, %v6793_v34 }
 0x1a3   :  { %6057 = vtanh.f32 %v7129_v31  ;;  %v9015_v50 = vcombine.high %v7026_v18, %v7026_v18  ;;  %v9017_v47 = vrot.slane %v9016_v36, 2  ;;  %v9020_v32 = vrot.slane %v6738_v49, 2 }
 0x1a4   :  { %9009 = vst [vmem:[#allocation65_spill] sm:$0xff] %v7213_v56  ;;  %v7232_v59 = vrot.slane %v9012_v24, %v6630_v7  ;;  %v7238_v30 = vrot.slane %v9013_v25, %v6630_v7  ;;  %6059 = vtanh.f32 %v7142_v14  ;;  %v9014_v14 = vcombine.high %v7015_v43, %v7026_v18  ;;  %v9018_v25 = vld [vmem:[#allocation14_spill] sm:$0xff] }
 0x1a5   :  { %6061 = vtanh.f32 %v1250_v29  ;;  %v7263_v29 = vrot.slane %v9015_v50, %v6630_v7  ;;  %v2288_v24 = vmax.f32 %v9016_v36, %v9017_v47  ;;  %v9019_v61 = vrot.slane %v9018_v25, 2 }
 0x1a6   :  { %6063 = vtanh.f32 %v1249_v9  ;;  %v7257_v5 = vrot.slane %v9014_v14, %v6630_v7  ;;  %v2316_v43 = vmax.f32 %v6738_v49, %v9020_v32  ;;  %v9021_v14 = vrot.slane %v6743_v40, 2 }
 0x1a7   :  { %6065 = vtanh.f32 %v1251_v8  ;;  %v2302_v9 = vmax.f32 %v9018_v25, %v9019_v61  ;;  %v2289_v36 = vrot.slane %v2288_v24, 1  ;;  %v2343_v8 = vrot.slane %v6755_v28, 2 }
 0x1a8   :  { %v2330_v13 = vmax.f32 %v6743_v40, %v9021_v14  ;;  %v2317_v61 = vrot.slane %v2316_v43, 1  ;;  %v2357_v19 = vrot.slane %v6759_v39, 2 }
 0x1a9   :  { %v6050_v47 = vpop.eup %6049  ;;  %v2303_v63 = vrot.slane %v2302_v9, 1  ;;  %v2344_v41 = vmax.f32 %v6755_v28, %v2343_v8  ;;  %v7288_v50 = vmax.f32 %v2288_v24, %v2289_v36 }
 0x1aa   :  { %v2331_v25 = vrot.slane %v2330_v13, 1  ;;  %v6052_v49 = vpop.eup %6051  ;;  %v1498_v32 = vcombine.low %v7120_v37, %v6050_v47  ;;  %v1499_v40 = vcombine.high %v7120_v37, %v6050_v47  ;;  %v7292_v26 = vmax.f32 %v2316_v43, %v2317_v61  ;;  %v9023_v47 = vld [vmem:[#allocation9_spill] sm:$0xff] }
 0x1ab   :  { %v6054_v51 = vpop.eup %6053  ;;  %v7290_v18 = vmax.f32 %v2302_v9, %v2303_v63  ;;  %v2358_v48 = vmax.f32 %v6759_v39, %v2357_v19  ;;  %v9024_v28 = vcombine.high %v9023_v47, %v9023_v47  ;;  %v2345_v36 = vrot.slane %v2344_v41, 1 }
 0x1ac   :  { %v6056_v11 = vpop.eup %6055  ;;  %v1520_v34 = vrot.slane %v1498_v32, %v6630_v7  ;;  %v7297_v12 = vrot.slane %v1499_v40, %v6630_v7  ;;  %v7299_v37 = vmax.f32 %v2330_v13, %v2331_v25 }
 0x1ad   :  { %v7305_v24 = vsel %vm2276_vm7, %v9024_v28, -inf  ;;  %v6058_v63 = vpop.eup %6057  ;;  %v1532_v9 = vcombine.low %v6052_v49, %v6056_v11  ;;  %v1533_v43 = vcombine.high %v6052_v49, %v6056_v11  ;;  %v2359_v8 = vrot.slane %v2358_v48, 1 }
 0x1ae   :  { %9022 = vst [vmem:[#allocation11_spill] sm:$0xff] %v7297_v12  ;;  %v6060_v39 = vpop.eup %6059  ;;  %v1528_v19 = vcombine.low %v7210_v4, %v1520_v34  ;;  %v1529_v61 = vcombine.high %v7210_v4, %v1520_v34  ;;  %v1530_v13 = vcombine.low %v7213_v56, %v7297_v12  ;;  %v5416_v40 = vcombine.low %v1520_v34, %v1520_v34 }
 0x1af   :  { %v6062_v32 = vpop.eup %6061  ;;  %v5417_v47 = vcombine.high %v1520_v34, %v1520_v34  ;;  %v5418_v28 = vcombine.low %v7297_v12, %v7297_v12  ;;  %v1534_v11 = vcombine.low %v6054_v51, %v6058_v63 }
 0x1b0   :  { %v6064_v49 = vpop.eup %6063  ;;  %v7317_v14 = vrot.slane %v1528_v19, %v6630_v7  ;;  %v7320_v4 = vrot.slane %v1529_v61, %v6630_v7  ;;  %v7323_v31 = vrot.slane %v1530_v13, %v6630_v7  ;;  %v7328_v34 = vrot.slane %v5416_v40, %v6630_v7 }
 0x1b1   :  { %v6066_v16 = vpop.eup %6065  ;;  %v7331_v2 = vrot.slane %v5417_v47, %v6630_v7  ;;  %v7334_v1 = vrot.slane %v5418_v28, %v6630_v7  ;;  %v1542_v19 = vrot.slane %v1532_v9, %v6630_v7  ;;  %v1549_v61 = vrot.slane %v1533_v43, %v6630_v7 }
 0x1b2   :  { %9025 = vst [vmem:[#allocation12_spill] sm:$0xff] %v7317_v14  ;;  %9026 = vst [vmem:[#allocation13_spill] sm:$0xff] %v7320_v4  ;;  %v1535_v13 = vcombine.high %v6054_v51, %v6058_v63  ;;  %v1568_v22 = vcombine.low %v6060_v39, %v6064_v49  ;;  %v1569_v15 = vcombine.high %v6060_v39, %v6064_v49 }
 0x1b3   :  { %9027 = vst [vmem:[#allocation14_spill] sm:$0xff] %v7323_v31  ;;  %9028 = vst [vmem:[#allocation9_spill] sm:$0xff] %v7328_v34  ;;  %v1570_v58 = vcombine.low %v6062_v32, %v6066_v16  ;;  %v1571_v40 = vcombine.high %v6062_v32, %v6066_v16  ;;  %v1556_v60 = vrot.slane %v1534_v11, %v6630_v7 }
 0x1b4   :  { %9029 = vst [vmem:[#allocation66_spill] sm:$0xff] %v7331_v2  ;;  %9030 = vst [vmem:[#allocation67_spill] sm:$0xff] %v7334_v1  ;;  %v1563_v28 = vrot.slane %v1535_v13, %v6630_v7  ;;  %v7345_v9 = vrot.slane %v1568_v22, %v6630_v7  ;;  %v7348_v43 = vrot.slane %v1569_v15, %v6630_v7 }
 0x1b5   :  { %v7351_v51 = vrot.slane %v1570_v58, %v6630_v7  ;;  %v7354_v63 = vrot.slane %v1571_v40, %v6630_v7  ;;  %v7356_v16 = vmax.f32 %v2344_v41, %v2345_v36  ;;  %v1564_v39 = vcombine.low %v1542_v19, %v1556_v60 }
 0x1b6   :  { %v1565_v32 = vcombine.high %v1542_v19, %v1556_v60  ;;  %v1566_v49 = vcombine.low %v1549_v61, %v1563_v28  ;;  %v1567_v11 = vcombine.high %v1549_v61, %v1563_v28  ;;  %v5420_v47 = vcombine.low %v1556_v60, %v1556_v60 }
 0x1b7   :  { %v5421_v13 = vcombine.high %v1556_v60, %v1556_v60  ;;  %v5422_v25 = vcombine.low %v1563_v28, %v1563_v28  ;;  %v5423_v22 = vcombine.high %v1563_v28, %v1563_v28  ;;  %v2019_v33 = vrot.slane %v1564_v39, %v6630_v7 }
 0x1b8   :  { %v2036_v15 = vrot.slane %v1565_v32, %v6630_v7  ;;  %v7361_v58 = vrot.slane %v1566_v49, %v6630_v7  ;;  %v7364_v40 = vrot.slane %v1567_v11, %v6630_v7  ;;  %v2026_v41 = vrot.slane %v5420_v47, %v6630_v7 }
 0x1b9   :  { %v2043_v36 = vrot.slane %v5421_v13, %v6630_v7  ;;  %v7369_v19 = vrot.slane %v5422_v25, %v6630_v7  ;;  %v7371_v60 = vmax.f32 %v2358_v48, %v2359_v8  ;;  %v2027_v61 = vcombine.high %v2019_v33, %v2019_v33 }
 0x1ba   :  { %v2044_v28 = vcombine.high %v2036_v15, %v2036_v15  ;;  %v2061_v39 = vcombine.high %v7361_v58, %v7361_v58  ;;  %v7376_v32 = vrot.slane %v5423_v22, %v6630_v7  ;;  %v2028_v49 = vcombine.high %v2026_v41, %v2026_v41 }
 0x1bb   :  { %v2045_v11 = vcombine.high %v2043_v36, %v2043_v36  ;;  %v2949_v25 = vsel %vm2276_vm7, %v2019_v33, -inf  ;;  %v2956_v48 = vsel %vm2276_vm7, %v2027_v61, -inf  ;;  %v2963_v8 = vsel %vm2276_vm7, %v2026_v41, -inf }
 0x1bc   :  { %v2977_v21 = vsel %vm2276_vm7, %v2036_v15, -inf  ;;  %v2950_v23 = vrot.slane %v2949_v25, 4  ;;  %v2957_v53 = vrot.slane %v2956_v48, 4  ;;  %v2964_v22 = vrot.slane %v2963_v8, 4 }
 0x1bd   :  { %v2970_v34 = vsel %vm2276_vm7, %v2028_v49, -inf  ;;  %v2978_v62 = vrot.slane %v2977_v21, 4  ;;  %v2984_v47 = vsel %vm2276_vm7, %v2044_v28, -inf  ;;  %v2991_v0 = vsel %vm2276_vm7, %v2043_v36, -inf }
 0x1be   :  { %v2971_v14 = vrot.slane %v2970_v34, 4  ;;  %v2951_v13 = vmax.f32 %v2949_v25, %v2950_v23  ;;  %v2958_v45 = vmax.f32 %v2956_v48, %v2957_v53  ;;  %v2965_v33 = vmax.f32 %v2963_v8, %v2964_v22 }
 0x1bf   :  { %v2985_v6 = vrot.slane %v2984_v47, 4  ;;  %v2979_v54 = vmax.f32 %v2977_v21, %v2978_v62  ;;  %v2992_v41 = vrot.slane %v2991_v0, 4  ;;  %v2998_v15 = vsel %vm2276_vm7, %v2045_v11, -inf }
 0x1c0   :  { %v2972_v61 = vmax.f32 %v2970_v34, %v2971_v14  ;;  %v2952_v3 = vrot.slane %v2951_v13, 2  ;;  %v2959_v38 = vrot.slane %v2958_v45, 2  ;;  %v2966_v20 = vrot.slane %v2965_v33, 2 }
 0x1c1   :  { %v2986_v12 = vmax.f32 %v2984_v47, %v2985_v6  ;;  %v2980_v56 = vrot.slane %v2979_v54, 2  ;;  %v2993_v1 = vmax.f32 %v2991_v0, %v2992_v41  ;;  %v2999_v31 = vrot.slane %v2998_v15, 4 }
 0x1c2   :  { %v2973_v49 = vrot.slane %v2972_v61, 2  ;;  %v2953_v28 = vmax.f32 %v2951_v13, %v2952_v3  ;;  %v2960_v2 = vmax.f32 %v2958_v45, %v2959_v38  ;;  %v2967_v36 = vmax.f32 %v2965_v33, %v2966_v20 }
 0x1c3   :  { %v2987_v23 = vrot.slane %v2986_v12, 2  ;;  %v2981_v25 = vmax.f32 %v2979_v54, %v2980_v56  ;;  %v2994_v48 = vrot.slane %v2993_v1, 2  ;;  %v3000_v14 = vmax.f32 %v2998_v15, %v2999_v31 }
 0x1c4   :  { %v2974_v53 = vmax.f32 %v2972_v61, %v2973_v49  ;;  %v2954_v62 = vrot.slane %v2953_v28, 1  ;;  %v2961_v21 = vrot.slane %v2960_v2, 1  ;;  %v2968_v34 = vrot.slane %v2967_v36, 1 }
 0x1c5   :  { %v2988_v11 = vmax.f32 %v2986_v12, %v2987_v23  ;;  %v2982_v22 = vrot.slane %v2981_v25, 1  ;;  %v2995_v4 = vmax.f32 %v2993_v1, %v2994_v48  ;;  %v3001_v6 = vrot.slane %v3000_v14, 2  ;;  %v5946_v48 = vld [vmem:[%s8797_s3 + $0x68] sm:$0xff]  }
 0x1c6   :  { %v2975_v8 = vrot.slane %v2974_v53, 1  ;;  %v2079_v0 = vcombine.high %v7376_v32, %v7376_v32  ;;  %v7392_v47 = vmax.f32 %v2953_v28, %v2954_v62  ;;  %v7394_v38 = vmax.f32 %v2960_v2, %v2961_v21  ;;  %5612 = vmatprep.subr.bf16.mxu0 %v5946_v48 }
 0x1c7   :  { %v2989_v20 = vrot.slane %v2988_v11, 1  ;;  %v2969_v3 = vmax.f32 %v2967_v36, %v2968_v34  ;;  %v2996_v45 = vrot.slane %v2995_v4, 1  ;;  %v3002_v56 = vmax.f32 %v3000_v14, %v3001_v6  ;;  %v5948_v14 = vld [vmem:[%s8797_s3 + $0x70] sm:$0xff]  }
 0x1c8   :  { %9031 = vst [vmem:[#allocation68_spill] sm:$0xff] %v7394_v38  ;;  %v7396_v54 = vmax.f32 %v2974_v53, %v2975_v8  ;;  %v2983_v31 = vmax.f32 %v2981_v25, %v2982_v22  ;;  %v3005_v12 = vsel %vm2276_vm7, %v7361_v58, -inf  ;;  %v3012_v1 = vsel %vm2276_vm7, %v2061_v39, -inf }
 0x1c9   :  { %v3019_v13 = vsel %vm2276_vm7, %v7369_v19, -inf  ;;  %v7403_v33 = vmax.f32 %v2988_v11, %v2989_v20  ;;  %v2997_v61 = vmax.f32 %v2995_v4, %v2996_v45  ;;  %v3006_v2 = vrot.slane %v3005_v12, 4 }
 0x1ca   :  { %9032 = vst [vmem:[#allocation69_spill] sm:$0xff] %v7396_v54  ;;  %v3013_v41 = vrot.slane %v3012_v1, 4  ;;  %v3020_v15 = vrot.slane %v3019_v13, 4  ;;  %v9034_v49 = vcombine.high %v7369_v19, %v7369_v19  ;;  %v3033_v36 = vsel %vm2276_vm7, %v7364_v40, -inf  ;;  %v5947_v19 = vld [vmem:[%s8797_s3 + $0x28] sm:$0xff]  }
 0x1cb   :  { %9033 = vst [vmem:[#allocation70_spill] sm:$0xff] %v7403_v33  ;;  %v9035_v58 = vcombine.high %v7364_v40, %v7364_v40  ;;  %v3003_v23 = vrot.slane %v3002_v56, 1  ;;  %v3007_v53 = vmax.f32 %v3005_v12, %v3006_v2  ;;  %v3034_v40 = vrot.slane %v3033_v36, 4  ;;  %5613 = vmatpush3.bf16.msra.mxu0 %v5947_v19 }
 0x1cc   :  { %v3026_v28 = vsel %vm2276_vm7, %v9034_v49, -inf  ;;  %v3014_v25 = vmax.f32 %v3012_v1, %v3013_v41  ;;  %v3021_v62 = vmax.f32 %v3019_v13, %v3020_v15  ;;  %v3047_v34 = vsel %vm2276_vm7, %v7376_v32, -inf  ;;  %v5949_v13 = vld [vmem:[%s8797_s3 + $0x30] sm:$0xff]   ;;  %5614 = vmatprep.subr.bf16.mxu0 %v5948_v14  ;;  %v5950_v49 = vld [vmem:[%s8797_s3 + $0x78] sm:$0xff]  }
 0x1cd   :  { %v3040_v39 = vsel %vm2276_vm7, %v9035_v58, -inf  ;;  %v3027_v4 = vrot.slane %v3026_v28, 4  ;;  %v3008_v11 = vrot.slane %v3007_v53, 2  ;;  %v3048_v6 = vrot.slane %v3047_v34, 4  ;;  %v5951_v14 = vld [vmem:[%s8797_s3 + $0x38] sm:$0xff]  }
 0x1ce   :  { %v3041_v21 = vrot.slane %v3040_v39, 4  ;;  %v3015_v8 = vrot.slane %v3014_v25, 2  ;;  %v3022_v20 = vrot.slane %v3021_v62, 2  ;;  %v3035_v45 = vmax.f32 %v3033_v36, %v3034_v40 }
 0x1cf   :  { %v3028_v22 = vmax.f32 %v3026_v28, %v3027_v4  ;;  %v3054_v1 = vsel %vm2276_vm7, %v2079_v0, -inf  ;;  %v3009_v2 = vmax.f32 %v3007_v53, %v3008_v11  ;;  %v3049_v32 = vmax.f32 %v3047_v34, %v3048_v6  ;;  %5615 = vmatpush3.bf16.msra.mxu0 %v5949_v13 }
 0x1d0   :  { %v3042_v12 = vmax.f32 %v3040_v39, %v3041_v21  ;;  %v7430_v41 = vmax.f32 %v3014_v25, %v3015_v8  ;;  %v3023_v28 = vmax.f32 %v3021_v62, %v3022_v20  ;;  %v3036_v36 = vrot.slane %v3035_v45, 2  ;;  %5616 = vmatprep.subr.bf16.mxu0 %v5950_v49 }
 0x1d1   :  { %v3029_v15 = vrot.slane %v3028_v22, 2  ;;  %v3055_v39 = vrot.slane %v3054_v1, 4  ;;  %v7435_v0 = vmax.f32 %v3002_v56, %v3003_v23  ;;  %v3010_v4 = vrot.slane %v3009_v2, 1 }
 0x1d2   :  { %v3043_v58 = vrot.slane %v3042_v12, 2  ;;  %v3050_v19 = vrot.slane %v3049_v32, 2  ;;  %v3024_v25 = vrot.slane %v3023_v28, 1  ;;  %v3037_v40 = vmax.f32 %v3035_v45, %v3036_v36 }
 0x1d3   :  { %9036 = vst [vmem:[#allocation71_spill] sm:$0xff] %v7435_v0  ;;  %v7437_v48 = vmax.f32 %v3028_v22, %v3029_v15  ;;  %v3056_v21 = vmax.f32 %v3054_v1, %v3055_v39  ;;  %v3011_v62 = vmax.f32 %v3009_v2, %v3010_v4  ;;  %v7446_v56 = vmax.f32 %v7392_v47, %v2969_v3 }
 0x1d4   :  { %v7443_v34 = vmax.f32 %v3042_v12, %v3043_v58  ;;  %v3051_v11 = vmax.f32 %v3049_v32, %v3050_v19  ;;  %v3025_v23 = vmax.f32 %v3023_v28, %v3024_v25  ;;  %v3038_v22 = vrot.slane %v3037_v40, 1  ;;  %5617 = vmatpush3.bf16.msra.mxu0 %v5951_v14 }
 0x1d5   :  { %9037 = vst [vmem:[#allocation72_spill] sm:$0xff] %v7446_v56  ;;  %v7449_v6 = vmax.f32 %v2983_v31, %v2997_v61  ;;  %v1600_v45 = vcombine.low %v7345_v9, %v7351_v51  ;;  %v1601_v1 = vcombine.high %v7345_v9, %v7351_v51  ;;  %v1602_v12 = vcombine.low %v7348_v43, %v7354_v63 }
 0x1d6   :  { %v3052_v20 = vrot.slane %v3051_v11, 1  ;;  %v3039_v13 = vmax.f32 %v3037_v40, %v3038_v22  ;;  %v3057_v47 = vrot.slane %v3056_v21, 2  ;;  %v7457_v3 = vmax.f32 %v3011_v62, %v3025_v23 }
 0x1d7   :  { %9038 = vst [vmem:[#allocation73_spill] sm:$0xff] %v7449_v6  ;;  %v1603_v2 = vcombine.high %v7348_v43, %v7354_v63  ;;  %v5424_v61 = vcombine.low %v7351_v51, %v7351_v51  ;;  %v2087_v15 = vrot.slane %v1600_v45, %v6630_v7  ;;  %v5425_v9 = vcombine.high %v7351_v51, %v7351_v51 }
 0x1d8   :  { %9039 = vst [vmem:[#allocation74_spill] sm:$0xff] %v7457_v3  ;;  %v3053_v31 = vmax.f32 %v3051_v11, %v3052_v20  ;;  %v2104_v32 = vrot.slane %v1601_v1, %v6630_v7  ;;  %v5426_v49 = vcombine.low %v7354_v63, %v7354_v63  ;;  %v7470_v28 = vrot.slane %v1602_v12, %v6630_v7 }
 0x1d9   :  { %v5427_v43 = vcombine.high %v7354_v63, %v7354_v63  ;;  %v2094_v58 = vrot.slane %v5424_v61, %v6630_v7  ;;  %v2095_v39 = vcombine.high %v2087_v15, %v2087_v15  ;;  %v2111_v4 = vrot.slane %v5425_v9, %v6630_v7 }
 0x1da   :  { %9040 = vst [vmem:[#allocation75_spill] sm:$0xff] %v7470_v28  ;;  %v7474_v36 = vmax.f32 %v3039_v13, %v3053_v31  ;;  %v7478_v19 = vmax.f32 %v3056_v21, %v3057_v47  ;;  %v2112_v51 = vcombine.high %v2104_v32, %v2104_v32  ;;  %v7481_v25 = vrot.slane %v5426_v49, %v6630_v7 }
 0x1db   :  { %v7484_v40 = vrot.slane %v1603_v2, %v6630_v7  ;;  %v2096_v14 = vcombine.high %v2094_v58, %v2094_v58  ;;  %v2113_v62 = vcombine.high %v2111_v4, %v2111_v4  ;;  %v3061_v11 = vsel %vm2276_vm7, %v2087_v15, -inf }
 0x1dc   :  { %9041 = vst [vmem:[#allocation76_spill] sm:$0xff] %v7474_v36  ;;  %9042 = vst [vmem:[#allocation77_spill] sm:$0xff] %v7481_v25  ;;  %v7492_v21 = vrot.slane %v5427_v43, %v6630_v7  ;;  %v3062_v22 = vrot.slane %v3061_v11, 4  ;;  %v3068_v20 = vsel %vm2276_vm7, %v2095_v39, -inf  ;;  %v3075_v12 = vsel %vm2276_vm7, %v2094_v58, -inf }
 0x1dd   :  { %9043 = vst [vmem:[#allocation78_spill] sm:$0xff] %v7484_v40  ;;  %v3069_v1 = vrot.slane %v3068_v20, 4  ;;  %v3082_v13 = vsel %vm2276_vm7, %v2096_v14, -inf  ;;  %v3076_v2 = vrot.slane %v3075_v12, 4  ;;  %v3089_v61 = vsel %vm2276_vm7, %v2104_v32, -inf }
 0x1de   :  { %9044 = vst [vmem:[#allocation79_spill] sm:$0xff] %v7492_v21  ;;  %v3063_v47 = vmax.f32 %v3061_v11, %v3062_v22  ;;  %v3083_v31 = vrot.slane %v3082_v13, 4  ;;  %v3090_v9 = vrot.slane %v3089_v61, 4  ;;  %v7503_v49 = vsel %vm2276_vm7, %v2112_v51, -inf }
 0x1df   :  { %v7500_v15 = vmax.f32 %v3068_v20, %v3069_v1  ;;  %9045 = vst [vmem:[#allocation80_spill] sm:$0xff] %v7503_v49  ;;  %v3103_v43 = vsel %vm2276_vm7, %v2111_v4, -inf  ;;  %v3077_v58 = vmax.f32 %v3075_v12, %v3076_v2  ;;  %v7514_v63 = vsel %vm2276_vm7, %v2113_v62, -inf  ;;  %v5952_v4 = vld [vmem:[%s8797_s3 + $0x140] sm:$0xff]  }
 0x1e0   :  { %v3064_v45 = vrot.slane %v3063_v47, 2  ;;  %v7508_v23 = vmax.f32 %v3082_v13, %v3083_v31  ;;  %v3091_v11 = vmax.f32 %v3089_v61, %v3090_v9  ;;  %v3104_v22 = vrot.slane %v3103_v43, 4  ;;  %9047 = vst [vmem:[#allocation82_spill] sm:$0xff] %v7514_v63  ;;  %5658 = vmatprep.subr.bf16.mxu0 %v5952_v4 }
 0x1e1   :  { %v3078_v1 = vrot.slane %v3077_v58, 2  ;;  %v3117_v2 = vsel %vm2276_vm7, %v7470_v28, -inf  ;;  %v3131_v31 = vsel %vm2276_vm7, %v7481_v25, -inf  ;;  %v3145_v32 = vsel %vm2276_vm7, %v7484_v40, -inf }
 0x1e2   :  { %9046 = vst [vmem:[#allocation81_spill] sm:$0xff] %v7508_v23  ;;  %v3065_v20 = vmax.f32 %v3063_v47, %v3064_v45  ;;  %v3092_v12 = vrot.slane %v3091_v11, 2  ;;  %v3105_v13 = vmax.f32 %v3103_v43, %v3104_v22  ;;  %v3118_v47 = vrot.slane %v3117_v2, 4 }
 0x1e3   :  { %v3079_v45 = vmax.f32 %v3077_v58, %v3078_v1  ;;  %v3132_v9 = vrot.slane %v3131_v31, 4  ;;  %v3159_v51 = vsel %vm2276_vm7, %v7492_v21, -inf  ;;  %v3146_v36 = vrot.slane %v3145_v32, 4 }
 0x1e4   :  { %v3066_v61 = vrot.slane %v3065_v20, 1  ;;  %v3093_v39 = vmax.f32 %v3091_v11, %v3092_v12  ;;  %v3106_v62 = vrot.slane %v3105_v13, 2  ;;  %v3119_v14 = vmax.f32 %v3117_v2, %v3118_v47 }
 0x1e5   :  { %v3080_v22 = vrot.slane %v3079_v45, 1  ;;  %v3133_v8 = vmax.f32 %v3131_v31, %v3132_v9  ;;  %v3160_v3 = vrot.slane %v3159_v51, 4  ;;  %v9048_v11 = vrot.slane %v7305_v24, 4  ;;  %v9051_v9 = vld [vmem:[#allocation10_spill] sm:$0xff] }
 0x1e6   :  { %v3067_v43 = vmax.f32 %v3065_v20, %v3066_v61  ;;  %v3094_v53 = vrot.slane %v3093_v39, 1  ;;  %v3107_v7 = vmax.f32 %v3105_v13, %v3106_v62  ;;  %v3120_v1 = vrot.slane %v3119_v14, 2 }
 0x1e7   :  { %v3081_v58 = vmax.f32 %v3079_v45, %v3080_v22  ;;  %v3134_v6 = vrot.slane %v3133_v8, 2  ;;  %v2370_v4 = vmax.f32 %v7305_v24, %v9048_v11  ;;  %v3147_v33 = vmax.f32 %v3145_v32, %v3146_v36 }
 0x1e8   :  { %v3108_v12 = vrot.slane %v3107_v7, 1  ;;  %v3161_v0 = vmax.f32 %v3159_v51, %v3160_v3  ;;  %v3121_v20 = vmax.f32 %v3119_v14, %v3120_v1  ;;  %v7533_v13 = vmax.f32 %v3093_v39, %v3094_v53  ;;  %v9057_v39 = vld [vmem:[#allocation22_spill] sm:$0xff] }
 0x1e9   :  { %v3135_v61 = vmax.f32 %v3133_v8, %v3134_v6  ;;  %v7531_v2 = vmax.f32 %v3067_v43, %v3081_v58  ;;  %v2371_v31 = vrot.slane %v2370_v4, 2  ;;  %v3148_v47 = vrot.slane %v3147_v33, 2  ;;  %v9055_v8 = vld [vmem:[#allocation21_spill] sm:$0xff] }
 0x1ea   :  { %9050 = vst [vmem:[#allocation84_spill] sm:$0xff] %v7533_v13  ;;  %v3162_v45 = vrot.slane %v3161_v0, 2  ;;  %v9052_v62 = vcombine.high %v9051_v9, %v9051_v9  ;;  %v3122_v24 = vrot.slane %v3121_v20, 1  ;;  %v9056_v6 = vcombine.high %v9055_v8, %v9055_v8 }
 0x1eb   :  { %9049 = vst [vmem:[#allocation83_spill] sm:$0xff] %v7531_v2  ;;  %v3136_v11 = vrot.slane %v3135_v61, 1  ;;  %v2372_v38 = vmax.f32 %v2370_v4, %v2371_v31  ;;  %v7539_v36 = vmax.f32 %v3147_v33, %v3148_v47  ;;  %v9058_v14 = vcombine.high %v9057_v39, %v9057_v39 }
 0x1ec   :  { %v2382_v22 = vsel %vm2276_vm7, %v9052_v62, -inf  ;;  %v7541_v3 = vmax.f32 %v3161_v0, %v3162_v45  ;;  %v2396_v53 = vsel %vm2276_vm7, %v9056_v6, -inf  ;;  %v7551_v51 = vmax.f32 %v3107_v7, %v3108_v12 }
 0x1ed   :  { %v2383_v56 = vrot.slane %v2382_v22, 4  ;;  %9053 = vst [vmem:[#allocation10_spill] sm:$0xff] %v7539_v36  ;;  %v2410_v32 = vsel %vm2276_vm7, %v9058_v14, -inf  ;;  %v7553_v43 = vmax.f32 %v3121_v20, %v3122_v24  ;;  %v7555_v58 = vmax.f32 %v3135_v61, %v3136_v11 }
 0x1ee   :  { %9054 = vst [vmem:[#allocation85_spill] sm:$0xff] %v7541_v3  ;;  %9059 = vst [vmem:[#allocation21_spill] sm:$0xff] %v7551_v51  ;;  %v2373_v1 = vrot.slane %v2372_v38, 1  ;;  %v2397_v4 = vrot.slane %v2396_v53, 4  ;;  %v2411_v31 = vrot.slane %v2410_v32, 4  ;;  %v9062_v9 = vcombine.high %v6816_v35, %v6816_v35  ;;  %v9074_v51 = vld [vmem:[#allocation34_spill] sm:$0xff] }
 0x1ef   :  { %9060 = vst [vmem:[#allocation22_spill] sm:$0xff] %v7553_v43  ;;  %9061 = vst [vmem:[#allocation86_spill] sm:$0xff] %v7555_v58  ;;  %v2384_v33 = vmax.f32 %v2382_v22, %v2383_v56  ;;  %v9063_v7 = vcombine.high %v6831_v27, %v6831_v27  ;;  %v9064_v11 = vcombine.high %v6828_v52, %v6828_v52  ;;  %v7577_v27 = vsel %vm2276_vm7, %v7232_v59, -inf }
 0x1f0   :  { %v2424_v62 = vsel %vm2276_vm7, %v9062_v9, -inf  ;;  %v2398_v20 = vmax.f32 %v2396_v53, %v2397_v4  ;;  %v2412_v56 = vmax.f32 %v2410_v32, %v2411_v31  ;;  %v9065_v35 = vcombine.high %v6842_v17, %v6842_v17 }
 0x1f1   :  { %v2385_v45 = vrot.slane %v2384_v33, 2  ;;  %v2438_v12 = vsel %vm2276_vm7, %v9063_v7, -inf  ;;  %v2425_v61 = vrot.slane %v2424_v62, 4  ;;  %v2452_v8 = vsel %vm2276_vm7, %v9064_v11, -inf }
 0x1f2   :  { %v2439_v22 = vrot.slane %v2438_v12, 4  ;;  %v2466_v6 = vsel %vm2276_vm7, %v9065_v35, -inf  ;;  %v2399_v39 = vrot.slane %v2398_v20, 2  ;;  %v2413_v53 = vrot.slane %v2412_v56, 2 }
 0x1f3   :  { %v2386_v24 = vmax.f32 %v2384_v33, %v2385_v45  ;;  %v2426_v14 = vmax.f32 %v2424_v62, %v2425_v61  ;;  %v7579_v4 = vmax.f32 %v2372_v38, %v2373_v1  ;;  %v2453_v31 = vrot.slane %v2452_v8, 4 }
 0x1f4   :  { %v2440_v32 = vmax.f32 %v2438_v12, %v2439_v22  ;;  %v2467_v52 = vrot.slane %v2466_v6, 4  ;;  %v2400_v45 = vmax.f32 %v2398_v20, %v2399_v39  ;;  %v2414_v9 = vmax.f32 %v2412_v56, %v2413_v53 }
 0x1f5   :  { %v2387_v33 = vrot.slane %v2386_v24, 1  ;;  %v2427_v7 = vrot.slane %v2426_v14, 2  ;;  %v2454_v17 = vmax.f32 %v2452_v8, %v2453_v31  ;;  %v9066_v0 = vcombine.high %v7232_v59, %v7232_v59 }
 0x1f6   :  { %v2441_v11 = vrot.slane %v2440_v32, 2  ;;  %v2468_v47 = vmax.f32 %v2466_v6, %v2467_v52  ;;  %v2401_v62 = vrot.slane %v2400_v45, 1  ;;  %v2415_v12 = vrot.slane %v2414_v9, 1 }
 0x1f7   :  { %v2480_v2 = vsel %vm2276_vm7, %v9066_v0, -inf  ;;  %v2428_v38 = vmax.f32 %v2426_v14, %v2427_v7  ;;  %v2455_v61 = vrot.slane %v2454_v17, 2  ;;  %v7588_v20 = vsel %vm2276_vm7, %v7238_v30, -inf }
 0x1f8   :  { %v2442_v1 = vmax.f32 %v2440_v32, %v2441_v11  ;;  %v2469_v22 = vrot.slane %v2468_v47, 2  ;;  %v2481_v43 = vrot.slane %v2480_v2, 4  ;;  %v7590_v56 = vmax.f32 %v2386_v24, %v2387_v33  ;;  %v9068_v24 = vld [vmem:[#allocation31_spill] sm:$0xff] }
 0x1f9   :  { %v7592_v8 = vmax.f32 %v2400_v45, %v2401_v62  ;;  %v7594_v6 = vmax.f32 %v2414_v9, %v2415_v12  ;;  %v2429_v59 = vrot.slane %v2428_v38, 1  ;;  %v2456_v0 = vmax.f32 %v2454_v17, %v2455_v61 }
 0x1fa   :  { %v2443_v39 = vrot.slane %v2442_v1, 1  ;;  %v2470_v53 = vmax.f32 %v2468_v47, %v2469_v22  ;;  %v2482_v31 = vmax.f32 %v2480_v2, %v2481_v43  ;;  %v9067_v52 = vcombine.high %v7238_v30, %v7238_v30  ;;  %v9070_v47 = vld [vmem:[#allocation32_spill] sm:$0xff] }
 0x1fb   :  { %v7596_v14 = vmax.f32 %v2428_v38, %v2429_v59  ;;  %v9069_v33 = vrot.slane %v9068_v24, 2  ;;  %v2457_v9 = vrot.slane %v2456_v0, 1  ;;  %v9071_v2 = vrot.slane %v9070_v47, 2 }
 0x1fc   :  { %v2494_v7 = vsel %vm2276_vm7, %v9067_v52, -inf  ;;  %v2471_v11 = vrot.slane %v2470_v53, 1  ;;  %v2483_v62 = vrot.slane %v2482_v31, 2  ;;  %v9072_v38 = vrot.slane %v6965_v42, 2 }
 0x1fd   :  { %v2512_v45 = vmax.f32 %v9068_v24, %v9069_v33  ;;  %v2495_v12 = vrot.slane %v2494_v7, 4  ;;  %v2526_v43 = vmax.f32 %v9070_v47, %v9071_v2  ;;  %v9073_v30 = vrot.slane %v6976_v10, 2 }
 0x1fe   :  { %v2540_v61 = vmax.f32 %v6965_v42, %v9072_v38  ;;  %v7615_v59 = vmax.f32 %v2442_v1, %v2443_v39  ;;  %v7617_v52 = vmax.f32 %v2456_v0, %v2457_v9  ;;  %v2484_v24 = vmax.f32 %v2482_v31, %v2483_v62  ;;  %v9075_v42 = vld [vmem:[#allocation36_spill] sm:$0xff] }
 0x1ff   :  { %v2513_v17 = vrot.slane %v2512_v45, 1  ;;  %v2554_v22 = vmax.f32 %v6976_v10, %v9073_v30  ;;  %v2496_v33 = vmax.f32 %v2494_v7, %v2495_v12  ;;  %v7619_v32 = vmax.f32 %v2470_v53, %v2471_v11  ;;  %v9076_v39 = vld [vmem:[#allocation28_spill] sm:$0xff]  ;;  %v9078_v12 = vld [vmem:[#allocation30_spill] sm:$0xff] }
 0x200   :  { %v2527_v35 = vrot.slane %v2526_v43, 1  ;;  %v2541_v58 = vrot.slane %v2540_v61, 1  ;;  %v2485_v47 = vrot.slane %v2484_v24, 1  ;;  %v2567_v3 = vrot.slane %v9074_v51, 2 }
 0x201   :  { %v2555_v13 = vrot.slane %v2554_v22, 1  ;;  %v2497_v2 = vrot.slane %v2496_v33, 2  ;;  %v2581_v38 = vrot.slane %v9075_v42, 2  ;;  %v7623_v36 = vmax.f32 %v2512_v45, %v2513_v17 }
 0x202   :  { %v7625_v10 = vmax.f32 %v2526_v43, %v2527_v35  ;;  %v7627_v1 = vmax.f32 %v2540_v61, %v2541_v58  ;;  %v9077_v0 = vcombine.high %v9076_v39, %v9076_v39  ;;  %v2568_v9 = vmax.f32 %v9074_v51, %v2567_v3  ;;  %v9080_v58 = vld [vmem:[#allocation41_spill] sm:$0xff]  ;;  %v9082_v61 = vld [vmem:[#allocation42_spill] sm:$0xff] }
 0x203   :  { %v2498_v31 = vmax.f32 %v2496_v33, %v2497_v2  ;;  %v7633_v7 = vmax.f32 %v2554_v22, %v2555_v13  ;;  %v2582_v11 = vmax.f32 %v9075_v42, %v2581_v38  ;;  %v9079_v45 = vcombine.high %v9078_v12, %v9078_v12 }
 0x204   :  { %v2592_v53 = vsel %vm2276_vm7, %v9077_v0, -inf  ;;  %v9081_v17 = vcombine.high %v9080_v58, %v9080_v58  ;;  %v9083_v30 = vcombine.high %v9082_v61, %v9082_v61  ;;  %v7649_v22 = vmax.f32 %v2484_v24, %v2485_v47 }
 0x205   :  { %v2593_v62 = vrot.slane %v2592_v53, 4  ;;  %v2606_v35 = vsel %vm2276_vm7, %v9079_v45, -inf  ;;  %v2499_v3 = vrot.slane %v2498_v31, 1  ;;  %v2569_v51 = vrot.slane %v2568_v9, 1 }
 0x206   :  { %v2620_v43 = vsel %vm2276_vm7, %v9081_v17, -inf  ;;  %v2634_v13 = vsel %vm2276_vm7, %v9083_v30, -inf  ;;  %v2607_v33 = vrot.slane %v2606_v35, 4  ;;  %v9084_v39 = vcombine.high %v7048_v55, %v7048_v55 }
 0x207   :  { %v2594_v2 = vmax.f32 %v2592_v53, %v2593_v62  ;;  %v2621_v42 = vrot.slane %v2620_v43, 4  ;;  %v2635_v38 = vrot.slane %v2634_v13, 4  ;;  %v7655_v12 = vmax.f32 %v2498_v31, %v2499_v3 }
 0x208   :  { %v2648_v0 = vsel %vm2276_vm7, %v9084_v39, -inf  ;;  %v7657_v45 = vmax.f32 %v2568_v9, %v2569_v51  ;;  %v2583_v58 = vrot.slane %v2582_v11, 1  ;;  %v2608_v17 = vmax.f32 %v2606_v35, %v2607_v33 }
 0x209   :  { %v2595_v61 = vrot.slane %v2594_v2, 2  ;;  %v2622_v24 = vmax.f32 %v2620_v43, %v2621_v42  ;;  %v2636_v47 = vmax.f32 %v2634_v13, %v2635_v38  ;;  %v2649_v30 = vrot.slane %v2648_v0, 4 }
 0x20a   :  { %v2609_v54 = vrot.slane %v2608_v17, 2  ;;  %v9085_v53 = vcombine.high %v7062_v44, %v7062_v44  ;;  %v9086_v55 = vcombine.high %v7057_v57, %v7057_v57  ;;  %v9087_v9 = vcombine.high %v7065_v46, %v7065_v46 }
 0x20b   :  { %v2596_v3 = vmax.f32 %v2594_v2, %v2595_v61  ;;  %v2623_v43 = vrot.slane %v2622_v24, 2  ;;  %v2637_v13 = vrot.slane %v2636_v47, 2  ;;  %v2650_v51 = vmax.f32 %v2648_v0, %v2649_v30 }
 0x20c   :  { %v2662_v62 = vsel %vm2276_vm7, %v9085_v53, -inf  ;;  %v2676_v31 = vsel %vm2276_vm7, %v9086_v55, -inf  ;;  %v2690_v35 = vsel %vm2276_vm7, %v9087_v9, -inf  ;;  %v2610_v33 = vmax.f32 %v2608_v17, %v2609_v54 }
 0x20d   :  { %v2663_v42 = vrot.slane %v2662_v62, 4  ;;  %v2677_v38 = vrot.slane %v2676_v31, 4  ;;  %v2691_v44 = vrot.slane %v2690_v35, 4  ;;  %v2597_v39 = vrot.slane %v2596_v3, 1 }
 0x20e   :  { %v2624_v53 = vmax.f32 %v2622_v24, %v2623_v43  ;;  %v2638_v21 = vmax.f32 %v2636_v47, %v2637_v13  ;;  %v2651_v40 = vrot.slane %v2650_v51, 2  ;;  %v2611_v57 = vrot.slane %v2610_v33, 1 }
 0x20f   :  { %v2664_v25 = vmax.f32 %v2662_v62, %v2663_v42  ;;  %v2678_v55 = vmax.f32 %v2676_v31, %v2677_v38  ;;  %v2692_v28 = vmax.f32 %v2690_v35, %v2691_v44  ;;  %v2584_v63 = vmax.f32 %v2582_v11, %v2583_v58 }
 0x210   :  { %v2625_v46 = vrot.slane %v2624_v53, 1  ;;  %v2639_v49 = vrot.slane %v2638_v21, 1  ;;  %v2652_v9 = vmax.f32 %v2650_v51, %v2651_v40  ;;  %v2598_v2 = vmax.f32 %v2596_v3, %v2597_v39 }
 0x211   :  { %v2665_v61 = vrot.slane %v2664_v25, 2  ;;  %v2679_v23 = vrot.slane %v2678_v55, 2  ;;  %v2693_v0 = vrot.slane %v2692_v28, 2  ;;  %v2612_v54 = vmax.f32 %v2610_v33, %v2611_v57 }
 0x212   :  { %v2626_v17 = vmax.f32 %v2624_v53, %v2625_v46  ;;  %v2653_v30 = vrot.slane %v2652_v9, 1  ;;  %v7673_v24 = vsel %vm2276_vm7, %v7257_v5, -inf  ;;  %v2640_v47 = vmax.f32 %v2638_v21, %v2639_v49 }
 0x213   :  { %v2666_v43 = vmax.f32 %v2664_v25, %v2665_v61  ;;  %v2680_v62 = vmax.f32 %v2678_v55, %v2679_v23  ;;  %v2694_v31 = vmax.f32 %v2692_v28, %v2693_v0  ;;  %v2698_v11 = vrot.slane %v7673_v24, 4 }
 0x214   :  { %v2654_v35 = vmax.f32 %v2652_v9, %v2653_v30  ;;  %v9088_v40 = vcombine.high %v7257_v5, %v7257_v5  ;;  %v9089_v3 = vcombine.high %v7263_v29, %v7263_v29  ;;  %v7686_v28 = vsel %vm2276_vm7, %v7263_v29, -inf }
 0x215   :  { %v2667_v51 = vrot.slane %v2666_v43, 1  ;;  %v2681_v33 = vrot.slane %v2680_v62, 1  ;;  %v2695_v42 = vrot.slane %v2694_v31, 1  ;;  %v7690_v23 = vmax.f32 %v7288_v50, %v7290_v18 }
 0x216   :  { %v2704_v58 = vsel %vm2276_vm7, %v9088_v40, -inf  ;;  %v2718_v13 = vsel %vm2276_vm7, %v9089_v3, -inf  ;;  %v7694_v5 = vmax.f32 %v7292_v26, %v7299_v37  ;;  %v7698_v57 = vmax.f32 %v7356_v16, %v7371_v60 }
 0x217   :  { %v2705_v21 = vrot.slane %v2704_v58, 4  ;;  %v2719_v25 = vrot.slane %v2718_v13, 4  ;;  %v2668_v49 = vmax.f32 %v2666_v43, %v2667_v51  ;;  %v2682_v38 = vmax.f32 %v2680_v62, %v2681_v33 }
 0x218   :  { %v2696_v44 = vmax.f32 %v2694_v31, %v2695_v42  ;;  %v7702_v29 = vmax.f32 %v7579_v4, %v7590_v56  ;;  %v7706_v18 = vmax.f32 %v7592_v8, %v7594_v6  ;;  %v7710_v26 = vmax.f32 %v7596_v14, %v7615_v59 }
 0x219   :  { %v2706_v39 = vmax.f32 %v2704_v58, %v2705_v21  ;;  %v2720_v53 = vmax.f32 %v2718_v13, %v2719_v25  ;;  %v7714_v37 = vmax.f32 %v7617_v52, %v7619_v32  ;;  %v7718_v16 = vmax.f32 %v7649_v22, %v7655_v12 }
 0x21a   :  { %v7722_v4 = vmax.f32 %v7623_v36, %v7625_v10  ;;  %v7726_v56 = vmax.f32 %v7627_v1, %v7633_v7  ;;  %v7729_v8 = vmax.f32 %v7657_v45, %v2584_v63  ;;  %v7731_v14 = vmax.f32 %v2598_v2, %v2612_v54 }
 0x21b   :  { %v2707_v50 = vrot.slane %v2706_v39, 2  ;;  %v2721_v60 = vrot.slane %v2720_v53, 2  ;;  %v7733_v32 = vmax.f32 %v2626_v17, %v2640_v47  ;;  %v7735_v59 = vmax.f32 %v2654_v35, %v2668_v49 }
 0x21c   :  { %v2712_v52 = vrot.slane %v7686_v28, 4  ;;  %v7738_v12 = vmax.f32 %v2682_v38, %v2696_v44  ;;  %v3238_v36 = vpack.c.bf16 %v7690_v23, %v7690_v23  ;;  %v3240_v63 = vpack.c.bf16 %v7694_v5, %v7694_v5 }
 0x21d   :  { %v2708_v6 = vmax.f32 %v2706_v39, %v2707_v50  ;;  %v2722_v22 = vmax.f32 %v2720_v53, %v2721_v60  ;;  %v3242_v1 = vpack.c.bf16 %v7698_v57, %v7698_v57  ;;  %v3244_v7 = vpack.c.bf16 %v7702_v29, %v7702_v29 }
 0x21e   :  { %v3246_v55 = vpack.c.bf16 %v7706_v18, %v7706_v18  ;;  %v3248_v46 = vpack.c.bf16 %v7710_v26, %v7710_v26  ;;  %v3250_v9 = vpack.c.bf16 %v7714_v37, %v7714_v37  ;;  %v3252_v61 = vpack.c.bf16 %v7718_v16, %v7718_v16 }
 0x21f   :  { %v2709_v10 = vrot.slane %v2708_v6, 1  ;;  %v2723_v45 = vrot.slane %v2722_v22, 1  ;;  %v3254_v0 = vpack.c.bf16 %v7722_v4, %v7722_v4  ;;  %v3256_v54 = vpack.c.bf16 %v7726_v56, %v7726_v56 }
 0x220   :  { %v3258_v30 = vpack.c.bf16 %v7729_v8, %v7729_v8  ;;  %v3260_v47 = vpack.c.bf16 %v7731_v14, %v7731_v14  ;;  %v3262_v43 = vpack.c.bf16 %v7733_v32, %v7733_v32  ;;  %v3264_v62 = vpack.c.bf16 %v7735_v59, %v7735_v59 }
 0x221   :  { %v2710_v2 = vmax.f32 %v2708_v6, %v2709_v10  ;;  %v2724_v17 = vmax.f32 %v2722_v22, %v2723_v45  ;;  %v3266_v31 = vpack.c.bf16 %v7738_v12, %v7738_v12  ;;  %v3799_v40 = vunpack.c.l.b16 %v3238_v36 }
 0x222   :  { %v3801_v58 = vunpack.c.l.b16 %v3240_v63  ;;  %v3803_v3 = vunpack.c.l.b16 %v3242_v1  ;;  %v3805_v51 = vunpack.c.l.b16 %v3244_v7  ;;  %v3807_v33 = vunpack.c.l.b16 %v3246_v55  ;;  %v9090_v1 = vld [vmem:[#allocation18_spill] sm:$0xff]  ;;  %v9092_v55 = vld [vmem:[#allocation19_spill] sm:$0xff] }
 0x223   :  { %v7770_v35 = vmax.f32 %v2710_v2, %v2724_v17  ;;  %v3809_v42 = vunpack.c.l.b16 %v3248_v46  ;;  %v3811_v21 = vunpack.c.l.b16 %v3250_v9  ;;  %v3813_v25 = vunpack.c.l.b16 %v3252_v61  ;;  %v9095_v17 = vld [vmem:[#allocation29_spill] sm:$0xff] }
 0x224   :  { %v3815_v49 = vunpack.c.l.b16 %v3254_v0  ;;  %v3817_v38 = vunpack.c.l.b16 %v3256_v54  ;;  %v3819_v44 = vunpack.c.l.b16 %v3258_v30  ;;  %v3821_v39 = vunpack.c.l.b16 %v3260_v47  ;;  %v9094_v0 = vld [vmem:[#allocation26_spill] sm:$0xff] }
 0x225   :  { %v3268_v13 = vpack.c.bf16 %v7770_v35, %v7770_v35  ;;  %v3823_v53 = vunpack.c.l.b16 %v3262_v43  ;;  %v3825_v50 = vunpack.c.l.b16 %v3264_v62  ;;  %v3827_v60 = vunpack.c.l.b16 %v3266_v31  ;;  %v9096_v62 = vld [vmem:[#allocation23_spill] sm:$0xff] }
 0x226   :  { %v3869_v22 = vsel %vm3398_vm8, %v3801_v58, %v3799_v40  ;;  %v3883_v36 = vsel %vm3398_vm8, %v3817_v38, %v3815_v49  ;;  %v9091_v7 = vrot.slane %v9090_v1, 1  ;;  %v9093_v46 = vrot.slane %v9092_v55, 1  ;;  %v9098_v58 = vld [vmem:[#allocation24_spill] sm:$0xff] }
 0x227   :  { %v3829_v6 = vunpack.c.l.b16 %v3268_v13  ;;  %v3870_v10 = vsel %vm3400_vm9, %v3803_v3, %v3869_v22  ;;  %v3884_v63 = vsel %vm3400_vm9, %v3819_v44, %v3883_v36  ;;  %v2394_v54 = vrot.slane %v9094_v0, 1 }
 0x228   :  { %v7781_v45 = vmax.f32 %v9090_v1, %v9091_v7  ;;  %v7786_v9 = vmax.f32 %v9092_v55, %v9093_v46  ;;  %v3871_v2 = vsel %vm3402_vm10, %v3805_v51, %v3870_v10  ;;  %v3885_v61 = vsel %vm3402_vm10, %v3821_v39, %v3884_v63  ;;  %v9100_v63 = vld [vmem:[#allocation25_spill] sm:$0xff]  ;;  %v9101_v7 = vld [vmem:[#allocation27_spill] sm:$0xff] }
 0x229   :  { %v2408_v30 = vrot.slane %v9095_v17, 1  ;;  %v3872_v47 = vsel %vm3404_vm11, %v3807_v33, %v3871_v2  ;;  %v3886_v43 = vsel %vm3404_vm11, %v3823_v53, %v3885_v61  ;;  %v9097_v31 = vrot.slane %v9096_v62, 2 }
 0x22a   :  { %v9099_v3 = vrot.slane %v9098_v58, 2  ;;  %v3873_v51 = vsel %vm3406_vm12, %v3809_v42, %v3872_v47  ;;  %v3887_v49 = vsel %vm3406_vm12, %v3825_v50, %v3886_v43  ;;  %v2395_v38 = vmax.f32 %v9094_v0, %v2394_v54  ;;  %v9106_v47 = vld [vmem:[#allocation39_spill] sm:$0xff] }
 0x22b   :  { %v2421_v40 = vmax.f32 %v9096_v62, %v9097_v31  ;;  %v2409_v44 = vmax.f32 %v9095_v17, %v2408_v30  ;;  %v3874_v33 = vsel %vm3408_vm13, %v3811_v21, %v3873_v51  ;;  %v3888_v39 = vsel %vm3408_vm13, %v3827_v60, %v3887_v49  ;;  %v9108_v31 = vld [vmem:[#allocation47_spill] sm:$0xff] }
 0x22c   :  { %v2435_v13 = vmax.f32 %v9098_v58, %v9099_v3  ;;  %v3875_v36 = vsel %vm3410_vm14, %v3813_v25, %v3874_v33  ;;  %v3889_v10 = vsel %vm3410_vm14, %v3829_v6, %v3888_v39  ;;  %v2448_v1 = vrot.slane %v9100_v63, 2  ;;  %v9104_v6 = vld [vmem:[#allocation38_spill] sm:$0xff]  ;;  %v9110_v49 = vld [vmem:[#allocation43_spill] sm:$0xff] }
 0x22d   :  { %v2422_v53 = vrot.slane %v2421_v40, 1  ;;  %v2462_v42 = vrot.slane %v9101_v7, 2  ;;  %v3919_v55 = vpack.c.b16 %v3889_v10, %v3875_v36  ;;  %v9102_v2 = vrot.slane %v7577_v27, 4  ;;  %v9112_v36 = vld [vmem:[#allocation44_spill] sm:$0xff] }
 0x22e   :  { %v2436_v22 = vrot.slane %v2435_v13, 1  ;;  %v2449_v21 = vmax.f32 %v9100_v63, %v2448_v1  ;;  %v9103_v0 = vrot.slane %v7588_v20, 4  ;;  %v9105_v54 = vrot.slane %v9104_v6, 1 }
 0x22f   :  { %v2423_v50 = vmax.f32 %v2421_v40, %v2422_v53  ;;  %v2475_v61 = vmax.f32 %v7577_v27, %v9102_v2  ;;  %v2463_v60 = vmax.f32 %v9101_v7, %v2462_v42  ;;  %4054 = vmatprep.mubr.bf16.mxu1 %v3919_v55  ;;  %v9107_v43 = vrot.slane %v9106_v47, 1  ;;  %v9109_v40 = vld [vmem:[#allocation48_spill] sm:$0xff] }
 0x230   :  { %v2437_v46 = vmax.f32 %v2435_v13, %v2436_v22  ;;  %v2489_v25 = vmax.f32 %v7588_v20, %v9103_v0  ;;  %v2591_v17 = vmax.f32 %v9104_v6, %v9105_v54  ;;  %v2618_v27 = vrot.slane %v9108_v31, 1  ;;  %v9114_v6 = vld [vmem:[#allocation45_spill] sm:$0xff] }
 0x231   :  { %v2476_v30 = vrot.slane %v2475_v61, 2  ;;  %v2605_v62 = vmax.f32 %v9106_v47, %v9107_v43  ;;  %v2632_v58 = vrot.slane %v9109_v40, 1  ;;  %v2450_v3 = vrot.slane %v2449_v21, 1  ;;  %v9115_v47 = vld [vmem:[#allocation46_spill] sm:$0xff] }
 0x232   :  { %v2464_v13 = vrot.slane %v2463_v60, 1  ;;  %v2490_v51 = vrot.slane %v2489_v25, 2  ;;  %v9111_v33 = vrot.slane %v9110_v49, 2  ;;  %v2619_v53 = vmax.f32 %v9108_v31, %v2618_v27 }
 0x233   :  { %v2477_v39 = vmax.f32 %v2475_v61, %v2476_v30  ;;  %v2633_v22 = vmax.f32 %v9109_v40, %v2632_v58  ;;  %v9113_v10 = vrot.slane %v9112_v36, 2  ;;  %v2451_v1 = vmax.f32 %v2449_v21, %v2450_v3 }
 0x234   :  { %v2645_v20 = vmax.f32 %v9110_v49, %v9111_v33  ;;  %v2465_v7 = vmax.f32 %v2463_v60, %v2464_v13  ;;  %v2491_v42 = vmax.f32 %v2489_v25, %v2490_v51  ;;  %v2672_v54 = vrot.slane %v9114_v6, 2  ;;  %v9116_v13 = vld [vmem:[#allocation20_spill] sm:$0xff]  ;;  %v9117_v51 = vld [vmem:[#allocation17_spill] sm:$0xff] }
 0x235   :  { %v2659_v63 = vmax.f32 %v9112_v36, %v9113_v10  ;;  %v2478_v2 = vrot.slane %v2477_v39, 1  ;;  %v2686_v43 = vrot.slane %v9115_v47, 2  ;;  %v2699_v30 = vmax.f32 %v7673_v24, %v2698_v11 }
 0x236   :  { %v2646_v55 = vrot.slane %v2645_v20, 1  ;;  %v2492_v49 = vrot.slane %v2491_v42, 1  ;;  %v2713_v31 = vmax.f32 %v7686_v28, %v2712_v52  ;;  %v2673_v25 = vmax.f32 %v9114_v6, %v2672_v54 }
 0x237   :  { %v2660_v0 = vrot.slane %v2659_v63, 1  ;;  %v2479_v21 = vmax.f32 %v2477_v39, %v2478_v2  ;;  %v2687_v27 = vmax.f32 %v9115_v47, %v2686_v43  ;;  %v2700_v58 = vrot.slane %v2699_v30, 2  ;;  %v9121_v2 = vld [vmem:[#allocation40_spill] sm:$0xff] }
 0x238   :  { %v2647_v61 = vmax.f32 %v2645_v20, %v2646_v55  ;;  %v2493_v40 = vmax.f32 %v2491_v42, %v2492_v49  ;;  %v2714_v3 = vrot.slane %v2713_v31, 2  ;;  %v7846_v33 = vmax.f32 %v9117_v51, %v9116_v13 }
 0x239   :  { %v2661_v60 = vmax.f32 %v2659_v63, %v2660_v0  ;;  %v2674_v20 = vrot.slane %v2673_v25, 1  ;;  %v2688_v36 = vrot.slane %v2687_v27, 1  ;;  %v7850_v24 = vmax.f32 %v7781_v45, %v7786_v9  ;;  %v9122_v0 = vld [vmem:[#allocation37_spill] sm:$0xff] }
 0x23a   :  { %v7852_v11 = vmax.f32 %v2395_v38, %v2409_v44  ;;  %v2701_v28 = vmax.f32 %v2699_v30, %v2700_v58  ;;  %v2715_v52 = vmax.f32 %v2713_v31, %v2714_v3  ;;  %v7854_v39 = vmax.f32 %v2423_v50, %v2437_v46  ;;  %v9126_v50 = vld [vmem:[#allocation15_spill] sm:$0xff] }
 0x23b   :  { %v7856_v10 = vmax.f32 %v2451_v1, %v2465_v7  ;;  %v2675_v63 = vmax.f32 %v2673_v25, %v2674_v20  ;;  %v2689_v42 = vmax.f32 %v2687_v27, %v2688_v36  ;;  %v7858_v55 = vmax.f32 %v2479_v21, %v2493_v40  ;;  %v9127_v1 = vld [vmem:[#allocation16_spill] sm:$0xff]  ;;  %v9129_v21 = vld [vmem:[#allocation33_spill] sm:$0xff]  ;;  %v9130_v25 = vld [vmem:[#allocation35_spill] sm:$0xff] }
 0x23c   :  { %9118 = vst [vmem:[#allocation31_spill] sm:$0xff] %v7854_v39  ;;  %v7862_v6 = vmax.f32 %v9122_v0, %v9121_v2  ;;  %v2702_v54 = vrot.slane %v2701_v28, 1  ;;  %v2716_v47 = vrot.slane %v2715_v52, 1  ;;  %v7864_v45 = vmax.f32 %v2591_v17, %v2605_v62 }
 0x23d   :  { %9119 = vst [vmem:[#allocation32_spill] sm:$0xff] %v7856_v10  ;;  %9120 = vst [vmem:[#allocation34_spill] sm:$0xff] %v7858_v55  ;;  %v7866_v9 = vmax.f32 %v2619_v53, %v2633_v22  ;;  %v7868_v38 = vmax.f32 %v2647_v61, %v2661_v60  ;;  %v7870_v44 = vmax.f32 %v2675_v63, %v2689_v42 }
 0x23e   :  { %v3237_v46 = vpack.c.bf16 %v9126_v50, %v9126_v50  ;;  %v3239_v7 = vpack.c.bf16 %v9127_v1, %v9127_v1  ;;  %v2703_v43 = vmax.f32 %v2701_v28, %v2702_v54  ;;  %v2717_v49 = vmax.f32 %v2715_v52, %v2716_v47 }
 0x23f   :  { %9123 = vst [vmem:[#allocation36_spill] sm:$0xff] %v7866_v9  ;;  %9124 = vst [vmem:[#allocation28_spill] sm:$0xff] %v7868_v38  ;;  %v3241_v30 = vpack.c.bf16 %v7846_v33, %v7846_v33  ;;  %v3243_v17 = vpack.c.bf16 %v7850_v24, %v7850_v24  ;;  %v3245_v62 = vpack.c.bf16 %v7852_v11, %v7852_v11 }
 0x240   :  { %9125 = vst [vmem:[#allocation30_spill] sm:$0xff] %v7870_v44  ;;  %v3247_v53 = vpack.c.bf16 %v7854_v39, %v7854_v39  ;;  %v3249_v22 = vpack.c.bf16 %v7856_v10, %v7856_v10  ;;  %v3251_v61 = vpack.c.bf16 %v7858_v55, %v7858_v55  ;;  %v7888_v31 = vmax.f32 %v2703_v43, %v2717_v49 }
 0x241   :  { %v3253_v60 = vpack.c.bf16 %v9129_v21, %v9129_v21  ;;  %v3255_v27 = vpack.c.bf16 %v9130_v25, %v9130_v25  ;;  %v3257_v40 = vpack.c.bf16 %v7862_v6, %v7862_v6  ;;  %v3259_v58 = vpack.c.bf16 %v7864_v45, %v7864_v45 }
 0x242   :  { %9128 = vst [vmem:[#allocation41_spill] sm:$0xff] %v7888_v31  ;;  %v3261_v3 = vpack.c.bf16 %v7866_v9, %v7866_v9  ;;  %v3263_v13 = vpack.c.bf16 %v7868_v38, %v7868_v38  ;;  %v3265_v51 = vpack.c.bf16 %v7870_v44, %v7870_v44  ;;  %v3267_v20 = vpack.c.bf16 %v7888_v31, %v7888_v31 }
 0x243   :  { %v3798_v36 = vunpack.c.l.b16 %v3237_v46  ;;  %v3800_v28 = vunpack.c.l.b16 %v3239_v7  ;;  %v3802_v52 = vunpack.c.l.b16 %v3241_v30  ;;  %v3804_v63 = vunpack.c.l.b16 %v3243_v17 }
 0x244   :  { %v3806_v42 = vunpack.c.l.b16 %v3245_v62  ;;  %v3808_v2 = vunpack.c.l.b16 %v3247_v53  ;;  %v3810_v0 = vunpack.c.l.b16 %v3249_v22  ;;  %v3812_v54 = vunpack.c.l.b16 %v3251_v61 }
 0x245   :  { %v3814_v47 = vunpack.c.l.b16 %v3253_v60  ;;  %v3816_v43 = vunpack.c.l.b16 %v3255_v27  ;;  %v3818_v49 = vunpack.c.l.b16 %v3257_v40  ;;  %v3820_v55 = vunpack.c.l.b16 %v3259_v58 }
 0x246   :  { %v3822_v10 = vunpack.c.l.b16 %v3261_v3  ;;  %v3824_v38 = vunpack.c.l.b16 %v3263_v13  ;;  %v3826_v39 = vunpack.c.l.b16 %v3265_v51  ;;  %v3828_v9 = vunpack.c.l.b16 %v3267_v20  ;;  %v9134_v3 = vld [vmem:[#allocation81_spill] sm:$0xff] }
 0x247   :  { %v3862_v44 = vsel %vm3398_vm8, %v3800_v28, %v3798_v36  ;;  %v3876_v31 = vsel %vm3398_vm8, %v3816_v43, %v3814_v47  ;;  %v9131_v46 = vrot.slane %v7430_v41, 1  ;;  %v9132_v62 = vrot.slane %v7437_v48, 1 }
 0x248   :  { %v3863_v30 = vsel %vm3400_vm9, %v3802_v52, %v3862_v44  ;;  %v3877_v17 = vsel %vm3400_vm9, %v3818_v49, %v3876_v31  ;;  %v3045_v22 = vrot.slane %v7443_v34, 1  ;;  %v3059_v27 = vrot.slane %v7478_v19, 1 }
 0x249   :  { %v3018_v7 = vmax.f32 %v7430_v41, %v9131_v46  ;;  %v3032_v53 = vmax.f32 %v7437_v48, %v9132_v62  ;;  %v3864_v61 = vsel %vm3402_vm10, %v3804_v63, %v3863_v30  ;;  %v3878_v60 = vsel %vm3402_vm10, %v3820_v55, %v3877_v17  ;;  %v9136_v63 = vld [vmem:[#allocation80_spill] sm:$0xff] }
 0x24a   :  { %v9133_v40 = vrot.slane %v7500_v15, 2  ;;  %v3865_v44 = vsel %vm3404_vm11, %v3806_v42, %v3864_v61  ;;  %v3879_v31 = vsel %vm3404_vm11, %v3822_v10, %v3878_v60  ;;  %v3046_v58 = vmax.f32 %v7443_v34, %v3045_v22  ;;  %v9142_v61 = vld [vmem:[#allocation77_spill] sm:$0xff]  ;;  %v9144_v60 = vld [vmem:[#allocation78_spill] sm:$0xff] }
 0x24b   :  { %v9135_v48 = vrot.slane %v9134_v3, 2  ;;  %v3866_v51 = vsel %vm3406_vm12, %v3808_v2, %v3865_v44  ;;  %v3880_v55 = vsel %vm3406_vm12, %v3824_v38, %v3879_v31  ;;  %v3060_v20 = vmax.f32 %v7478_v19, %v3059_v27  ;;  %v9138_v2 = vld [vmem:[#allocation82_spill] sm:$0xff] }
 0x24c   :  { %v3072_v41 = vmax.f32 %v7500_v15, %v9133_v40  ;;  %v3867_v28 = vsel %vm3408_vm13, %v3810_v0, %v3866_v51  ;;  %v3881_v15 = vsel %vm3408_vm13, %v3826_v39, %v3880_v55  ;;  %v9137_v10 = vrot.slane %v9136_v63, 4  ;;  %v9140_v0 = vld [vmem:[#allocation75_spill] sm:$0xff] }
 0x24d   :  { %v3086_v13 = vmax.f32 %v9134_v3, %v9135_v48  ;;  %v3868_v42 = vsel %vm3410_vm14, %v3812_v54, %v3867_v28  ;;  %v3882_v47 = vsel %vm3410_vm14, %v3828_v9, %v3881_v15  ;;  %v9139_v49 = vrot.slane %v9138_v2, 4  ;;  %v9146_v3 = vld [vmem:[#allocation79_spill] sm:$0xff]  ;;  %v9148_v28 = vld [vmem:[#allocation69_spill] sm:$0xff]  ;;  %v9149_v15 = vld [vmem:[#allocation68_spill] sm:$0xff] }
 0x24e   :  { %v3073_v36 = vrot.slane %v3072_v41, 1  ;;  %v3098_v34 = vmax.f32 %v9136_v63, %v9137_v10  ;;  %v3918_v19 = vpack.c.b16 %v3882_v47, %v3868_v42  ;;  %v9141_v39 = vcombine.high %v9140_v0, %v9140_v0  ;;  %v9150_v47 = vld [vmem:[#allocation71_spill] sm:$0xff] }
 0x24f   :  { %v3087_v52 = vrot.slane %v3086_v13, 1  ;;  %v3112_v38 = vmax.f32 %v9138_v2, %v9139_v49  ;;  %v9143_v54 = vcombine.high %v9142_v61, %v9142_v61  ;;  %v9145_v27 = vcombine.high %v9144_v60, %v9144_v60  ;;  %v9151_v2 = vld [vmem:[#allocation70_spill] sm:$0xff] }
 0x250   :  { %v3074_v43 = vmax.f32 %v3072_v41, %v3073_v36  ;;  %v3099_v30 = vrot.slane %v3098_v34, 2  ;;  %v3124_v17 = vsel %vm2276_vm7, %v9141_v39, -inf  ;;  %4055 = vmatmul.mubr.bf16.vlgmr.msra.gmra.mrb[16].mxu1 %v3918_v19  ;;  %v9147_v48 = vcombine.high %v9146_v3, %v9146_v3 }
 0x251   :  { %v3088_v46 = vmax.f32 %v3086_v13, %v3087_v52  ;;  %v3113_v62 = vrot.slane %v3112_v38, 2  ;;  %v3125_v22 = vrot.slane %v3124_v17, 4  ;;  %v3138_v9 = vsel %vm2276_vm7, %v9143_v54, -inf }
 0x252   :  { %v3152_v40 = vsel %vm2276_vm7, %v9145_v27, -inf  ;;  %v3100_v41 = vmax.f32 %v3098_v34, %v3099_v30  ;;  %v3139_v44 = vrot.slane %v3138_v9, 4  ;;  %v3166_v13 = vsel %vm2276_vm7, %v9147_v48, -inf }
 0x253   :  { %v3153_v31 = vrot.slane %v3152_v40, 4  ;;  %v3114_v51 = vmax.f32 %v3112_v38, %v3113_v62  ;;  %v3126_v55 = vmax.f32 %v3124_v17, %v3125_v22  ;;  %v3167_v36 = vrot.slane %v3166_v13, 4 }
 0x254   :  { %v7960_v52 = vmax.f32 %v9149_v15, %v9148_v28  ;;  %v3101_v63 = vrot.slane %v3100_v41, 1  ;;  %v3140_v10 = vmax.f32 %v3138_v9, %v3139_v44  ;;  %v7964_v34 = vmax.f32 %v9151_v2, %v9150_v47  ;;  %v9155_v2 = vld [vmem:[#allocation85_spill] sm:$0xff] }
 0x255   :  { %v3154_v42 = vmax.f32 %v3152_v40, %v3153_v31  ;;  %v3115_v49 = vrot.slane %v3114_v51, 1  ;;  %v3127_v19 = vrot.slane %v3126_v55, 2  ;;  %v3168_v30 = vmax.f32 %v3166_v13, %v3167_v36 }
 0x256   :  { %v7966_v0 = vmax.f32 %v3018_v7, %v3032_v53  ;;  %v3102_v39 = vmax.f32 %v3100_v41, %v3101_v63  ;;  %v3141_v38 = vrot.slane %v3140_v10, 2  ;;  %v7968_v62 = vmax.f32 %v3046_v58, %v3060_v20 }
 0x257   :  { %v3155_v17 = vrot.slane %v3154_v42, 2  ;;  %v3116_v22 = vmax.f32 %v3114_v51, %v3115_v49  ;;  %v3128_v61 = vmax.f32 %v3126_v55, %v3127_v19  ;;  %v3169_v54 = vrot.slane %v3168_v30, 2 }
 0x258   :  { %v7970_v60 = vmax.f32 %v3074_v43, %v3088_v46  ;;  %v3142_v9 = vmax.f32 %v3140_v10, %v3141_v38  ;;  %v3412_v40 = vsel %vm3398_vm8, %v7694_v5, %v7690_v23  ;;  %v3426_v7 = vsel %vm3398_vm8, %v7726_v56, %v7722_v4 }
 0x259   :  { %v3156_v27 = vmax.f32 %v3154_v42, %v3155_v17  ;;  %v3129_v53 = vrot.slane %v3128_v61, 1  ;;  %v3170_v41 = vmax.f32 %v3168_v30, %v3169_v54  ;;  %v7978_v44 = vmax.f32 %v3102_v39, %v3116_v22  ;;  %v9153_v42 = vld [vmem:[#allocation10_spill] sm:$0xff]  ;;  %v9157_v30 = vld [vmem:[#allocation21_spill] sm:$0xff]  ;;  %v9158_v39 = vld [vmem:[#allocation84_spill] sm:$0xff] }
 0x25a   :  { %v3413_v58 = vsel %vm3400_vm9, %v7698_v57, %v3412_v40  ;;  %v3143_v20 = vrot.slane %v3142_v9, 1  ;;  %v3427_v31 = vsel %vm3400_vm9, %v7729_v8, %v3426_v7  ;;  %v9154_v47 = vrot.slane %v9153_v42, 1  ;;  %v9161_v54 = vld [vmem:[#allocation86_spill] sm:$0xff] }
 0x25b   :  { %v3157_v43 = vrot.slane %v3156_v27, 1  ;;  %v3414_v46 = vsel %vm3402_vm10, %v7702_v29, %v3413_v58  ;;  %v3130_v23 = vmax.f32 %v3128_v61, %v3129_v53  ;;  %v3171_v5 = vrot.slane %v3170_v41, 1  ;;  %v9182_v61 = vld [vmem:[#allocation67_spill] sm:$0xff] }
 0x25c   :  { %v3415_v4 = vsel %vm3404_vm11, %v7706_v18, %v3414_v46  ;;  %v3428_v56 = vsel %vm3402_vm10, %v7731_v14, %v3427_v31  ;;  %v3144_v3 = vmax.f32 %v3142_v9, %v3143_v20  ;;  %v3454_v18 = vsel %vm3398_vm8, %v7964_v34, %v7960_v52  ;;  %v9162_v9 = vld [vmem:[#allocation22_spill] sm:$0xff]  ;;  %v9163_v46 = vld [vmem:[#allocation72_spill] sm:$0xff]  ;;  %v9164_v31 = vld [vmem:[#allocation73_spill] sm:$0xff] }
 0x25d   :  { %v3158_v48 = vmax.f32 %v3156_v27, %v3157_v43  ;;  %v3416_v57 = vsel %vm3406_vm12, %v7710_v26, %v3415_v4  ;;  %v3429_v13 = vsel %vm3404_vm11, %v7733_v32, %v3428_v56  ;;  %v3172_v29 = vmax.f32 %v3170_v41, %v3171_v5 }
 0x25e   :  { %v3417_v8 = vsel %vm3408_vm13, %v7714_v37, %v3416_v57  ;;  %v3430_v51 = vsel %vm3406_vm12, %v7735_v59, %v3429_v13  ;;  %v8001_v14 = vmax.f32 %v3130_v23, %v3144_v3  ;;  %v3455_v32 = vsel %vm3400_vm9, %v7966_v0, %v3454_v18  ;;  %v9170_v3 = vld [vmem:[#allocation76_spill] sm:$0xff]  ;;  %v9171_v13 = vld [vmem:[#allocation31_spill] sm:$0xff] }
 0x25f   :  { %v8005_v55 = vsel %vm3410_vm14, %v7718_v16, %v3417_v8  ;;  %v3431_v26 = vsel %vm3408_vm13, %v7738_v12, %v3430_v51  ;;  %v8011_v37 = vmax.f32 %v3158_v48, %v3172_v29  ;;  %v3456_v36 = vsel %vm3402_vm10, %v7968_v62, %v3455_v32  ;;  %v9152_v12 = vld [vmem:[#allocation6_spill] sm:$0xff]  ;;  %v9172_v8 = vld [vmem:[#allocation28_spill] sm:$0xff]  ;;  %v9173_v18 = vld [vmem:[#allocation83_spill] sm:$0xff] }
 0x260   :  { %v8015_v59 = vsel %vm3410_vm14, %v7770_v35, %v3431_v26  ;;  %v3470_v28 = vrot.slane %v8005_v55, 7  ;;  %v3457_v16 = vsel %vm3404_vm11, %v7970_v60, %v3456_v36  ;;  %v3489_v63 = vand.u32 15, %v9152_v12  ;;  %v9174_v32 = vld [vmem:[#allocation32_spill] sm:$0xff] }
 0x261   :  { %v8932_v15 = vrot.slane %v8015_v59, 7  ;;  %v3458_v10 = vsel %vm3406_vm12, %v7978_v44, %v3457_v16  ;;  %v3151_v35 = vmax.f32 %v9153_v42, %v9154_v47  ;;  %v9156_v49 = vrot.slane %v9155_v2, 1  ;;  %v9177_v42 = vld [vmem:[#allocation34_spill] sm:$0xff] }
 0x262   :  { %v8034_v38 = vmax.f32 %v9158_v39, %v9157_v30  ;;  %v3459_v17 = vsel %vm3408_vm13, %v8001_v14, %v3458_v10  ;;  %vm8042_vm15 = vcmp.ne.s32.totalorder %v3489_v63, 0  ;;  %v8048_v27 = vmax.f32 %v9162_v9, %v9161_v54  ;;  %v9176_v63 = vld [vmem:[#allocation66_spill] sm:$0xff] }
 0x263   :  { %v3165_v19 = vmax.f32 %v9155_v2, %v9156_v49  ;;  %v3482_v22 = vsel %vm88_vm0, %v3470_v28, %v8932_v15  ;;  %v8052_v40 = vsel %vm3410_vm14, %v8011_v37, %v3459_v17  ;;  %v3399_v53 = vsel %vm3398_vm8, %v9127_v1, %v9126_v50  ;;  %v9165_v1 = vld [vmem:[#allocation74_spill] sm:$0xff]  ;;  %vm8085_vm3 = vmpackc.low %vm6103_vm1, %vm8042_vm15 }
 0x264   :  { %v3419_v41 = vsel %vm3398_vm8, %v9130_v25, %v9129_v21  ;;  %v8933_v58 = vrot.slane %v8052_v40, 7  ;;  %v3401_v20 = vsel %vm3400_vm9, %v7846_v33, %v3399_v53  ;;  %v3447_v23 = vsel %vm3398_vm8, %v9164_v31, %v9163_v46  ;;  %v9166_v25 = vld [vmem:[#allocation13_spill] sm:$0xff]  ;;  %v9183_v53 = vld [vmem:[#allocation8_spill] sm:$0xff] }
 0x265   :  { %v8054_v7 = vmax.f32 %v3151_v35, %v3165_v19  ;;  %v3420_v43 = vsel %vm3400_vm9, %v7862_v6, %v3419_v41  ;;  %v3403_v5 = vsel %vm3402_vm10, %v7850_v24, %v3401_v20  ;;  %v3448_v21 = vsel %vm3400_vm9, %v9165_v1, %v3447_v23  ;;  %v9179_v35 = vld [vmem:[#allocation41_spill] sm:$0xff]  ;;  %v9181_v19 = vld [vmem:[#allocation14_spill] sm:$0xff]  ;;  %v9185_v20 = vld [vmem:[#allocation11_spill] sm:$0xff] }
 0x266   :  { %v3421_v50 = vsel %vm3402_vm10, %v7864_v45, %v3420_v43  ;;  %v1976_v4 = vcombine.high %v9166_v25, %v9166_v25  ;;  %v3484_v33 = vsel %vm88_vm0, %v8933_v58, %v3470_v28  ;;  %v3405_v6 = vsel %vm3404_vm11, %v7852_v11, %v3403_v5  ;;  %v9169_v45 = vld [vmem:[#allocation36_spill] sm:$0xff]  ;;  %v9175_v11 = vld [vmem:[#allocation30_spill] sm:$0xff]  ;;  %v9184_v41 = vld [vmem:[#allocation65_spill] sm:$0xff] }
 0x267   :  { %v3422_v56 = vsel %vm3404_vm11, %v9169_v45, %v3421_v50  ;;  %v3449_v48 = vsel %vm3402_vm10, %v9170_v3, %v3448_v21  ;;  %v5477_v57 = vpack.c.bf16 %v3482_v22, %v3484_v33  ;;  %v3407_v29 = vsel %vm3406_vm12, %v9171_v13, %v3405_v6  ;;  %v9188_v21 = vld [vmem:[#allocation51_spill] sm:$0xff]  ;;  %v9192_v13 = vld [vmem:[#allocation53_spill] sm:$0xff] }
 0x268   :  { %v3423_v51 = vsel %vm3406_vm12, %v9172_v8, %v3422_v56  ;;  %v3450_v26 = vsel %vm3404_vm11, %v9173_v18, %v3449_v48  ;;  %v3409_v36 = vsel %vm3408_vm13, %v9174_v32, %v3407_v29  ;;  %v1977_v10 = vcombine.high %v9176_v63, %v9176_v63  ;;  %v9190_v56 = vld [vmem:[#allocation52_spill] sm:$0xff] }
 0x269   :  { %v3424_v28 = vsel %vm3408_vm13, %v9175_v11, %v3423_v51  ;;  %v3451_v16 = vsel %vm3406_vm12, %v8034_v38, %v3450_v26  ;;  %5478 = vmatprep.mubr.msk.bf16.mxu0 %vm8085_vm3, %v5477_v57  ;;  %v8113_v47 = vsel %vm3410_vm14, %v9177_v42, %v3409_v36  ;;  %v9186_v43 = vcombine.high %v9184_v41, %v9185_v20  ;;  %v9194_v51 = vld [vmem:[#allocation54_spill] sm:$0xff]  ;;  %v5953_v42 = vld [vmem:[%s8797_s3 + $0x100] sm:$0xff]  }
 0x26a   :  { %9178 = vst [vmem:[#allocation42_spill] sm:$0xff] %v8113_v47  ;;  %v8117_v2 = vsel %vm3410_vm14, %v9179_v35, %v3424_v28  ;;  %v3452_v49 = vsel %vm3408_vm13, %v8048_v27, %v3451_v16  ;;  %v3469_v17 = vrot.slane %v8113_v47, 7  ;;  %v9187_v5 = vcombine.high %v9185_v20, %v9185_v20  ;;  %v5957_v28 = vld [vmem:[%s8797_s3 + $0x110] sm:$0xff]  }
 0x26b   :  { %9180 = vst [vmem:[#allocation18_spill] sm:$0xff] %v8117_v2  ;;  %v8125_v39 = vsel %vm3410_vm14, %v8054_v7, %v3452_v49  ;;  %v8930_v22 = vrot.slane %v8117_v2, 7  ;;  %v8136_v23 = vrot.slane %v9186_v43, %v9183_v53  ;;  %v9189_v33 = vrot.slane %v9188_v21, 2  ;;  %v5954_v43 = vld [vmem:[%s8797_s3 + $0x148] sm:$0xff]  }
 0x26c   :  { %v8931_v9 = vrot.slane %v8125_v39, 7  ;;  %v8142_v50 = vrot.slane %v9187_v5, %v9183_v53  ;;  %v9191_v48 = vrot.slane %v9190_v56, 2  ;;  %v9193_v29 = vrot.slane %v9192_v13, 2  ;;  %v9196_v5 = vld [vmem:[#allocation62_spill] sm:$0xff] }
 0x26d   :  { %v2736_v6 = vmax.f32 %v9188_v21, %v9189_v33  ;;  %v3481_v45 = vsel %vm88_vm0, %v3469_v17, %v8930_v22  ;;  %v9195_v26 = vrot.slane %v9194_v51, 2  ;;  %v2791_v21 = vrot.slane %v9196_v5, 2  ;;  %v9197_v33 = vld [vmem:[#allocation64_spill] sm:$0xff]  ;;  %v9200_v22 = vld [vmem:[#allocation50_spill] sm:$0xff] }
 0x26e   :  { %v2750_v57 = vmax.f32 %v9190_v56, %v9191_v48  ;;  %v2764_v8 = vmax.f32 %v9192_v13, %v9193_v29  ;;  %v3483_v36 = vsel %vm88_vm0, %v8931_v9, %v3469_v17  ;;  %v2805_v56 = vrot.slane %v9197_v33, 2  ;;  %v9198_v48 = vld [vmem:[#allocation49_spill] sm:$0xff] }
 0x26f   :  { %v2778_v32 = vmax.f32 %v9194_v51, %v9195_v26  ;;  %v2737_v16 = vrot.slane %v2736_v6, 1  ;;  %v5480_v35 = vpack.c.bf16 %v3481_v45, %v3483_v36  ;;  %v9199_v13 = vcombine.high %v9198_v48, %v9198_v48 }
 0x270   :  { %v2751_v49 = vrot.slane %v2750_v57, 1  ;;  %v2765_v41 = vrot.slane %v2764_v8, 1  ;;  %v2792_v36 = vmax.f32 %v9196_v5, %v2791_v21  ;;  %v9201_v9 = vcombine.high %v9200_v22, %v9200_v22 }
 0x271   :  { %v2779_v20 = vrot.slane %v2778_v32, 1  ;;  %v8174_v17 = vmax.f32 %v2736_v6, %v2737_v16  ;;  %v2816_v29 = vsel %vm2276_vm7, %v9199_v13, -inf  ;;  %5481 = vmatmul.mubr.msk.bf16.vlgmr.msra.gmra.mrb[16].mxu0 %vm8085_vm3, %v5480_v35  ;;  %v2806_v16 = vmax.f32 %v9197_v33, %v2805_v56  ;;  %v9202_v13 = vld [vmem:[#allocation12_spill] sm:$0xff] }
 0x272   :  { %v8184_v45 = vmax.f32 %v2750_v57, %v2751_v49  ;;  %v8186_v51 = vmax.f32 %v2764_v8, %v2765_v41  ;;  %v2817_v6 = vrot.slane %v2816_v29, 4  ;;  %v2830_v48 = vsel %vm2276_vm7, %v9201_v9, -inf  ;;  %5659 = vmatpush3.bf16.msra.mxu0 %v5953_v42  ;;  %v5955_v8 = vld [vmem:[%s8797_s3 + $0x108] sm:$0xff]   ;;  %v5956_v9 = vld [vmem:[%s8797_s3 + $0x150] sm:$0xff]  }
 0x273   :  { %v8188_v26 = vmax.f32 %v2778_v32, %v2779_v20  ;;  %v9203_v24 = vcombine.high %v9202_v13, %v9202_v13  ;;  %v2831_v35 = vrot.slane %v2830_v48, 4  ;;  %v9204_v41 = vld [vmem:[#allocation9_spill] sm:$0xff]  ;;  %5660 = vmatprep.subr.bf16.mxu0 %v5954_v43  ;;  %v2793_v5 = vrot.slane %v2792_v36, 1 }
 0x274   :  { %v2818_v32 = vmax.f32 %v2816_v29, %v2817_v6  ;;  %v9205_v20 = vcombine.high %v9204_v41, %v9204_v41  ;;  %v2807_v21 = vrot.slane %v2806_v16, 1  ;;  %v2872_v33 = vsel %vm2276_vm7, %v1976_v4, -inf  ;;  %v5958_v4 = vld [vmem:[%s8797_s3 + $0x158] sm:$0xff]  }
 0x275   :  { %v2844_v57 = vsel %vm2276_vm7, %v9203_v24, -inf  ;;  %v2832_v29 = vmax.f32 %v2830_v48, %v2831_v35  ;;  %v2873_v24 = vrot.slane %v2872_v33, 4  ;;  %v2794_v15 = vmax.f32 %v2792_v36, %v2793_v5 }
 0x276   :  { %v2845_v49 = vrot.slane %v2844_v57, 4  ;;  %v2858_v22 = vsel %vm2276_vm7, %v9205_v20, -inf  ;;  %v2819_v56 = vrot.slane %v2818_v32, 2  ;;  %v2808_v58 = vmax.f32 %v2806_v16, %v2807_v21  ;;  %5661 = vmatpush3.bf16.msra.mxu0 %v5955_v8 }
 0x277   :  { %v2859_v42 = vrot.slane %v2858_v22, 4  ;;  %v2886_v43 = vsel %vm2276_vm7, %v1977_v10, -inf  ;;  %v2833_v54 = vrot.slane %v2832_v29, 2  ;;  %v2874_v53 = vmax.f32 %v2872_v33, %v2873_v24  ;;  %5662 = vmatprep.subr.bf16.mxu0 %v5956_v9  ;;  %v5959_v33 = vld [vmem:[%s8797_s3 + $0x118] sm:$0xff]  }
 0x278   :  { %v2846_v6 = vmax.f32 %v2844_v57, %v2845_v49  ;;  %v2820_v11 = vmax.f32 %v2818_v32, %v2819_v56  ;;  %v2887_v36 = vrot.slane %v2886_v43, 4  ;;  %v9206_v16 = vcombine.high %v9181_v19, %v9181_v19 }
 0x279   :  { %v2860_v20 = vmax.f32 %v2858_v22, %v2859_v42  ;;  %v9207_v57 = vcombine.high %v9182_v61, %v9182_v61  ;;  %v2834_v35 = vmax.f32 %v2832_v29, %v2833_v54  ;;  %v2875_v22 = vrot.slane %v2874_v53, 2  ;;  %v5960_v54 = vld [vmem:[%s8797_s3 + $0x160] sm:$0xff]  }
 0x27a   :  { %v2847_v30 = vrot.slane %v2846_v6, 2  ;;  %v2900_v10 = vsel %vm2276_vm7, %v9206_v16, -inf  ;;  %v2821_v32 = vrot.slane %v2820_v11, 1  ;;  %v2888_v5 = vmax.f32 %v2886_v43, %v2887_v36  ;;  %5663 = vmatpush3.bf16.msra.mxu0 %v5957_v28 }
 0x27b   :  { %v2861_v48 = vrot.slane %v2860_v20, 2  ;;  %v2914_v8 = vsel %vm2276_vm7, %v9207_v57, -inf  ;;  %v2901_v21 = vrot.slane %v2900_v10, 4  ;;  %v2835_v24 = vrot.slane %v2834_v35, 1  ;;  %5664 = vmatprep.subr.bf16.mxu0 %v5958_v4 }
 0x27c   :  { %v2848_v49 = vmax.f32 %v2846_v6, %v2847_v30  ;;  %v2915_v42 = vrot.slane %v2914_v8, 4  ;;  %v2822_v56 = vmax.f32 %v2820_v11, %v2821_v32  ;;  %v2876_v47 = vmax.f32 %v2874_v53, %v2875_v22  ;;  %v5961_v22 = vld [vmem:[%s8797_s3 + $0x120] sm:$0xff]  }
 0x27d   :  { %v2862_v9 = vmax.f32 %v2860_v20, %v2861_v48  ;;  %v2889_v29 = vrot.slane %v2888_v5, 2  ;;  %v2902_v6 = vmax.f32 %v2900_v10, %v2901_v21  ;;  %v2836_v43 = vmax.f32 %v2834_v35, %v2835_v24 }
 0x27e   :  { %v2849_v16 = vrot.slane %v2848_v49, 1  ;;  %v2916_v20 = vmax.f32 %v2914_v8, %v2915_v42  ;;  %v2877_v28 = vrot.slane %v2876_v47, 1  ;;  %v9208_v36 = vcombine.high %v8136_v23, %v8136_v23  ;;  %5665 = vmatpush3.bf16.msra.mxu0 %v5959_v33 }
 0x27f   :  { %v2863_v30 = vrot.slane %v2862_v9, 1  ;;  %v2890_v32 = vmax.f32 %v2888_v5, %v2889_v29  ;;  %v2903_v53 = vrot.slane %v2902_v6, 2  ;;  %v9209_v8 = vcombine.high %v8142_v50, %v8142_v50  ;;  %5666 = vmatprep.subr.bf16.mxu0 %v5960_v54 }
 0x280   :  { %v2850_v48 = vmax.f32 %v2848_v49, %v2849_v16  ;;  %v2928_v11 = vsel %vm2276_vm7, %v9208_v36, -inf  ;;  %v2917_v4 = vrot.slane %v2916_v20, 2  ;;  %v2878_v2 = vmax.f32 %v2876_v47, %v2877_v28 }
 0x281   :  { %v2864_v57 = vmax.f32 %v2862_v9, %v2863_v30  ;;  %v2929_v10 = vrot.slane %v2928_v11, 4  ;;  %v2942_v35 = vsel %vm2276_vm7, %v9209_v8, -inf  ;;  %v8248_v49 = vmax.f32 %v8174_v17, %v8184_v45  ;;  %v5962_v9 = vld [vmem:[%s8797_s3 + $0x168] sm:$0xff]  }
 0x282   :  { %v2891_v5 = vrot.slane %v2890_v32, 1  ;;  %v2904_v21 = vmax.f32 %v2902_v6, %v2903_v53  ;;  %v2918_v42 = vmax.f32 %v2916_v20, %v2917_v4  ;;  %v2943_v33 = vrot.slane %v2942_v35, 4  ;;  %5667 = vmatpush3.bf16.msra.mxu0 %v5961_v22  ;;  %v5963_v6 = vld [vmem:[%s8797_s3 + $0x128] sm:$0xff]  }
 0x283   :  { %v2930_v47 = vmax.f32 %v2928_v11, %v2929_v10  ;;  %v8255_v24 = vmax.f32 %v8186_v51, %v8188_v26  ;;  %v8257_v16 = vmax.f32 %v2794_v15, %v2808_v58  ;;  %v8259_v30 = vmax.f32 %v2822_v56, %v2836_v43  ;;  %5668 = vmatprep.subr.bf16.mxu0 %v5962_v9  ;;  %v5964_v58 = vld [vmem:[%s8797_s3 + $0x170] sm:$0xff]  }
 0x284   :  { %v2892_v17 = vmax.f32 %v2890_v32, %v2891_v5  ;;  %v2905_v45 = vrot.slane %v2904_v21, 1  ;;  %v2919_v54 = vrot.slane %v2918_v42, 1  ;;  %v2944_v29 = vmax.f32 %v2942_v35, %v2943_v33  ;;  %v5965_v10 = vld [vmem:[%s8797_s3 + $0x130] sm:$0xff]  }
 0x285   :  { %v2931_v20 = vrot.slane %v2930_v47, 2  ;;  %v8264_v28 = vmax.f32 %v2850_v48, %v2864_v57  ;;  %v3270_v51 = vpack.c.bf16 %v8248_v49, %v8248_v49  ;;  %v3272_v15 = vpack.c.bf16 %v8255_v24, %v8255_v24 }
 0x286   :  { %v2906_v26 = vmax.f32 %v2904_v21, %v2905_v45  ;;  %v2920_v56 = vmax.f32 %v2918_v42, %v2919_v54  ;;  %v2945_v43 = vrot.slane %v2944_v29, 2  ;;  %v8273_v36 = vmax.f32 %v2878_v2, %v2892_v17  ;;  %5669 = vmatpush3.bf16.msra.mxu0 %v5963_v6 }
 0x287   :  { %v2932_v11 = vmax.f32 %v2930_v47, %v2931_v20  ;;  %v3274_v48 = vpack.c.bf16 %v8257_v16, %v8257_v16  ;;  %v3276_v57 = vpack.c.bf16 %v8259_v30, %v8259_v30  ;;  %v3278_v32 = vpack.c.bf16 %v8264_v28, %v8264_v28  ;;  %5670 = vmatprep.subr.bf16.mxu0 %v5964_v58 }
 0x288   :  { %v2946_v53 = vmax.f32 %v2944_v29, %v2945_v43  ;;  %v8281_v4 = vmax.f32 %v2906_v26, %v2920_v56  ;;  %v3280_v22 = vpack.c.bf16 %v8273_v36, %v8273_v36  ;;  %v3286_v2 = vpack.c.bf16 %v7960_v52, %v7960_v52  ;;  %v5966_v52 = vld [vmem:[%s8797_s3 + $0x178] sm:$0xff]  }
 0x289   :  { %v2933_v8 = vrot.slane %v2932_v11, 1  ;;  %v3288_v35 = vpack.c.bf16 %v7964_v34, %v7964_v34  ;;  %v3290_v9 = vpack.c.bf16 %v7966_v0, %v7966_v0  ;;  %v3292_v5 = vpack.c.bf16 %v7968_v62, %v7968_v62 }
 0x28a   :  { %v2947_v21 = vrot.slane %v2946_v53, 1  ;;  %v3282_v42 = vpack.c.bf16 %v8281_v4, %v8281_v4  ;;  %v3294_v33 = vpack.c.bf16 %v7970_v60, %v7970_v60  ;;  %v3296_v34 = vpack.c.bf16 %v7978_v44, %v7978_v44  ;;  %5671 = vmatpush3.bf16.msra.mxu0 %v5965_v10  ;;  %v5967_v60 = vld [vmem:[%s8797_s3 + $0x138] sm:$0xff]  }
 0x28b   :  { %v2934_v47 = vmax.f32 %v2932_v11, %v2933_v8  ;;  %v3298_v0 = vpack.c.bf16 %v8001_v14, %v8001_v14  ;;  %v3300_v62 = vpack.c.bf16 %v8011_v37, %v8011_v37  ;;  %v3831_v17 = vunpack.c.l.b16 %v3270_v51  ;;  %5672 = vmatprep.subr.bf16.mxu0 %v5966_v52 }
 0x28c   :  { %v2948_v45 = vmax.f32 %v2946_v53, %v2947_v21  ;;  %v3833_v54 = vunpack.c.l.b16 %v3272_v15  ;;  %v3835_v29 = vunpack.c.l.b16 %v3274_v48  ;;  %v3837_v6 = vunpack.c.l.b16 %v3276_v57 }
 0x28d   :  { %v3839_v20 = vunpack.c.l.b16 %v3278_v32  ;;  %v3841_v58 = vunpack.c.l.b16 %v3280_v22  ;;  %v3843_v44 = vunpack.c.l.b16 %v3282_v42  ;;  %v3847_v26 = vunpack.c.l.b16 %v3286_v2 }
 0x28e   :  { %v3220_v56 = vmax.f32 %v2934_v47, %v2948_v45  ;;  %v3849_v14 = vunpack.c.l.b16 %v3288_v35  ;;  %v3851_v43 = vunpack.c.l.b16 %v3290_v9  ;;  %v3853_v11 = vunpack.c.l.b16 %v3292_v5  ;;  %5673 = vmatpush3.bf16.msra.mxu0 %v5967_v60  ;;  %v9210_v35 = vld [vmem:[#allocation55_spill] sm:$0xff]  ;;  %v9213_v60 = vld [vmem:[#allocation56_spill] sm:$0xff] }
 0x28f   :  { %v3855_v37 = vunpack.c.l.b16 %v3294_v33  ;;  %v3857_v51 = vunpack.c.l.b16 %v3296_v34  ;;  %v3859_v53 = vunpack.c.l.b16 %v3298_v0  ;;  %v3861_v15 = vunpack.c.l.b16 %v3300_v62 }
 0x290   :  { %v3284_v48 = vpack.c.bf16 %v3220_v56, %v3220_v56  ;;  %v3897_v57 = vsel %vm3398_vm8, %v3833_v54, %v3831_v17  ;;  %v3911_v10 = vsel %vm3398_vm8, %v3849_v14, %v3847_v26  ;;  %v45_v8 = vadd.s32 16, %v9152_v12  ;;  %v9214_v26 = vld [vmem:[#allocation57_spill] sm:$0xff] }
 0x291   :  { %v3898_v32 = vsel %vm3400_vm9, %v3835_v29, %v3897_v57  ;;  %v3912_v22 = vsel %vm3400_vm9, %v3851_v43, %v3911_v10  ;;  %v3440_v2 = vsel %vm3398_vm8, %v8255_v24, %v8248_v49  ;;  %v2730_v9 = vrot.slane %v9210_v35, 1 }
 0x292   :  { %v3845_v5 = vunpack.c.l.b16 %v3284_v48  ;;  %v3899_v52 = vsel %vm3402_vm10, %v3837_v6, %v3898_v32  ;;  %v3913_v21 = vsel %vm3402_vm10, %v3853_v11, %v3912_v22  ;;  %v3441_v42 = vsel %vm3400_vm9, %v8257_v16, %v3440_v2  ;;  %v9222_v2 = vld [vmem:[#allocation61_spill] sm:$0xff] }
 0x293   :  { %v3900_v33 = vsel %vm3404_vm11, %v3839_v20, %v3899_v52  ;;  %v3914_v34 = vsel %vm3404_vm11, %v3855_v37, %v3913_v21  ;;  %v3442_v47 = vsel %vm3402_vm10, %v8259_v30, %v3441_v42  ;;  %v3503_v0 = vand.u32 15, %v45_v8  ;;  %v9220_v8 = vld [vmem:[#allocation60_spill] sm:$0xff] }
 0x294   :  { %v3901_v49 = vsel %vm3406_vm12, %v3841_v58, %v3900_v33  ;;  %v3915_v24 = vsel %vm3406_vm12, %v3857_v51, %v3914_v34  ;;  %v3443_v62 = vsel %vm3404_vm11, %v8264_v28, %v3442_v47  ;;  %v8334_v17 = vmax.f32 %v9210_v35, %v2730_v9  ;;  %v9216_v51 = vld [vmem:[#allocation59_spill] sm:$0xff] }
 0x295   :  { %v3902_v16 = vsel %vm3408_vm13, %v3843_v44, %v3901_v49  ;;  %v3916_v45 = vsel %vm3408_vm13, %v3859_v53, %v3915_v24  ;;  %v3444_v54 = vsel %vm3406_vm12, %v8273_v36, %v3443_v62  ;;  %vm8340_vm4 = vcmp.ne.s32.totalorder %v3503_v0, 0  ;;  %v9215_v36 = vld [vmem:[#allocation58_spill] sm:$0xff] }
 0x296   :  { %v3903_v29 = vsel %vm3410_vm14, %v3845_v5, %v3902_v16  ;;  %v3917_v6 = vsel %vm3410_vm14, %v3861_v15, %v3916_v45  ;;  %v3445_v28 = vsel %vm3408_vm13, %v8281_v4, %v3444_v54  ;;  %v2744_v20 = vrot.slane %v9213_v60, 1  ;;  %v9218_v4 = vld [vmem:[#allocation63_spill] sm:$0xff]  ;;  %vm8387_vm5 = vmpackc.low %vm6103_vm1, %vm8340_vm4 }
 0x297   :  { %v3921_v58 = vpack.c.b16 %v3917_v6, %v3903_v29  ;;  %v8350_v44 = vsel %vm3410_vm14, %v3220_v56, %v3445_v28  ;;  %v2758_v14 = vrot.slane %v9214_v26, 1  ;;  %v2772_v43 = vrot.slane %v9215_v36, 1 }
 0x298   :  { %v3474_v11 = vrot.slane %v8350_v44, 7  ;;  %v8356_v37 = vmax.f32 %v9213_v60, %v2744_v20  ;;  %v9217_v53 = vrot.slane %v9216_v51, 2  ;;  %v9219_v48 = vrot.slane %v9218_v4, 2 }
 0x299   :  { %4062 = vmatprep.mubr.bf16.mxu1 %v3921_v58  ;;  %v8365_v56 = vmax.f32 %v9214_v26, %v2758_v14  ;;  %v8368_v10 = vmax.f32 %v9215_v36, %v2772_v43  ;;  %v9221_v32 = vrot.slane %v9220_v8, 4  ;;  %v9223_v35 = vrot.slane %v9222_v2, 4 }
 0x29a   :  { %v2785_v15 = vmax.f32 %v9216_v51, %v9217_v53  ;;  %v2799_v57 = vmax.f32 %v9218_v4, %v9219_v48  ;;  %v9224_v5 = vrot.slane %v8052_v40, 7  ;;  %v9225_v21 = vrot.slane %v8015_v59, 7 }
 0x29b   :  { %v2811_v22 = vmax.f32 %v9220_v8, %v9221_v32  ;;  %v2825_v9 = vmax.f32 %v9222_v2, %v9223_v35  ;;  %v2837_v62 = vsel %vm2276_vm7, %v9202_v13, -inf  ;;  %v2851_v29 = vsel %vm2276_vm7, %v9204_v41, -inf }
 0x29c   :  { %v3478_v52 = vsel %vm88_vm0, %v3474_v11, %v9224_v5  ;;  %v3480_v42 = vsel %vm88_vm0, %v9225_v21, %v3474_v11  ;;  %v2786_v34 = vrot.slane %v2785_v15, 1  ;;  %v2800_v47 = vrot.slane %v2799_v57, 1 }
 0x29d   :  { %v5483_v0 = vpack.c.bf16 %v3478_v52, %v3480_v42  ;;  %v2812_v49 = vrot.slane %v2811_v22, 2  ;;  %v2826_v24 = vrot.slane %v2825_v9, 2  ;;  %v2838_v54 = vrot.slane %v2837_v62, 4 }
 0x29e   :  { %v2787_v16 = vmax.f32 %v2785_v15, %v2786_v34  ;;  %v2801_v45 = vmax.f32 %v2799_v57, %v2800_v47  ;;  %v2852_v28 = vrot.slane %v2851_v29, 4  ;;  %v2865_v60 = vsel %vm2276_vm7, %v9166_v25, -inf }
 0x29f   :  { %5484 = vmatprep.mubr.msk.bf16.mxu0 %vm8387_vm5, %v5483_v0  ;;  %v2813_v30 = vmax.f32 %v2811_v22, %v2812_v49  ;;  %v2827_v6 = vmax.f32 %v2825_v9, %v2826_v24  ;;  %v2839_v20 = vmax.f32 %v2837_v62, %v2838_v54  ;;  %v2866_v58 = vrot.slane %v2865_v60, 4 }
 0x2a0   :  { %v2879_v13 = vsel %vm2276_vm7, %v9176_v63, -inf  ;;  %v2893_v26 = vsel %vm2276_vm7, %v9181_v19, -inf  ;;  %v2853_v41 = vmax.f32 %v2851_v29, %v2852_v28  ;;  %v2907_v15 = vsel %vm2276_vm7, %v9182_v61, -inf }
 0x2a1   :  { %v2814_v14 = vrot.slane %v2813_v30, 1  ;;  %v2828_v36 = vrot.slane %v2827_v6, 1  ;;  %v2880_v43 = vrot.slane %v2879_v13, 4  ;;  %v2840_v11 = vrot.slane %v2839_v20, 2 }
 0x2a2   :  { %v2867_v51 = vmax.f32 %v2865_v60, %v2866_v58  ;;  %v2894_v53 = vrot.slane %v2893_v26, 4  ;;  %v2854_v48 = vrot.slane %v2853_v41, 2  ;;  %v2908_v22 = vrot.slane %v2907_v15, 4 }
 0x2a3   :  { %v2815_v4 = vmax.f32 %v2813_v30, %v2814_v14  ;;  %v2829_v25 = vmax.f32 %v2827_v6, %v2828_v36  ;;  %v2881_v57 = vmax.f32 %v2879_v13, %v2880_v43  ;;  %v2841_v8 = vmax.f32 %v2839_v20, %v2840_v11 }
 0x2a4   :  { %v2868_v32 = vrot.slane %v2867_v51, 2  ;;  %v2895_v63 = vmax.f32 %v2893_v26, %v2894_v53  ;;  %v2855_v2 = vmax.f32 %v2853_v41, %v2854_v48  ;;  %v2921_v35 = vsel %vm2276_vm7, %v8136_v23, -inf }
 0x2a5   :  { %v2882_v19 = vrot.slane %v2881_v57, 2  ;;  %v2935_v9 = vsel %vm2276_vm7, %v8142_v50, -inf  ;;  %v2842_v5 = vrot.slane %v2841_v8, 1  ;;  %v2909_v61 = vmax.f32 %v2907_v15, %v2908_v22 }
 0x2a6   :  { %v2869_v52 = vmax.f32 %v2867_v51, %v2868_v32  ;;  %v2896_v21 = vrot.slane %v2895_v63, 2  ;;  %v2856_v42 = vrot.slane %v2855_v2, 1  ;;  %v2922_v47 = vrot.slane %v2921_v35, 4 }
 0x2a7   :  { %v2883_v34 = vmax.f32 %v2881_v57, %v2882_v19  ;;  %v2936_v0 = vrot.slane %v2935_v9, 4  ;;  %v2843_v49 = vmax.f32 %v2841_v8, %v2842_v5  ;;  %v2910_v54 = vrot.slane %v2909_v61, 2 }
 0x2a8   :  { %v2870_v24 = vrot.slane %v2869_v52, 1  ;;  %v2897_v62 = vmax.f32 %v2895_v63, %v2896_v21  ;;  %v2857_v29 = vmax.f32 %v2855_v2, %v2856_v42  ;;  %v2923_v6 = vmax.f32 %v2921_v35, %v2922_v47 }
 0x2a9   :  { %v2884_v30 = vrot.slane %v2883_v34, 1  ;;  %v2937_v28 = vmax.f32 %v2935_v9, %v2936_v0  ;;  %v2911_v20 = vmax.f32 %v2909_v61, %v2910_v54  ;;  %v3205_v50 = vmax.f32 %v8334_v17, %v8356_v37 }
 0x2aa   :  { %v2871_v23 = vmax.f32 %v2869_v52, %v2870_v24  ;;  %v2898_v60 = vrot.slane %v2897_v62, 1  ;;  %v2924_v13 = vrot.slane %v2923_v6, 2  ;;  %v3207_v14 = vmax.f32 %v8365_v56, %v8368_v10 }
 0x2ab   :  { %v2885_v58 = vmax.f32 %v2883_v34, %v2884_v30  ;;  %v2938_v26 = vrot.slane %v2937_v28, 2  ;;  %v2912_v41 = vrot.slane %v2911_v20, 1  ;;  %v3209_v43 = vmax.f32 %v2787_v16, %v2801_v45 }
 0x2ac   :  { %v2899_v36 = vmax.f32 %v2897_v62, %v2898_v60  ;;  %v3211_v11 = vmax.f32 %v2815_v4, %v2829_v25  ;;  %v2925_v51 = vmax.f32 %v2923_v6, %v2924_v13  ;;  %v3213_v15 = vmax.f32 %v2843_v49, %v2857_v29 }
 0x2ad   :  { %v2939_v53 = vmax.f32 %v2937_v28, %v2938_v26  ;;  %v3215_v48 = vmax.f32 %v2871_v23, %v2885_v58  ;;  %v2913_v57 = vmax.f32 %v2911_v20, %v2912_v41  ;;  %v3269_v8 = vpack.c.bf16 %v3205_v50, %v3205_v50 }
 0x2ae   :  { %v2926_v32 = vrot.slane %v2925_v51, 1  ;;  %v3271_v22 = vpack.c.bf16 %v3207_v14, %v3207_v14  ;;  %v3273_v17 = vpack.c.bf16 %v3209_v43, %v3209_v43  ;;  %v3275_v2 = vpack.c.bf16 %v3211_v11, %v3211_v11 }
 0x2af   :  { %v2940_v63 = vrot.slane %v2939_v53, 1  ;;  %v3217_v37 = vmax.f32 %v2899_v36, %v2913_v57  ;;  %v3277_v19 = vpack.c.bf16 %v3213_v15, %v3213_v15  ;;  %v3279_v35 = vpack.c.bf16 %v3215_v48, %v3215_v48 }
 0x2b0   :  { %v2927_v9 = vmax.f32 %v2925_v51, %v2926_v32  ;;  %v3285_v10 = vpack.c.bf16 %v9163_v46, %v9163_v46  ;;  %v3287_v16 = vpack.c.bf16 %v9164_v31, %v9164_v31  ;;  %v3289_v4 = vpack.c.bf16 %v9165_v1, %v9165_v1 }
 0x2b1   :  { %v2941_v56 = vmax.f32 %v2939_v53, %v2940_v63  ;;  %v3281_v45 = vpack.c.bf16 %v3217_v37, %v3217_v37  ;;  %v3291_v25 = vpack.c.bf16 %v9170_v3, %v9170_v3  ;;  %v3293_v5 = vpack.c.bf16 %v9173_v18, %v9173_v18 }
 0x2b2   :  { %v3295_v21 = vpack.c.bf16 %v8034_v38, %v8034_v38  ;;  %v3830_v61 = vunpack.c.l.b16 %v3269_v8  ;;  %v3832_v42 = vunpack.c.l.b16 %v3271_v22  ;;  %v3297_v46 = vpack.c.bf16 %v8048_v27, %v8048_v27 }
 0x2b3   :  { %v3219_v52 = vmax.f32 %v2927_v9, %v2941_v56  ;;  %v3299_v31 = vpack.c.bf16 %v8054_v7, %v8054_v7  ;;  %v3834_v34 = vunpack.c.l.b16 %v3273_v17  ;;  %v3836_v1 = vunpack.c.l.b16 %v3275_v2 }
 0x2b4   :  { %v3838_v0 = vunpack.c.l.b16 %v3277_v19  ;;  %v3846_v3 = vunpack.c.l.b16 %v3285_v10  ;;  %v3848_v49 = vunpack.c.l.b16 %v3287_v16  ;;  %v3840_v24 = vunpack.c.l.b16 %v3279_v35  ;;  %v9229_v10 = vld [vmem:[#allocation18_spill] sm:$0xff] }
 0x2b5   :  { %v3283_v47 = vpack.c.bf16 %v3219_v52, %v3219_v52  ;;  %v3842_v18 = vunpack.c.l.b16 %v3281_v45  ;;  %v3850_v62 = vunpack.c.l.b16 %v3289_v4  ;;  %v3852_v54 = vunpack.c.l.b16 %v3291_v25 }
 0x2b6   :  { %v3854_v38 = vunpack.c.l.b16 %v3293_v5  ;;  %v3856_v30 = vunpack.c.l.b16 %v3295_v21  ;;  %v3890_v6 = vsel %vm3398_vm8, %v3832_v42, %v3830_v61  ;;  %v3904_v28 = vsel %vm3398_vm8, %v3848_v49, %v3846_v3 }
 0x2b7   :  { %v3844_v29 = vunpack.c.l.b16 %v3283_v47  ;;  %v3891_v27 = vsel %vm3400_vm9, %v3834_v34, %v3890_v6  ;;  %v3433_v7 = vsel %vm3398_vm8, %v3207_v14, %v3205_v50  ;;  %v44_v23 = vadd.s32 8, %v9152_v12 }
 0x2b8   :  { %v3858_v60 = vunpack.c.l.b16 %v3297_v46  ;;  %v3892_v20 = vsel %vm3402_vm10, %v3836_v1, %v3891_v27  ;;  %v3905_v58 = vsel %vm3400_vm9, %v3850_v62, %v3904_v28  ;;  %v3434_v13 = vsel %vm3400_vm9, %v3209_v43, %v3433_v7  ;;  %v9234_v46 = vld [vmem:[#allocation42_spill] sm:$0xff] }
 0x2b9   :  { %v3860_v26 = vunpack.c.l.b16 %v3299_v31  ;;  %v3893_v36 = vsel %vm3404_vm11, %v3838_v0, %v3892_v20  ;;  %v3906_v41 = vsel %vm3402_vm10, %v3852_v54, %v3905_v58  ;;  %v3435_v51 = vsel %vm3402_vm10, %v3211_v11, %v3434_v13 }
 0x2ba   :  { %v3894_v53 = vsel %vm3406_vm12, %v3840_v24, %v3893_v36  ;;  %v3907_v50 = vsel %vm3404_vm11, %v3854_v38, %v3906_v41  ;;  %v3436_v14 = vsel %vm3404_vm11, %v3213_v15, %v3435_v51  ;;  %v3496_v57 = vand.u32 15, %v44_v23 }
 0x2bb   :  { %v3895_v8 = vsel %vm3408_vm13, %v3842_v18, %v3894_v53  ;;  %v3908_v32 = vsel %vm3406_vm12, %v3856_v30, %v3907_v50  ;;  %v3437_v43 = vsel %vm3406_vm12, %v3215_v48, %v3436_v14  ;;  %v4076_v63 = vrot.slane %v8350_v44, 1 }
 0x2bc   :  { %v3896_v22 = vsel %vm3410_vm14, %v3844_v29, %v3895_v8  ;;  %v3909_v17 = vsel %vm3408_vm13, %v3858_v60, %v3908_v32  ;;  %v3438_v11 = vsel %vm3408_vm13, %v3217_v37, %v3437_v43  ;;  %v4074_v15 = vrot.slane %v8015_v59, 1 }
 0x2bd   :  { %v3910_v2 = vsel %vm3410_vm14, %v3860_v26, %v3909_v17  ;;  %v3439_v19 = vsel %vm3410_vm14, %v3219_v52, %v3438_v11  ;;  %vm4088_vm6 = vcmp.ne.s32.totalorder %v3496_v57, 15  ;;  %v4072_v56 = vrot.slane %v8005_v55, 1  ;;  %v9233_v52 = vld [vmem:[#allocation7_spill] sm:$0xff] }
 0x2be   :  { %v3920_v35 = vpack.c.b16 %v3910_v2, %v3896_v22  ;;  %v3473_v9 = vrot.slane %v3439_v19, 7  ;;  %v4082_v44 = vsel %vm818_vm2, %v4074_v15, %v4076_v63  ;;  %v9228_v48 = vrot.slane %v8125_v39, 7  ;;  %vm8467_vm9 = vmpackc.low %vm4088_vm6, %vm6103_vm1 }
 0x2bf   :  { %v9230_v16 = vrot.slane %v9229_v10, 7  ;;  %v4084_v4 = vsel %vm818_vm2, %v4072_v56, %v4074_v15  ;;  %v4075_v25 = vrot.slane %v3439_v19, 1  ;;  %v3510_v21 = vand.u32 15, %v9233_v52  ;;  %v5564_v19 = vld [vmem:[%s8798_s4] ss:$0 sm:$0xff]  ;;  %s6104_s4 = smov 64  }
 0x2c0   :  { %4063 = vmatmul.mubr.bf16.gmra.mrb[20].mxu1 %v3920_v35  ;;  %v3477_v37 = vsel %vm88_vm0, %v3473_v9, %v9228_v48  ;;  %v5553_v5 = vpack.c.bf16 %v4082_v44, %v4084_v4  ;;  %v4078_v61 = vrot.slane %v8052_v40, 1  ;;  %v4073_v42 = vrot.slane %v9229_v10, 1 }
 0x2c1   :  { %v3479_v45 = vsel %vm88_vm0, %v9230_v16, %v3473_v9  ;;  %v4071_v31 = vrot.slane %v9234_v46, 1  ;;  %vm4090_vm0 = vcmp.ne.s32.totalorder %v3510_v21, 15  ;;  %v4077_v3 = vrot.slane %v8125_v39, 1 }
 0x2c2   :  { %v5486_v59 = vpack.c.bf16 %v3477_v37, %v3479_v45  ;;  %v4081_v34 = vsel %vm818_vm2, %v4073_v42, %v4075_v25  ;;  %v4080_v1 = vsel %vm818_vm2, %v4076_v63, %v4078_v61  ;;  %v4086_v33 = vsel %vm818_vm2, %v4078_v61, %v4072_v56  ;;  %vm5558_vm11 = vmpackc.low %vm4090_vm0, %vm6103_vm1  ;;  %v9235_v61 = vld [vmem:[#allocation8_spill] sm:$0xff] }
 0x2c3   :  { %v4083_v40 = vsel %vm818_vm2, %v4071_v31, %v4073_v42  ;;  %v5559_v0 = vpack.c.bf16 %v4086_v33, %v4080_v1  ;;  %v4079_v49 = vsel %vm818_vm2, %v4075_v25, %v4077_v3  ;;  %v4085_v24 = vsel %vm818_vm2, %v4077_v3, %v4071_v31 }
 0x2c4   :  { %5487 = vmatmul.mubr.msk.bf16.gmra.mrb[20].mxu0 %vm8387_vm5, %v5486_v59  ;;  %v5556_v47 = vpack.c.bf16 %v4081_v34, %v4083_v40  ;;  %v5562_v18 = vpack.c.bf16 %v4085_v24, %v4079_v49  ;;  %vm4612_vm2 = vcmask 517120  }
 0x2c5   :  { %5554 = vmatprep.mubr.msk.bf16.mxu0 %vm8467_vm9, %v5553_v5 }
 0x2cc   :  { %5557 = vmatmul.mubr.msk.bf16.vlgmr.msra.gmra.mrb[24].mxu0 %vm8467_vm9, %v5556_v47 }
 0x2cd   :  { %5560 = vmatprep.mubr.msk.bf16.mxu0 %vm5558_vm11, %v5559_v0 }
 0x2d4   :  { %5563 = vmatmul.mubr.msk.bf16.gmra.mrb[28].mxu0 %vm5558_vm11, %v5562_v18 }
 0x323   :  { %v5646_v62 = vpop.f32.mrb[16].mxu1 }
 0x324   :  { %v5647_v54 = vpop.f32.mrb[17].mxu1 }
 0x325   :  { %v5648_v29 = vadd.f32 %v5647_v54, %v5646_v62  ;;  %v5649_v38 = vpop.f32.mrb[18].mxu1 }
 0x326   :  { %v5650_v30 = vpop.f32.mrb[19].mxu1 }
 0x327   :  { %v5651_v6 = vadd.f32 %v5650_v30, %v5649_v38 }
 0x344   :  { %v5618_v27 = vpop.f32.mrb[16].mxu0 }
 0x345   :  { %v5619_v39 = vpop.f32.mrb[17].mxu0 }
 0x346   :  { %v5620_v28 = vadd.f32 %v5619_v39, %v5618_v27  ;;  %v5621_v7 = vpop.f32.mrb[18].mxu0 }
 0x347   :  { %v5622_v23 = vpop.f32.mrb[19].mxu0 }
 0x348   :  { %v4057_v60 = vadd.f32 %v5648_v29, %v5620_v28  ;;  %v5623_v20 = vadd.f32 %v5622_v23, %v5621_v7 }
 0x34a   :  { %v4060_v58 = vadd.f32 %v5651_v6, %v5623_v20 }
 0x393   :  { %v5652_v13 = vpop.f32.mrb[20].mxu1 }
 0x394   :  { %v5653_v26 = vpop.f32.mrb[21].mxu1 }
 0x395   :  { %v5654_v12 = vadd.f32 %v5653_v26, %v5652_v13  ;;  %v5655_v36 = vpop.f32.mrb[22].mxu1 }
 0x396   :  { %v5656_v41 = vpop.f32.mrb[23].mxu1 }
 0x397   :  { %v5624_v51 = vpop.f32.mrb[20].mxu0  ;;  %v5657_v53 = vadd.f32 %v5656_v41, %v5655_v36 }
 0x398   :  { %v5625_v50 = vpop.f32.mrb[21].mxu0 }
 0x399   :  { %v5626_v14 = vadd.f32 %v5625_v50, %v5624_v51  ;;  %v5627_v57 = vpop.f32.mrb[22].mxu0 }
 0x39a   :  { %v5628_v8 = vpop.f32.mrb[23].mxu0 }
 0x39b   :  { %v4065_v32 = vadd.f32 %v5654_v12, %v5626_v14  ;;  %v5629_v43 = vadd.f32 %v5628_v8, %v5627_v57 }
 0x39d   :  { %v4068_v63 = vadd.f32 %v5657_v53, %v5629_v43 }
 0x39f   :  { %v5674_v22 = vpop.f32.mrb[24].mxu0 }
 0x3a0   :  { %v5675_v17 = vpop.f32.mrb[25].mxu0 }
 0x3a1   :  { %v5676_v11 = vadd.f32 %v5675_v17, %v5674_v22  ;;  %v5677_v2 = vpop.f32.mrb[26].mxu0 }
 0x3a2   :  { %v5678_v15 = vpop.f32.mrb[27].mxu0 }
 0x3a3   :  { %v4289_v35 = vadd.f32 %v5676_v11, %v4057_v60  ;;  %v5679_v9 = vadd.f32 %v5678_v15, %v5677_v2 }
 0x3a5   :  { %v4300_v56 = vadd.f32 %v5564_v19, %v4289_v35  ;;  %v4290_v44 = vadd.f32 %v5679_v9, %v4060_v58 }
 0x3a7   :  { %6067 = vtanh.f32 %v4300_v56  ;;  %v4301_v48 = vadd.f32 %v5564_v19, %v4290_v44  ;;  %v5680_v37 = vpop.f32.mrb[28].mxu0 }
 0x3a8   :  { %v5681_v10 = vpop.f32.mrb[29].mxu0 }
 0x3a9   :  { %6069 = vtanh.f32 %v4301_v48  ;;  %v5682_v16 = vadd.f32 %v5681_v10, %v5680_v37  ;;  %v5683_v45 = vpop.f32.mrb[30].mxu0 }
 0x3aa   :  { %v5684_v59 = vpop.f32.mrb[31].mxu0 }
 0x3ab   :  { %v4291_v4 = vadd.f32 %v5682_v16, %v4065_v32  ;;  %v5685_v55 = vadd.f32 %v5684_v59, %v5683_v45 }
 0x3ad   :  { %v4302_v25 = vadd.f32 %v5564_v19, %v4291_v4  ;;  %v4292_v5 = vadd.f32 %v5685_v55, %v4068_v63 }
 0x3af   :  { %6071 = vtanh.f32 %v4302_v25  ;;  %v4303_v52 = vadd.f32 %v5564_v19, %v4292_v5 }
 0x3b1   :  { %v6068_v21 = vpop.eup %6067  ;;  %6073 = vtanh.f32 %v4303_v52 }
 0x3b2   :  { %v4319_v42 = vrot.slane %v6068_v21, %v9235_v61  ;;  %v4312_v46 = vcombine.high %v6068_v21, %v6068_v21 }
 0x3b3   :  { %v6070_v31 = vpop.eup %6069 }
 0x3b4   :  { %v4327_v34 = vcombine.high %v4319_v42, %v4319_v42  ;;  %v4326_v1 = vrot.slane %v4312_v46, %v9235_v61  ;;  %v8501_v33 = vrot.slane %v6070_v31, %v9235_v61  ;;  %v4329_v40 = vcombine.high %v6070_v31, %v6070_v31 }
 0x3b5   :  { %v8518_v50 = vsel %vm2276_vm7, %v4319_v42, -inf }
 0x3b6   :  { %v4403_v47 = vsel %vm2276_vm7, %v4327_v34, -inf  ;;  %v4328_v0 = vcombine.high %v4326_v1, %v4326_v1  ;;  %v4344_v3 = vcombine.high %v8501_v33, %v8501_v33  ;;  %v8507_v49 = vrot.slane %v4329_v40, %v9235_v61 }
 0x3b7   :  { %v4404_v24 = vrot.slane %v4403_v47, 4  ;;  %v4410_v17 = vsel %vm2276_vm7, %v4326_v1, -inf  ;;  %v4397_v16 = vrot.slane %v8518_v50, 4 }
 0x3b8   :  { %v4417_v18 = vsel %vm2276_vm7, %v4328_v0, -inf  ;;  %v4431_v62 = vsel %vm2276_vm7, %v4344_v3, -inf  ;;  %v4345_v54 = vcombine.high %v8507_v49, %v8507_v49  ;;  %v4411_v21 = vrot.slane %v4410_v17, 4 }
 0x3b9   :  { %v6072_v29 = vpop.eup %6071  ;;  %v4405_v38 = vmax.f32 %v4403_v47, %v4404_v24  ;;  %v4418_v30 = vrot.slane %v4417_v18, 4  ;;  %v4432_v6 = vrot.slane %v4431_v62, 4 }
 0x3ba   :  { %v4353_v27 = vrot.slane %v6072_v29, %v9235_v61  ;;  %v4346_v39 = vcombine.high %v6072_v29, %v6072_v29  ;;  %v4445_v28 = vsel %vm2276_vm7, %v4345_v54, -inf }
 0x3bb   :  { %v6074_v7 = vpop.eup %6073  ;;  %v4406_v23 = vrot.slane %v4405_v38, 2  ;;  %v4419_v60 = vmax.f32 %v4417_v18, %v4418_v30  ;;  %v4433_v20 = vmax.f32 %v4431_v62, %v4432_v6  ;;  %v4446_v58 = vrot.slane %v4445_v28, 4 }
 0x3bc   :  { %v4361_v13 = vcombine.high %v4353_v27, %v4353_v27  ;;  %v4370_v26 = vrot.slane %v6074_v7, %v9235_v61  ;;  %v4360_v12 = vrot.slane %v4346_v39, %v9235_v61  ;;  %v4363_v36 = vcombine.high %v6074_v7, %v6074_v7 }
 0x3bd   :  { %v4407_v41 = vmax.f32 %v4405_v38, %v4406_v23  ;;  %v4420_v51 = vrot.slane %v4419_v60, 2  ;;  %v4447_v53 = vmax.f32 %v4445_v28, %v4446_v58  ;;  %v4434_v15 = vrot.slane %v4433_v20, 2 }
 0x3be   :  { %v4459_v14 = vsel %vm2276_vm7, %v4361_v13, -inf  ;;  %v4378_v57 = vcombine.high %v4370_v26, %v4370_v26  ;;  %v4362_v8 = vcombine.high %v4360_v12, %v4360_v12  ;;  %v4377_v32 = vrot.slane %v4363_v36, %v9235_v61 }
 0x3bf   :  { %v4408_v43 = vrot.slane %v4407_v41, 1  ;;  %v4421_v63 = vmax.f32 %v4419_v60, %v4420_v51  ;;  %v4460_v22 = vrot.slane %v4459_v14, 4  ;;  %v4448_v10 = vrot.slane %v4447_v53, 2 }
 0x3c0   :  { %v4487_v11 = vsel %vm2276_vm7, %v4378_v57, -inf  ;;  %v4473_v2 = vsel %vm2276_vm7, %v4362_v8, -inf  ;;  %v4379_v19 = vcombine.high %v4377_v32, %v4377_v32  ;;  %v4435_v5 = vmax.f32 %v4433_v20, %v4434_v15 }
 0x3c1   :  { %v8525_v35 = vmax.f32 %v4407_v41, %v4408_v43  ;;  %v4422_v9 = vrot.slane %v4421_v63, 1  ;;  %v4461_v56 = vmax.f32 %v4459_v14, %v4460_v22  ;;  %v4488_v44 = vrot.slane %v4487_v11, 4 }
 0x3c2   :  { %v4474_v48 = vrot.slane %v4473_v2, 4  ;;  %v4501_v37 = vsel %vm2276_vm7, %v4379_v19, -inf  ;;  %v4452_v52 = vsel %vm2276_vm7, %v4353_v27, -inf  ;;  %v4449_v40 = vmax.f32 %v4447_v53, %v4448_v10 }
 0x3c3   :  { %4526 = vrot.lane.b32.xlu0 %v8525_v35, %s6104_s4  ;;  %v8531_v45 = vmax.f32 %v4421_v63, %v4422_v9  ;;  %v4462_v59 = vrot.slane %v4461_v56, 2  ;;  %v4489_v4 = vmax.f32 %v4487_v11, %v4488_v44  ;;  %v4502_v55 = vrot.slane %v4501_v37, 4 }
 0x3c4   :  { %v4475_v25 = vmax.f32 %v4473_v2, %v4474_v48  ;;  %v4453_v34 = vrot.slane %v4452_v52, 4  ;;  %v4466_v47 = vsel %vm2276_vm7, %v4360_v12, -inf  ;;  %v4480_v0 = vsel %vm2276_vm7, %v4370_v26, -inf }
 0x3c5   :  { %4530 = vrot.lane.b32.xlu1 %v8531_v45, %s6104_s4  ;;  %v4463_v42 = vmax.f32 %v4461_v56, %v4462_v59  ;;  %v4490_v46 = vrot.slane %v4489_v4, 2  ;;  %v4503_v31 = vmax.f32 %v4501_v37, %v4502_v55  ;;  %v4467_v29 = vrot.slane %v4466_v47, 4 }
 0x3c6   :  { %v4476_v1 = vrot.slane %v4475_v25, 2  ;;  %v4454_v62 = vmax.f32 %v4452_v52, %v4453_v34  ;;  %v4481_v38 = vrot.slane %v4480_v0, 4  ;;  %v4494_v30 = vsel %vm2276_vm7, %v4377_v32, -inf }
 0x3c7   :  { %v4464_v3 = vrot.slane %v4463_v42, 1  ;;  %v4491_v24 = vmax.f32 %v4489_v4, %v4490_v46  ;;  %v4504_v18 = vrot.slane %v4503_v31, 2  ;;  %v4468_v23 = vmax.f32 %v4466_v47, %v4467_v29 }
 0x3c8   :  { %v4477_v54 = vmax.f32 %v4475_v25, %v4476_v1  ;;  %v4455_v28 = vrot.slane %v4454_v62, 2  ;;  %v4482_v60 = vmax.f32 %v4480_v0, %v4481_v38  ;;  %v4495_v20 = vrot.slane %v4494_v30, 4  ;;  %v5968_v0 = vld [vmem:[%s8799_s5 + $0x40] sm:$0xff]   ;;  %v5974_v38 = vld [vmem:[%s8799_s5 + $0xc8] sm:$0xff]  }
 0x3c9   :  { %v8539_v6 = vmax.f32 %v4463_v42, %v4464_v3  ;;  %v4492_v27 = vrot.slane %v4491_v24, 1  ;;  %v4505_v39 = vmax.f32 %v4503_v31, %v4504_v18  ;;  %v4424_v26 = vsel %vm2276_vm7, %v8501_v33, -inf  ;;  %v5969_v3 = vld [vmem:[%s8799_s5] sm:$0xff]   ;;  %5686 = vmatprep.subr.bf16.mxu1 %v5968_v0 }
 0x3ca   :  { %v4478_v7 = vrot.slane %v4477_v54, 1  ;;  %v4436_v12 = vrot.slane %v4435_v5, 1  ;;  %v4469_v36 = vrot.slane %v4468_v23, 2  ;;  %v4496_v41 = vmax.f32 %v4494_v30, %v4495_v20  ;;  %v5971_v18 = vld [vmem:[%s8799_s5 + $0x80] sm:$0xff]   ;;  %5687 = vmatpush3.bf16.msra.mxu1 %v5969_v3  ;;  %v5973_v30 = vld [vmem:[%s8799_s5 + $0x8] sm:$0xff]   ;;  %v5977_v20 = vld [vmem:[%s8799_s5 + $0x10] sm:$0xff]  }
 0x3cb   :  { %4542 = vrot.lane.b32.xlu0 %v8539_v6, %s6104_s4  ;;  %v8543_v58 = vmax.f32 %v4491_v24, %v4492_v27  ;;  %v4506_v13 = vrot.slane %v4505_v39, 1  ;;  %v4398_v51 = vmax.f32 %v8518_v50, %v4397_v16  ;;  %v4456_v14 = vmax.f32 %v4454_v62, %v4455_v28  ;;  %v5970_v24 = vld [vmem:[%s8799_s5 + $0xc0] sm:$0xff]   ;;  %v5972_v62 = vld [vmem:[%s8799_s5 + $0x48] sm:$0xff]   ;;  %v5976_v28 = vld [vmem:[%s8799_s5 + $0x50] sm:$0xff]  }
 0x3cc   :  { %v8550_v53 = vmax.f32 %v4477_v54, %v4478_v7  ;;  %v4483_v57 = vrot.slane %v4482_v60, 2  ;;  %v4450_v8 = vrot.slane %v4449_v40, 1  ;;  %v4412_v32 = vmax.f32 %v4410_v17, %v4411_v21  ;;  %5708 = vmatprep.subr.bf16.mxu0 %v5970_v24  ;;  %5688 = vmatprep.subr.bf16.mxu1 %v5972_v62 }
 0x3cd   :  { %4550 = vrot.lane.b32.xlu1 %v8543_v58, %s6104_s4  ;;  %v4425_v43 = vrot.slane %v4424_v26, 4  ;;  %v8554_v63 = vmax.f32 %v4505_v39, %v4506_v13  ;;  %v4470_v33 = vmax.f32 %v4468_v23, %v4469_v36  ;;  %v4497_v22 = vrot.slane %v4496_v41, 2  ;;  %5709 = vmatpush3.bf16.msra.mxu0 %v5971_v18  ;;  %v5975_v39 = vld [vmem:[%s8799_s5 + $0x88] sm:$0xff]   ;;  %v5978_v13 = vld [vmem:[%s8799_s5 + $0xd0] sm:$0xff]  }
 0x3ce   :  { %v4438_v50 = vsel %vm2276_vm7, %v8507_v49, -inf  ;;  %v8558_v11 = vmax.f32 %v4435_v5, %v4436_v12  ;;  %v4399_v2 = vrot.slane %v4398_v51, 2  ;;  %v4457_v19 = vrot.slane %v4456_v14, 1  ;;  %5710 = vmatprep.subr.bf16.mxu0 %v5974_v38  ;;  %5689 = vmatpush3.bf16.msra.mxu1 %v5973_v30  ;;  %v5980_v12 = vld [vmem:[%s8799_s5 + $0x58] sm:$0xff]   ;;  %v5994_v38 = vld [vmem:[%s8799_s5 + $0xf0] sm:$0xff]  }
 0x3cf   :  { %4546 = vrot.lane.b32.xlu0 %v8550_v53, %s6104_s4  ;;  %v4484_v15 = vmax.f32 %v4482_v60, %v4483_v57  ;;  %v4426_v17 = vmax.f32 %v4424_v26, %v4425_v43  ;;  %v4439_v9 = vrot.slane %v4438_v50, 4  ;;  %v8562_v56 = vmax.f32 %v4449_v40, %v4450_v8  ;;  %5690 = vmatprep.subr.bf16.mxu1 %v5976_v28  ;;  %v5979_v26 = vld [vmem:[%s8799_s5 + $0x90] sm:$0xff]   ;;  %v5981_v57 = vld [vmem:[%s8799_s5 + $0x18] sm:$0xff]  }
 0x3d0   :  { %v4471_v44 = vrot.slane %v4470_v33, 1  ;;  %v4498_v48 = vmax.f32 %v4496_v41, %v4497_v22  ;;  %v4413_v37 = vrot.slane %v4412_v32, 2  ;;  %v8568_v49 = vmax.f32 %v4456_v14, %v4457_v19  ;;  %v5982_v8 = vld [vmem:[%s8799_s5 + $0xd8] sm:$0xff]   ;;  %v5984_v22 = vld [vmem:[%s8799_s5 + $0x60] sm:$0xff]  }
 0x3d1   :  { %4554 = vrot.lane.b32.xlu1 %v8554_v63, %s6104_s4  ;;  %v4440_v10 = vmax.f32 %v4438_v50, %v4439_v9  ;;  %v4485_v16 = vrot.slane %v4484_v15, 1  ;;  %v4400_v59 = vmax.f32 %v4398_v51, %v4399_v2  ;;  %v4427_v4 = vrot.slane %v4426_v17, 2  ;;  %5711 = vmatpush3.bf16.msra.mxu0 %v5975_v39 }
 0x3d2   :  { %v8572_v55 = vmax.f32 %v4470_v33, %v4471_v44  ;;  %v4499_v25 = vrot.slane %v4498_v48, 1  ;;  %v4414_v5 = vmax.f32 %v4412_v32, %v4413_v37  ;;  %5691 = vmatpush3.bf16.msra.mxu1 %v5977_v20  ;;  %5712 = vmatprep.subr.bf16.mxu0 %v5978_v13  ;;  %v5988_v37 = vld [vmem:[%s8799_s5 + $0x68] sm:$0xff]   ;;  %vm4640_vm7 = vcmask 1041920  }
 0x3d3   :  { %4534 = vrot.lane.b32.xlu0 %v8558_v11, %s6104_s4  ;;  %v4441_v52 = vrot.slane %v4440_v10, 2  ;;  %v8576_v21 = vmax.f32 %v4484_v15, %v4485_v16  ;;  %v4401_v42 = vrot.slane %v4400_v59, 1  ;;  %v4428_v46 = vmax.f32 %v4426_v17, %v4427_v4  ;;  %5692 = vmatprep.subr.bf16.mxu1 %v5980_v12  ;;  %v5987_v17 = vld [vmem:[%s8799_s5 + $0xa0] sm:$0xff]  }
 0x3d4   :  { %v8580_v31 = vmax.f32 %v4498_v48, %v4499_v25  ;;  %v4415_v34 = vrot.slane %v4414_v5, 1 }
 0x3d5   :  { %4538 = vrot.lane.b32.xlu1 %v8562_v56, %s6104_s4  ;;  %v4442_v1 = vmax.f32 %v4440_v10, %v4441_v52  ;;  %v8584_v40 = vmax.f32 %v4400_v59, %v4401_v42  ;;  %v4429_v47 = vrot.slane %v4428_v46, 1  ;;  %5713 = vmatpush3.bf16.msra.mxu0 %v5979_v26  ;;  %v5990_v10 = vld [vmem:[%s8799_s5 + $0xe8] sm:$0xff]   ;;  %v5995_v26 = vld [vmem:[%s8799_s5 + $0xb0] sm:$0xff]  }
 0x3d6   :  { %v8603_v54 = vmax.f32 %v4414_v5, %v4415_v34  ;;  %5693 = vmatpush3.bf16.msra.mxu1 %v5981_v57  ;;  %5714 = vmatprep.subr.bf16.mxu0 %v5982_v8 }
 0x3d7   :  { %4540 = vrot.lane.b32.xlu0 %v8568_v49, %s6104_s4  ;;  %v4443_v29 = vrot.slane %v4442_v1, 1  ;;  %v8613_v27 = vmax.f32 %v4428_v46, %v4429_v47  ;;  %5694 = vmatprep.subr.bf16.mxu1 %v5984_v22  ;;  %v5992_v46 = vld [vmem:[%s8799_s5 + $0x70] sm:$0xff]   ;;  %v5991_v47 = vld [vmem:[%s8799_s5 + $0xa8] sm:$0xff]  }
 0x3d9   :  { %4544 = vrot.lane.b32.xlu1 %v8572_v55, %s6104_s4  ;;  %v8623_v7 = vmax.f32 %v4442_v1, %v4443_v29  ;;  %v5993_v29 = vld [vmem:[%s8799_s5 + $0x30] sm:$0xff]  }
 0x3db   :  { %4548 = vrot.lane.b32.xlu0 %v8576_v21, %s6104_s4 }
 0x3dd   :  { %4552 = vrot.lane.b32.xlu1 %v8580_v31, %s6104_s4 }
 0x3df   :  { %4524 = vrot.lane.b32.xlu0 %v8584_v40, %s6104_s4 }
 0x3e1   :  { %4528 = vrot.lane.b32.xlu1 %v8603_v54, %s6104_s4 }
 0x3e3   :  { %4532 = vrot.lane.b32.xlu0 %v8613_v27, %s6104_s4 }
 0x3e5   :  { %4536 = vrot.lane.b32.xlu1 %v8623_v7, %s6104_s4 }
 0x435   :  { %v4527_v23 = vpop.permute.xlu0 %4526 }
 0x436   :  { %v4573_v41 = vmax.f32 %v8525_v35, %v4527_v23  ;;  %v5996_v23 = vld [vmem:[%s8799_s5 + $0x78] sm:$0xff]  }
 0x437   :  { %v4531_v60 = vpop.permute.xlu1 %4530 }
 0x438   :  { %v4575_v33 = vmax.f32 %v8531_v45, %v4531_v60  ;;  %v4622_v50 = vrot.slane %v4573_v41, %v9235_v61  ;;  %v5985_v45 = vld [vmem:[%s8799_s5 + $0x20] sm:$0xff]  }
 0x439   :  { %5695 = vmatpush3.bf16.msra.mxu1 %v5985_v45 }
 0x43a   :  { %v4675_v16 = vrot.slane %v4575_v33, %v9235_v61  ;;  %5696 = vmatprep.subr.bf16.mxu1 %v5988_v37 }
 0x43d   :  { %v4543_v36 = vpop.permute.xlu0 %4542 }
 0x43e   :  { %v4581_v51 = vmax.f32 %v8539_v6, %v4543_v36  ;;  %v5983_v6 = vld [vmem:[%s8799_s5 + $0x98] sm:$0xff]  }
 0x43f   :  { %v4551_v14 = vpop.permute.xlu1 %4550  ;;  %5715 = vmatpush3.bf16.msra.mxu0 %v5983_v6 }
 0x440   :  { %v4629_v32 = vrot.slane %v4581_v51, %v9235_v61  ;;  %v4585_v43 = vmax.f32 %v8543_v58, %v4551_v14  ;;  %v5986_v58 = vld [vmem:[%s8799_s5 + $0xe0] sm:$0xff]   ;;  %v5998_v51 = vld [vmem:[%s8799_s5 + $0xf8] sm:$0xff]  }
 0x441   :  { %v4547_v35 = vpop.permute.xlu0 %4546  ;;  %5716 = vmatprep.subr.bf16.mxu0 %v5986_v58 }
 0x442   :  { %v4632_v2 = vrot.slane %v4629_v32, 7  ;;  %v4583_v19 = vmax.f32 %v8550_v53, %v4547_v35  ;;  %v4734_v9 = vrot.slane %v4585_v43, %v9235_v61 }
 0x443   :  { %v4555_v15 = vpop.permute.xlu1 %4554  ;;  %5717 = vmatpush3.bf16.msra.mxu0 %v5987_v17 }
 0x444   :  { %v4682_v44 = vrot.slane %v4583_v19, %v9235_v61  ;;  %v4587_v53 = vmax.f32 %v8554_v63, %v4555_v15  ;;  %v4633_v48 = vsel %vm3398_vm8, %v4632_v2, %v4622_v50  ;;  %v5989_v63 = vld [vmem:[%s8799_s5 + $0x28] sm:$0xff]   ;;  %v4737_v0 = vrot.slane %v4734_v9, 7  ;;  %5718 = vmatprep.subr.bf16.mxu0 %v5990_v10 }
 0x445   :  { %v4535_v59 = vpop.permute.xlu0 %4534  ;;  %v4634_v4 = vsel %vm3402_vm10, %v4632_v2, %v4633_v48  ;;  %5697 = vmatpush3.bf16.msra.mxu1 %v5989_v63 }
 0x446   :  { %v4685_v25 = vrot.slane %v4682_v44, 7  ;;  %v4786_v5 = vrot.slane %v4587_v53, %v9235_v61  ;;  %v4577_v52 = vmax.f32 %v8558_v11, %v4535_v59  ;;  %v4635_v42 = vsel %vm3406_vm12, %v4632_v2, %v4634_v4  ;;  %5698 = vmatprep.subr.bf16.mxu1 %v5992_v46 }
 0x447   :  { %v4539_v34 = vpop.permute.xlu1 %4538  ;;  %v4636_v1 = vsel %vm3410_vm14, %v4632_v2, %v4635_v42  ;;  %5719 = vmatpush3.bf16.msra.mxu0 %v5991_v47  ;;  %v5999_v2 = vld [vmem:[%s8799_s5 + $0xb8] sm:$0xff]  }
 0x448   :  { %v4727_v3 = vrot.slane %v4577_v52, %v9235_v61  ;;  %v4579_v11 = vmax.f32 %v8562_v56, %v4539_v34  ;;  %4637 = vrot.lane.b32.xlu0 %v4636_v1, %s6104_s4  ;;  %v4686_v24 = vsel %vm3398_vm8, %v4685_v25, %v4675_v16  ;;  %v4789_v30 = vrot.slane %v4786_v5, 7  ;;  %5720 = vmatprep.subr.bf16.mxu0 %v5994_v38 }
 0x449   :  { %v4541_v18 = vpop.permute.xlu0 %4540  ;;  %v4687_v62 = vsel %vm3402_vm10, %v4685_v25, %v4686_v24  ;;  %5699 = vmatpush3.bf16.msra.mxu1 %v5993_v29 }
 0x44a   :  { %v4738_v56 = vsel %vm3398_vm8, %v4737_v0, %v4727_v3  ;;  %v4779_v39 = vrot.slane %v4579_v11, %v9235_v61  ;;  %v4688_v28 = vsel %vm3406_vm12, %v4685_v25, %v4687_v62  ;;  %v4580_v36 = vmax.f32 %v8568_v49, %v4541_v18  ;;  %v5997_v49 = vld [vmem:[%s8799_s5 + $0x38] sm:$0xff]   ;;  %5700 = vmatprep.subr.bf16.mxu1 %v5996_v23 }
 0x44b   :  { %v4545_v60 = vpop.permute.xlu1 %4544  ;;  %v4689_v20 = vsel %vm3410_vm14, %v4685_v25, %v4688_v28  ;;  %v4739_v13 = vsel %vm3402_vm10, %v4737_v0, %v4738_v56  ;;  %5721 = vmatpush3.bf16.msra.mxu0 %v5995_v26 }
 0x44c   :  { %v4790_v12 = vsel %vm3398_vm8, %v4789_v30, %v4779_v39  ;;  %4690 = vrot.lane.b32.xlu1 %v4689_v20, %s6104_s4  ;;  %v4740_v41 = vsel %vm3406_vm12, %v4737_v0, %v4739_v13  ;;  %v4582_v14 = vmax.f32 %v8572_v55, %v4545_v60  ;;  %v4603_v6 = vrot.slane %v4580_v36, %v9235_v61 }
 0x44d   :  { %v4549_v57 = vpop.permute.xlu0 %4548  ;;  %v4741_v8 = vsel %vm3410_vm14, %v4737_v0, %v4740_v41  ;;  %v4791_v32 = vsel %vm3402_vm10, %v4789_v30, %v4790_v12  ;;  %5722 = vmatprep.subr.bf16.mxu0 %v5998_v51  ;;  %5701 = vmatpush3.bf16.msra.mxu1 %v5997_v49  ;;  %v6001_v41 = vld [vmem:[%s8801_s7] sm:$0xff]   ;;  %v6105_v51 = vmov 0.0  }
 0x44e   :  { %4742 = vrot.lane.b32.xlu0 %v4741_v8, %s6104_s4  ;;  %v4792_v43 = vsel %vm3406_vm12, %v4789_v30, %v4791_v32  ;;  %v4584_v33 = vmax.f32 %v8576_v21, %v4549_v57  ;;  %v4657_v22 = vrot.slane %v4582_v14, %v9235_v61  ;;  %v4606_v58 = vrot.slane %v4603_v6, 7  ;;  %5733 = vmatprep.subr.bf16.mxu1 %v6105_v51  ;;  %v5565_v57 = vld [vmem:[%s8800_s6] ss:$0 sm:$0xff]  ;;  %s6107_s6 = smov [#allocation3]  }
 0x44f   :  { %v4553_v35 = vpop.permute.xlu1 %4552  ;;  %v4793_v55 = vsel %vm3410_vm14, %v4789_v30, %v4792_v43  ;;  %5723 = vmatpush3.bf16.msra.mxu0 %v5999_v2  ;;  %s5244_s0 = sshll.u32 %s6107_s6, 4  ;;  %s5245_s0 = int_to_ptr.vmem [resolvable:$true] %s5244_s0 }
 0x450   :  { %4794 = vrot.lane.b32.xlu1 %v4793_v55, %s6104_s4  ;;  %v4586_v19 = vmax.f32 %v8580_v31, %v4553_v35  ;;  %v4709_v15 = vrot.slane %v4584_v33, %v9235_v61  ;;  %v4660_v44 = vrot.slane %v4657_v22, 7  ;;  %s6077_s17 = scalar_lea.vmem %s5245_s0, 32  ;;  %p6082_p1 = scmp.lt.s32.totalorder %s5245_s0, %s5245_s0 }
 0x451   :  { %v4525_v50 = vpop.permute.xlu0 %4524  ;;  %p6078_p0 = scmp.ne.s32.totalorder %s5245_s0, %s6077_s17  ;;  %p6083_p2 = scmp.lt.s32.totalorder %s6077_s17, %s6077_s17 }
 0x452   :  { %v4572_v21 = vmax.f32 %v8584_v40, %v4525_v50  ;;  %v4761_v48 = vrot.slane %v4586_v19, %v9235_v61  ;;  %v4712_v40 = vrot.slane %v4709_v15, 7  ;;  %v5598_v15 = vld [vmem:[%s8802_s8] ss:$0 sm:$0xff] }
 0x453   :  { %v4529_v45 = vpop.permute.xlu1 %4528  ;;  %p6084_p3 = por %p6083_p2, %p6082_p1 }
 0x454   :  { %v4596_v17 = vrot.slane %v4572_v21, %v9235_v61  ;;  %v4574_v9 = vmax.f32 %v8603_v54, %v4529_v45  ;;  %v4764_v42 = vrot.slane %v4761_v48, 7 }
 0x455   :  { %v4533_v53 = vpop.permute.xlu0 %4532  ;;  %p6085_p4 = pnand %p6084_p3, %p6078_p0 }
 0x456   :  { %v4607_v37 = vsel %vm3398_vm8, %v4606_v58, %v4596_v17  ;;  %v4650_v10 = vrot.slane %v4574_v9, %v9235_v61  ;;  %v4576_v31 = vmax.f32 %v8613_v27, %v4533_v53 }
 0x457   :  { %v4608_v16 = vsel %vm3402_vm10, %v4606_v58, %v4607_v37  ;;  %v4537_v59 = vpop.permute.xlu1 %4536 }
 0x458   :  { %v4661_v4 = vsel %vm3398_vm8, %v4660_v44, %v4650_v10  ;;  %v4702_v63 = vrot.slane %v4576_v31, %v9235_v61  ;;  %v4578_v54 = vmax.f32 %v8623_v7, %v4537_v59  ;;  %v4609_v25 = vsel %vm3406_vm12, %v4606_v58, %v4608_v16 }
 0x459   :  { %v4662_v5 = vsel %vm3402_vm10, %v4660_v44, %v4661_v4  ;;  %v4610_v52 = vsel %vm3410_vm14, %v4606_v58, %v4609_v25 }
 0x45a   :  { %v4713_v27 = vsel %vm3398_vm8, %v4712_v40, %v4702_v63  ;;  %v4754_v46 = vrot.slane %v4578_v54, %v9235_v61  ;;  %4613 = vst.msk [vmem:[#allocation2] sm:$0x3] %vm4612_vm2, %v4610_v52  ;;  %v4663_v34 = vsel %vm3406_vm12, %v4660_v44, %v4662_v5 }
 0x45b   :  { %v4714_v1 = vsel %vm3402_vm10, %v4712_v40, %v4713_v27  ;;  %v4664_v47 = vsel %vm3410_vm14, %v4660_v44, %v4663_v34 }
 0x45c   :  { %v4765_v7 = vsel %vm3398_vm8, %v4764_v42, %v4754_v46  ;;  %4666 = vst.msk [vmem:[#allocation2 + $0x2] sm:$0x3] %vm4612_vm2, %v4664_v47  ;;  %v4715_v0 = vsel %vm3406_vm12, %v4712_v40, %v4714_v1  ;;  %vm6106_vm8 = vmmov 0  }
 0x45d   :  { %v4766_v3 = vsel %vm3402_vm10, %v4764_v42, %v4765_v7  ;;  %v4716_v11 = vsel %vm3410_vm14, %v4712_v40, %v4715_v0  ;;  %vm5193_vm10 = vcmask 261120  }
 0x45e   :  { %4718 = vst.msk [vmem:[#allocation2 + $0x4] sm:$0x3] %vm4612_vm2, %v4716_v11  ;;  %v4767_v24 = vsel %vm3406_vm12, %v4764_v42, %v4766_v3 }
 0x45f   :  { %v4768_v18 = vsel %vm3410_vm14, %v4764_v42, %v4767_v24 }
 0x460   :  { %4770 = vst.msk [vmem:[#allocation2 + $0x6] sm:$0x3] %vm4612_vm2, %v4768_v18 }
 0x4ba   :  { %v4638_v62 = vpop.permute.xlu0 %4637 }
 0x4bb   :  { %4641 = vst.msk [vmem:[#allocation2] sm:$0x3] %vm4640_vm7, %v4638_v62 }
 0x4be   :  { %v4691_v29 = vpop.permute.xlu1 %4690 }
 0x4bf   :  { %4693 = vst.msk [vmem:[#allocation2 + $0x2] sm:$0x3] %vm4640_vm7, %v4691_v29 }
 0x4c0   :  { %v4743_v38 = vpop.permute.xlu0 %4742 }
 0x4c1   :  { %4745 = vst.msk [vmem:[#allocation2 + $0x4] sm:$0x3] %vm4640_vm7, %v4743_v38 }
 0x4c2   :  { %v4795_v30 = vpop.permute.xlu1 %4794 }
 0x4c3   :  { %4797 = vst.msk [vmem:[#allocation2 + $0x6] sm:$0x3] %vm4640_vm7, %v4795_v30 }
 0x4ca   :  { %v4798_v56 = vld [vmem:[#allocation2] sm:$0xff] }
 0x4cb   :  { %v4807_v39 = vrot.slane %v4798_v56, %v9235_v61  ;;  %v4800_v28 = vcombine.high %v4798_v56, %v4798_v56 }
 0x4cd   :  { %v4815_v23 = vcombine.high %v4807_v39, %v4807_v39  ;;  %v4814_v60 = vrot.slane %v4800_v28, %v9235_v61  ;;  %v4821_v26 = vpack.c.bf16 %v4807_v39, %v4807_v39  ;;  %v6002_v61 = vld [vmem:[%s8801_s7 + $0x8] sm:$0xff]  }
 0x4cf   :  { %v4822_v20 = vpack.c.bf16 %v4815_v23, %v4815_v23  ;;  %v4816_v13 = vcombine.high %v4814_v60, %v4814_v60  ;;  %v4823_v36 = vpack.c.bf16 %v4814_v60, %v4814_v60 }
 0x4d1   :  { %5120 = vmatprep.mubr.bf16.mxu1 %v4822_v20  ;;  %v4824_v12 = vpack.c.bf16 %v4816_v13, %v4816_v13 }
 0x4d2   :  { %5121 = vmatmul.mubr.bf16.vlgmr.msra.gmra.mrb[24].mxu1 %v4821_v26 }
 0x4d3   :  { %5160 = vmatprep.mubr.bf16.mxu0 %v4824_v12  ;;  %5737 = vmatprep.mubr.msk.bf16.mxu1 %vm6106_vm8, %v6105_v51 }
 0x4d4   :  { %5161 = vmatmul.mubr.bf16.vlgmr.msra.gmra.mrb[32].mxu0 %v4823_v36  ;;  %5734 = vmatpush3.bf16.msra.mxu1 %v6001_v41 }
 0x4d5   :  { %5735 = vmatprep.subr.bf16.mxu1 %v6105_v51 }
 0x4d8   :  { %5736 = vmatpush3.bf16.msra.mxu1 %v6002_v61 }
 0x5a5   :  { %v5702_v14 = vpop.f32.mrb[24].mxu1 }
 0x5a6   :  { %v5703_v8 = vpop.f32.mrb[25].mxu1 }
 0x5a7   :  { %v5704_v32 = vadd.f32 %v5703_v8, %v5702_v14  ;;  %v5705_v49 = vpop.f32.mrb[26].mxu1  ;;  %v5724_v43 = vpop.f32.mrb[32].mxu0 }
 0x5a8   :  { %v5706_v33 = vpop.f32.mrb[27].mxu1  ;;  %v5725_v35 = vpop.f32.mrb[33].mxu0 }
 0x5a9   :  { %v5123_v55 = vadd.f32 %v5704_v32, %v5565_v57  ;;  %v5726_v6 = vadd.f32 %v5725_v35, %v5724_v43  ;;  %v5727_v22 = vpop.f32.mrb[34].mxu0 }
 0x5aa   :  { %v5728_v50 = vpop.f32.mrb[35].mxu0 }
 0x5ab   :  { %v5163_v2 = vadd.f32 %v5726_v6, %v5123_v55 }
 0x5ad   :  { %6075 = vtanh.f32 %v5163_v2 }
 0x5b7   :  { %v6076_v19 = vpop.eup %6075 }
 0x5b8   :  { %v5169_v21 = vpack.c.bf16 %v6076_v19, %v6076_v19 }
 0x5ba   :  { %5738 = vmatmul.mubr.msk.bf16.vlgmr.msra.gmra.mrb[28].mxu1 %vm5193_vm10, %v5169_v21 }
 0x68d   :  { %v5231_v45 = vpop.f32.mrb[28].mxu1 }
 0x68e   :  { %v5232_v58 = vadd.f32 %v5598_v15, %v5231_v45  ;;  %v5739_v17 = vpop.f32.mrb[29].mxu1 }
 0x68f   :  { %v5234_v9 = vpop.f32.mrb[30].mxu1 }
 0x690   :  { %5237 = vst [vmem:[#allocation3] sm:$0x3] %v5232_v58  ;;  %v5740_v44 = vpop.f32.mrb[31].mxu1 }
 0x691   :  { %6088 = shalt.err (!%p6085_p4)
}
 0x692   :  { %s6089_s8 = scalar_lea.hbm %s8803_s9, 32 }
 0x693   :  { %p6090_p5 = scmp.ne.s32.totalorder %s8803_s9, %s6089_s8  ;;  %p6093_p6 = scmp.lt.u32.totalorder %s6089_s8, %s8803_s9 }
 0x695   :  { %p6095_p7 = pnand %p6093_p6, %p6090_p5 }
 0x697   :  { %6098 = shalt.err (!%p6095_p7)
}
 0x698   :  { %5247 = dma.vmem_to_hbm [thread:$0]  %s5245_s0, 32, %s8803_s9, [#allocation4]  }
 0x699   :  { %6099 = dma.done.wait [#allocation4], 32  }
 0x69a   :  { %6100 = vsyncadd [#allocation4], 4294967264 }
 0x69b   :  { %5251 = vsyncpa [#allocation4], 1 }

</bundles_post_ra>
